<compile_context>
chip_gen: v7x
topology: tpu7x:2x2x1
jax: 0.10.0
libtpu: 0.0.40
codegen_flags: <defaults>
</compile_context>

<pallas_src>
import jax
import jax.numpy as jnp
import numpy as np
from jax.experimental import pallas as pl
from jax.experimental.pallas import tpu as pltpu


# ----------------------------------------------------------------------------
# use_conv=True: fused nearest-2x upsample + 3x3 "same" conv.
# ----------------------------------------------------------------------------
def _fused_up_conv_kernel(xp_ref, g_ref, b_ref, o_ref):
    # xp_ref: (1, Hp, Wp, Cin)     full zero-padded NHWC image (VMEM resident)
    # g_ref : (2, 2, 4, Cin, Cout) parity-combined 3x3 weights
    # b_ref : (1, Cout)            bias (f32)
    # o_ref : (1, th, 2, 2, W, Cout); [0, r, a, b] = output row 2*(t*th+r)+a,
    #                                 columns 2j+b, j in [0, W)
    th = o_ref.shape[1]
    W = o_ref.shape[4]
    Cin = xp_ref.shape[3]
    Cout = o_ref.shape[5]
    t = pl.program_id(1)
    row0 = t * th                                  # tile start (padded row coords)
    bias = b_ref[...].astype(jnp.float32)          # (1, Cout), hoisted

    for a in (0, 1):                               # output row parity
        # two source row slabs for this parity: padded rows [row0+a+p, +th)
        slabs = [xp_ref[0, pl.ds(row0 + a + p, th), :, :] for p in (0, 1)]
        for b in (0, 1):                           # output col parity
            acc = None
            for k in range(4):                     # tap = (row slab p, col shift q)
                p, q = divmod(k, 2)
                tap = slabs[p][:, b + q:b + q + W, :].reshape(th * W, Cin)
                d = jnp.dot(tap, g_ref[a, b, k],
                            preferred_element_type=jnp.float32)
                acc = d if acc is None else acc + d
            acc = acc + bias
            o_ref[0, :, a, b, :, :] = acc.reshape(th, W, Cout).astype(o_ref.dtype)


def _combine_weights(wk):
    """wk: (3, 3, Cin, Cout) -> G: (2, 2, 4, Cin, Cout) parity-combined weights.

    G[a, b, 2p+q] is the summed kernel tap applied to the input sample at
    (row slab p, col shift q) for output parity (a, b); matches the kernel's
    slab/shift ordering.
    """
    groups = (((0,), (1, 2)), ((0, 1), (2,)))      # dy/dx taps hitting slab 0 / 1
    outer = []
    for a in (0, 1):
        inner = []
        for b in (0, 1):
            taps = []
            for p in (0, 1):
                for q in (0, 1):
                    k = sum(wk[dy, dx]
                            for dy in groups[a][p] for dx in groups[b][q])
                    taps.append(k)                 # (Cin, Cout)
            inner.append(jnp.stack(taps, axis=0))  # (4, Cin, Cout)
        outer.append(jnp.stack(inner, axis=0))     # (2, 4, Cin, Cout)
    return jnp.stack(outer, axis=0)                # (2, 2, 4, Cin, Cout)


def _pick_th(H, W, Cin, Cout, budget=10 << 20):
    """Largest-enough H tile: th | H, th*W targets >=256 MXU rows, fits VMEM."""
    def step_bytes(th):
        out_blk = 2 * (th * 4 * W * Cout * 4)           # double-buffered out block
        temps = 4 * th * W * (Cin + 2 * Cout)           # f32 tap + accumulator temps
        return out_blk + temps
    ok = [d for d in range(1, H + 1)
          if H % d == 0 and step_bytes(d) <= budget and d * W <= 4096]
    if not ok:
        ok = [1]
    good = [d for d in ok if d * W >= 256]
    return min(good) if good else max(ok)


def _fused_up_conv(xp, g, bias2, out_dtype, th):
    # xp: (N, H+2, W+2, Cin) zero-padded NHWC input
    N, Hp, Wp, Cin = xp.shape
    H, W = Hp - 2, Wp - 2
    Cout = g.shape[-1]
    isz = np.dtype(xp.dtype).itemsize
    gsz = np.dtype(g.dtype).itemsize
    osz = np.dtype(out_dtype).itemsize
    est = (2 * Hp * Wp * Cin * isz            # VMEM-resident image (double-buffered)
           + 2 * 16 * Cin * Cout * gsz        # combined weights
           + 2 * 4 * th * W * Cout * osz      # output block
           + 12 * th * W * (Cin + Cout)       # f32 temporaries
           + (1 << 20))
    vmem_limit = int(min(56 << 20, max(24 << 20, 2 * est)))
    # TODO(synk): for very large images / channel counts (Hp*Wp*Cin or 16*Cin*Cout
    #             beyond VMEM) tile the resident image over H and the contraction
    #             over Cin/Cout instead of keeping them whole in VMEM.
    return pl.pallas_call(
        _fused_up_conv_kernel,
        out_shape=jax.ShapeDtypeStruct((N, H, 2, 2, W, Cout), out_dtype),
        grid=(N, H // th),
        in_specs=[
            pl.BlockSpec((1, Hp, Wp, Cin), lambda n, t: (n, 0, 0, 0)),
            pl.BlockSpec((2, 2, 4, Cin, Cout), lambda n, t: (0, 0, 0, 0, 0)),
            pl.BlockSpec((1, Cout), lambda n, t: (0, 0)),
        ],
        out_specs=pl.BlockSpec((1, th, 2, 2, W, Cout),
                               lambda n, t: (n, t, 0, 0, 0, 0)),
        compiler_params=pltpu.CompilerParams(
            dimension_semantics=("parallel", "parallel"),
            vmem_limit_bytes=vmem_limit),
    )(xp, g, bias2)


# ----------------------------------------------------------------------------
# use_conv=False: nearest-neighbor 2x upsample, no post-kernel transpose.
# ----------------------------------------------------------------------------
def _upsample2x_kernel(x_ref, e_ref, o_ref):
    # x_ref: (tm, W); e_ref: (W, 2W) interleave matrix; o_ref: (tm, 2, 2W)
    v = x_ref[...].astype(jnp.float32)
    vv = jnp.dot(v, e_ref[...], preferred_element_type=jnp.float32)
    vv = vv.astype(o_ref.dtype)          # column-interleaved row (exact: 0/1 weights)
    o_ref[:, 0, :] = vv                  # row duplicate (a = 0)
    o_ref[:, 1, :] = vv                  # row duplicate (a = 1)


def _pick_tm(M, W, itemsize, budget=12 << 20):
    per_row = (2 * W + 2 * 4 * W) * itemsize     # double-buffered in + out rows
    cap = max(8, budget // max(per_row, 1))
    cap = min(cap, M, 4096)
    if M <= 8 or cap >= M:
        return M
    for tm in range(cap - cap % 8, 7, -8):       # prefer a divisor of M
        if M % tm == 0:
            return tm
    return max(8, cap - cap % 8)                 # ragged last block is fine


def _nearest_up2x_nchw(x_nchw):
    N, C, H, W = x_nchw.shape
    M = N * C * H
    isz = np.dtype(x_nchw.dtype).itemsize
    tm = _pick_tm(M, W, isz)
    x2 = x_nchw.reshape(M, W)
    # (W, 2W) duplication matrix: E[j, 2j] = E[j, 2j+1] = 1 (exact interleave on MXU)
    E = jnp.asarray(np.repeat(np.eye(W, dtype=np.float32), 2, axis=1))
    est = (2 * tm * W * isz + 2 * tm * 4 * W * isz
           + 2 * W * 2 * W * 4 + tm * 2 * W * 4 + (1 << 20))
    vmem_limit = int(min(56 << 20, max(24 << 20, 2 * est)))
    out3 = pl.pallas_call(
        _upsample2x_kernel,
        out_shape=jax.ShapeDtypeStruct((M, 2, 2 * W), x_nchw.dtype),
        grid=(pl.cdiv(M, tm),),
        in_specs=[pl.BlockSpec((tm, W), lambda i: (i, 0)),
                  pl.BlockSpec((W, 2 * W), lambda i: (0, 0))],
        out_specs=pl.BlockSpec((tm, 2, 2 * W), lambda i: (i, 0, 0)),
        compiler_params=pltpu.CompilerParams(
            dimension_semantics=("parallel",),
            vmem_limit_bytes=vmem_limit),
    )(x2, E)
    # (M, 2, 2W) == (N, C, H, 2, 2W) -> free row-major merge to (N, C, 2H, 2W)
    return out3.reshape(N, C, 2 * H, 2 * W)


# ----------------------------------------------------------------------------
# Module forward (wrapper).  Matches nn.Upsample semantics exactly (NCHW I/O).
# ----------------------------------------------------------------------------
def upsample_forward(x_nchw, weight=None, bias=None, use_conv=True, mxu_dtype=None):
    """x_nchw: (N, C, H, W); weight: (Cout, Cin, 3, 3); bias: (Cout,).

    mxu_dtype: optional compute dtype for activations/weights (e.g. jnp.bfloat16
    on v6e/v7x for ~2-3x MXU throughput); accumulation stays f32.
    """
    N, C, H, W = x_nchw.shape
    if not use_conv:
        return _nearest_up2x_nchw(x_nchw)

    assert weight is not None and bias is not None
    Cout, Cin = weight.shape[0], weight.shape[1]
    assert Cin == C, "Upsample conv expects Cin == channels"

    # TODO(synk): the NHWC<->NCHW transposes and the input zero-pad below are
    #             wrapper-side XLA passes forced by the module's NCHW interface;
    #             if the consumer accepts NHWC, skip the final transpose and the
    #             pad can be folded into the kernel's boundary handling.
    x = jnp.transpose(x_nchw, (0, 2, 3, 1))              # NHWC (C on lanes)
    xp = jnp.pad(x, ((0, 0), (1, 1), (1, 1), (0, 0)))    # pad SMALL input once
    wk = jnp.transpose(weight, (2, 3, 1, 0))             # (3, 3, Cin, Cout)
    g = _combine_weights(wk)                             # (2, 2, 4, Cin, Cout)
    if mxu_dtype is not None:
        xp = xp.astype(mxu_dtype)
        g = g.astype(mxu_dtype)
    th = _pick_th(H, W, Cin, Cout)
    out6 = _fused_up_conv(xp, g, bias.reshape(1, Cout).astype(jnp.float32),
                          x_nchw.dtype, th)              # (N, H, 2, 2, W, Cout)
    # (N, H, a, b, W, Cout) -> (N, Cout, H, a, W, b) -> (N, Cout, 2H, 2W)
    # (the trailing reshape is a free row-major merge of the parity axes)
    return jnp.transpose(out6, (0, 5, 1, 2, 4, 3)).reshape(N, Cout, 2 * H, 2 * W)


if __name__ == "__main__":
    key = jax.random.PRNGKey(0)
    k1, k2, k3 = jax.random.split(key, 3)
    N, C, H, W = 2, 4, 16, 16

    x = jax.random.normal(k1, (N, C, H, W), jnp.float32)
    # Deterministic synthetic parameters (nn.Conv2d(channels, channels, 3, padding=1))
    weight = jax.random.normal(k2, (C, C, 3, 3), jnp.float32) * 0.1
    bias = jax.random.normal(k3, (C,), jnp.float32) * 0.1

    out_conv = jax.block_until_ready(upsample_forward(x, weight, bias, use_conv=True))
    out_noconv = jax.block_until_ready(upsample_forward(x, use_conv=False))

    # ---- numpy reference (exact PyTorch semantics) ----
    xn = np.asarray(x); wn = np.asarray(weight); bn = np.asarray(bias)
    up = np.repeat(np.repeat(xn, 2, axis=2), 2, axis=3)            # nearest 2x
    ref_noconv = up
    xpad = np.pad(up, ((0, 0), (0, 0), (1, 1), (1, 1)))
    H2, W2 = 2 * H, 2 * W
    ref = np.tile(bn[None, :, None, None], (N, 1, H2, W2)).astype(np.float32)
    for dy in range(3):
        for dx in range(3):
            ref += np.einsum('oc,nchw->nohw', wn[:, :, dy, dx],
                             xpad[:, :, dy:dy + H2, dx:dx + W2])

    assert out_conv.shape == (N, C, H2, W2) and out_conv.dtype == jnp.float32
    assert out_noconv.shape == (N, C, H2, W2)
    np.testing.assert_allclose(np.asarray(out_noconv), ref_noconv, rtol=1e-5, atol=1e-5)
    np.testing.assert_allclose(np.asarray(out_conv), ref, rtol=1e-4, atol=1e-4)
    print("KERNEL_OK")
</pallas_src>

<mosaic_0001>
module attributes {stable_mosaic.version = 11 : i64} {
  func.func @_fused_up_conv_kernel(%arg0: i32, %arg1: i32, %arg2: memref<1x18x18x4xf32, #tpu.memory_space<vmem>>, %arg3: memref<2x2x4x4x4xf32, #tpu.memory_space<vmem>>, %arg4: memref<1x4xf32, #tpu.memory_space<vmem>>, %arg5: memref<1x16x2x2x16x4xf32, #tpu.memory_space<vmem>>) attributes {dimension_semantics = [#tpu.dimension_semantics<parallel>, #tpu.dimension_semantics<parallel>], iteration_bounds = array<i64: 2, 1>, scalar_prefetch = 0 : i64, scratch_operands = 0 : i64, tpu.core_type = #tpu.core_type<tc>, window_params = [{transform_indices = @transform_0, window_bounds = array<i64: 1, 18, 18, 4>}, {pipeline_mode = #tpu.pipeline_mode<synchronous>, transform_indices = @transform_1, window_bounds = array<i64: 2, 2, 4, 4, 4>}, {pipeline_mode = #tpu.pipeline_mode<synchronous>, transform_indices = @transform_2, window_bounds = array<i64: 1, 4>}, {transform_indices = @transform_3, window_bounds = array<i64: 1, 16, 2, 2, 16, 4>}]} {
    %c16_i32 = arith.constant 16 : i32
    %0 = arith.muli %arg1, %c16_i32 : i32
    %c0 = arith.constant 0 : index
    %c0_0 = arith.constant 0 : index
    %1 = vector.load %arg4[%c0, %c0_0] : memref<1x4xf32, #tpu.memory_space<vmem>>, vector<1x4xf32>
    %c0_i32 = arith.constant 0 : i32
    %2 = arith.addi %0, %c0_i32 : i32
    %c0_i32_1 = arith.constant 0 : i32
    %3 = arith.addi %2, %c0_i32_1 : i32
    %c0_2 = arith.constant 0 : index
    %4 = arith.index_cast %3 : i32 to index
    %c0_3 = arith.constant 0 : index
    %c0_4 = arith.constant 0 : index
    %5 = vector.load %arg2[%c0_2, %4, %c0_3, %c0_4] : memref<1x18x18x4xf32, #tpu.memory_space<vmem>>, vector<1x16x18x4xf32>
    %6 = vector.shape_cast %5 : vector<1x16x18x4xf32> to vector<16x18x4xf32>
    %c0_i32_5 = arith.constant 0 : i32
    %7 = arith.addi %0, %c0_i32_5 : i32
    %c1_i32 = arith.constant 1 : i32
    %8 = arith.addi %7, %c1_i32 : i32
    %c0_6 = arith.constant 0 : index
    %9 = arith.index_cast %8 : i32 to index
    %c0_7 = arith.constant 0 : index
    %c0_8 = arith.constant 0 : index
    %10 = vector.load %arg2[%c0_6, %9, %c0_7, %c0_8] : memref<1x18x18x4xf32, #tpu.memory_space<vmem>>, vector<1x16x18x4xf32>
    %11 = vector.shape_cast %10 : vector<1x16x18x4xf32> to vector<16x18x4xf32>
    %12 = vector.extract_strided_slice %6 {offsets = [0, 0, 0], sizes = [16, 16, 4], strides = [1, 1, 1]} : vector<16x18x4xf32> to vector<16x16x4xf32>
    %13 = vector.shape_cast %12 : vector<16x16x4xf32> to vector<256x4xf32>
    %c0_9 = arith.constant 0 : index
    %c0_10 = arith.constant 0 : index
    %c0_11 = arith.constant 0 : index
    %c0_12 = arith.constant 0 : index
    %c0_13 = arith.constant 0 : index
    %14 = vector.load %arg3[%c0_9, %c0_10, %c0_11, %c0_12, %c0_13] : memref<2x2x4x4x4xf32, #tpu.memory_space<vmem>>, vector<1x1x1x4x4xf32>
    %15 = vector.shape_cast %14 : vector<1x1x1x4x4xf32> to vector<4x4xf32>
    %cst = arith.constant dense<0.000000e+00> : vector<256x4xf32>
    %16 = tpu.matmul %13, %15, %cst {dimension_numbers = #tpu.dot_dimension_numbers<[1], [0], [0], [1], [0, 0, 1, 1], [], []>} : vector<256x4xf32>, vector<4x4xf32>, vector<256x4xf32> -> vector<256x4xf32>
    %17 = vector.extract_strided_slice %6 {offsets = [0, 1, 0], sizes = [16, 16, 4], strides = [1, 1, 1]} : vector<16x18x4xf32> to vector<16x16x4xf32>
    %18 = vector.shape_cast %17 : vector<16x16x4xf32> to vector<256x4xf32>
    %c0_14 = arith.constant 0 : index
    %c0_15 = arith.constant 0 : index
    %c1 = arith.constant 1 : index
    %c0_16 = arith.constant 0 : index
    %c0_17 = arith.constant 0 : index
    %19 = vector.load %arg3[%c0_14, %c0_15, %c1, %c0_16, %c0_17] : memref<2x2x4x4x4xf32, #tpu.memory_space<vmem>>, vector<1x1x1x4x4xf32>
    %20 = vector.shape_cast %19 : vector<1x1x1x4x4xf32> to vector<4x4xf32>
    %cst_18 = arith.constant dense<0.000000e+00> : vector<256x4xf32>
    %21 = tpu.matmul %18, %20, %cst_18 {dimension_numbers = #tpu.dot_dimension_numbers<[1], [0], [0], [1], [0, 0, 1, 1], [], []>} : vector<256x4xf32>, vector<4x4xf32>, vector<256x4xf32> -> vector<256x4xf32>
    %22 = arith.addf %16, %21 : vector<256x4xf32>
    %23 = vector.extract_strided_slice %11 {offsets = [0, 0, 0], sizes = [16, 16, 4], strides = [1, 1, 1]} : vector<16x18x4xf32> to vector<16x16x4xf32>
    %24 = vector.shape_cast %23 : vector<16x16x4xf32> to vector<256x4xf32>
    %c0_19 = arith.constant 0 : index
    %c0_20 = arith.constant 0 : index
    %c2 = arith.constant 2 : index
    %c0_21 = arith.constant 0 : index
    %c0_22 = arith.constant 0 : index
    %25 = vector.load %arg3[%c0_19, %c0_20, %c2, %c0_21, %c0_22] : memref<2x2x4x4x4xf32, #tpu.memory_space<vmem>>, vector<1x1x1x4x4xf32>
    %26 = vector.shape_cast %25 : vector<1x1x1x4x4xf32> to vector<4x4xf32>
    %cst_23 = arith.constant dense<0.000000e+00> : vector<256x4xf32>
    %27 = tpu.matmul %24, %26, %cst_23 {dimension_numbers = #tpu.dot_dimension_numbers<[1], [0], [0], [1], [0, 0, 1, 1], [], []>} : vector<256x4xf32>, vector<4x4xf32>, vector<256x4xf32> -> vector<256x4xf32>
    %28 = arith.addf %22, %27 : vector<256x4xf32>
    %29 = vector.extract_strided_slice %11 {offsets = [0, 1, 0], sizes = [16, 16, 4], strides = [1, 1, 1]} : vector<16x18x4xf32> to vector<16x16x4xf32>
    %30 = vector.shape_cast %29 : vector<16x16x4xf32> to vector<256x4xf32>
    %c0_24 = arith.constant 0 : index
    %c0_25 = arith.constant 0 : index
    %c3 = arith.constant 3 : index
    %c0_26 = arith.constant 0 : index
    %c0_27 = arith.constant 0 : index
    %31 = vector.load %arg3[%c0_24, %c0_25, %c3, %c0_26, %c0_27] : memref<2x2x4x4x4xf32, #tpu.memory_space<vmem>>, vector<1x1x1x4x4xf32>
    %32 = vector.shape_cast %31 : vector<1x1x1x4x4xf32> to vector<4x4xf32>
    %cst_28 = arith.constant dense<0.000000e+00> : vector<256x4xf32>
    %33 = tpu.matmul %30, %32, %cst_28 {dimension_numbers = #tpu.dot_dimension_numbers<[1], [0], [0], [1], [0, 0, 1, 1], [], []>} : vector<256x4xf32>, vector<4x4xf32>, vector<256x4xf32> -> vector<256x4xf32>
    %34 = arith.addf %28, %33 : vector<256x4xf32>
    %35 = vector.broadcast %1 : vector<1x4xf32> to vector<256x4xf32>
    %36 = arith.addf %34, %35 : vector<256x4xf32>
    %37 = vector.shape_cast %36 : vector<256x4xf32> to vector<16x16x4xf32>
    %c0_29 = arith.constant 0 : index
    %c0_30 = arith.constant 0 : index
    %c0_31 = arith.constant 0 : index
    %c0_32 = arith.constant 0 : index
    %c0_33 = arith.constant 0 : index
    %c0_34 = arith.constant 0 : index
    %38 = vector.load %arg5[%c0_29, %c0_30, %c0_31, %c0_32, %c0_33, %c0_34] : memref<1x16x2x2x16x4xf32, #tpu.memory_space<vmem>>, vector<1x16x1x1x16x4xf32>
    %39 = vector.shape_cast %38 : vector<1x16x1x1x16x4xf32> to vector<16x16x4xf32>
    %40 = vector.shape_cast %37 : vector<16x16x4xf32> to vector<1x16x1x1x16x4xf32>
    tpu.vector_store %arg5[%c0_29, %c0_30, %c0_31, %c0_32, %c0_33, %c0_34], %40 {strides = array<i32>} : memref<1x16x2x2x16x4xf32, #tpu.memory_space<vmem>>, vector<1x16x1x1x16x4xf32>,
    %41 = vector.extract_strided_slice %6 {offsets = [0, 1, 0], sizes = [16, 16, 4], strides = [1, 1, 1]} : vector<16x18x4xf32> to vector<16x16x4xf32>
    %42 = vector.shape_cast %41 : vector<16x16x4xf32> to vector<256x4xf32>
    %c0_35 = arith.constant 0 : index
    %c1_36 = arith.constant 1 : index
    %c0_37 = arith.constant 0 : index
    %c0_38 = arith.constant 0 : index
    %c0_39 = arith.constant 0 : index
    %43 = vector.load %arg3[%c0_35, %c1_36, %c0_37, %c0_38, %c0_39] : memref<2x2x4x4x4xf32, #tpu.memory_space<vmem>>, vector<1x1x1x4x4xf32>
    %44 = vector.shape_cast %43 : vector<1x1x1x4x4xf32> to vector<4x4xf32>
    %cst_40 = arith.constant dense<0.000000e+00> : vector<256x4xf32>
    %45 = tpu.matmul %42, %44, %cst_40 {dimension_numbers = #tpu.dot_dimension_numbers<[1], [0], [0], [1], [0, 0, 1, 1], [], []>} : vector<256x4xf32>, vector<4x4xf32>, vector<256x4xf32> -> vector<256x4xf32>
    %46 = vector.extract_strided_slice %6 {offsets = [0, 2, 0], sizes = [16, 16, 4], strides = [1, 1, 1]} : vector<16x18x4xf32> to vector<16x16x4xf32>
    %47 = vector.shape_cast %46 : vector<16x16x4xf32> to vector<256x4xf32>
    %c0_41 = arith.constant 0 : index
    %c1_42 = arith.constant 1 : index
    %c1_43 = arith.constant 1 : index
    %c0_44 = arith.constant 0 : index
    %c0_45 = arith.constant 0 : index
    %48 = vector.load %arg3[%c0_41, %c1_42, %c1_43, %c0_44, %c0_45] : memref<2x2x4x4x4xf32, #tpu.memory_space<vmem>>, vector<1x1x1x4x4xf32>
    %49 = vector.shape_cast %48 : vector<1x1x1x4x4xf32> to vector<4x4xf32>
    %cst_46 = arith.constant dense<0.000000e+00> : vector<256x4xf32>
    %50 = tpu.matmul %47, %49, %cst_46 {dimension_numbers = #tpu.dot_dimension_numbers<[1], [0], [0], [1], [0, 0, 1, 1], [], []>} : vector<256x4xf32>, vector<4x4xf32>, vector<256x4xf32> -> vector<256x4xf32>
    %51 = arith.addf %45, %50 : vector<256x4xf32>
    %52 = vector.extract_strided_slice %11 {offsets = [0, 1, 0], sizes = [16, 16, 4], strides = [1, 1, 1]} : vector<16x18x4xf32> to vector<16x16x4xf32>
    %53 = vector.shape_cast %52 : vector<16x16x4xf32> to vector<256x4xf32>
    %c0_47 = arith.constant 0 : index
    %c1_48 = arith.constant 1 : index
    %c2_49 = arith.constant 2 : index
    %c0_50 = arith.constant 0 : index
    %c0_51 = arith.constant 0 : index
    %54 = vector.load %arg3[%c0_47, %c1_48, %c2_49, %c0_50, %c0_51] : memref<2x2x4x4x4xf32, #tpu.memory_space<vmem>>, vector<1x1x1x4x4xf32>
    %55 = vector.shape_cast %54 : vector<1x1x1x4x4xf32> to vector<4x4xf32>
    %cst_52 = arith.constant dense<0.000000e+00> : vector<256x4xf32>
    %56 = tpu.matmul %53, %55, %cst_52 {dimension_numbers = #tpu.dot_dimension_numbers<[1], [0], [0], [1], [0, 0, 1, 1], [], []>} : vector<256x4xf32>, vector<4x4xf32>, vector<256x4xf32> -> vector<256x4xf32>
    %57 = arith.addf %51, %56 : vector<256x4xf32>
    %58 = vector.extract_strided_slice %11 {offsets = [0, 2, 0], sizes = [16, 16, 4], strides = [1, 1, 1]} : vector<16x18x4xf32> to vector<16x16x4xf32>
    %59 = vector.shape_cast %58 : vector<16x16x4xf32> to vector<256x4xf32>
    %c0_53 = arith.constant 0 : index
    %c1_54 = arith.constant 1 : index
    %c3_55 = arith.constant 3 : index
    %c0_56 = arith.constant 0 : index
    %c0_57 = arith.constant 0 : index
    %60 = vector.load %arg3[%c0_53, %c1_54, %c3_55, %c0_56, %c0_57] : memref<2x2x4x4x4xf32, #tpu.memory_space<vmem>>, vector<1x1x1x4x4xf32>
    %61 = vector.shape_cast %60 : vector<1x1x1x4x4xf32> to vector<4x4xf32>
    %cst_58 = arith.constant dense<0.000000e+00> : vector<256x4xf32>
    %62 = tpu.matmul %59, %61, %cst_58 {dimension_numbers = #tpu.dot_dimension_numbers<[1], [0], [0], [1], [0, 0, 1, 1], [], []>} : vector<256x4xf32>, vector<4x4xf32>, vector<256x4xf32> -> vector<256x4xf32>
    %63 = arith.addf %57, %62 : vector<256x4xf32>
    %64 = vector.broadcast %1 : vector<1x4xf32> to vector<256x4xf32>
    %65 = arith.addf %63, %64 : vector<256x4xf32>
    %66 = vector.shape_cast %65 : vector<256x4xf32> to vector<16x16x4xf32>
    %c0_59 = arith.constant 0 : index
    %c0_60 = arith.constant 0 : index
    %c0_61 = arith.constant 0 : index
    %c1_62 = arith.constant 1 : index
    %c0_63 = arith.constant 0 : index
    %c0_64 = arith.constant 0 : index
    %67 = vector.load %arg5[%c0_59, %c0_60, %c0_61, %c1_62, %c0_63, %c0_64] : memref<1x16x2x2x16x4xf32, #tpu.memory_space<vmem>>, vector<1x16x1x1x16x4xf32>
    %68 = vector.shape_cast %67 : vector<1x16x1x1x16x4xf32> to vector<16x16x4xf32>
    %69 = vector.shape_cast %66 : vector<16x16x4xf32> to vector<1x16x1x1x16x4xf32>
    tpu.vector_store %arg5[%c0_59, %c0_60, %c0_61, %c1_62, %c0_63, %c0_64], %69 {strides = array<i32>} : memref<1x16x2x2x16x4xf32, #tpu.memory_space<vmem>>, vector<1x16x1x1x16x4xf32>,
    %c1_i32_65 = arith.constant 1 : i32
    %70 = arith.addi %0, %c1_i32_65 : i32
    %c0_i32_66 = arith.constant 0 : i32
    %71 = arith.addi %70, %c0_i32_66 : i32
    %c0_67 = arith.constant 0 : index
    %72 = arith.index_cast %71 : i32 to index
    %c0_68 = arith.constant 0 : index
    %c0_69 = arith.constant 0 : index
    %73 = vector.load %arg2[%c0_67, %72, %c0_68, %c0_69] : memref<1x18x18x4xf32, #tpu.memory_space<vmem>>, vector<1x16x18x4xf32>
    %74 = vector.shape_cast %73 : vector<1x16x18x4xf32> to vector<16x18x4xf32>
    %c1_i32_70 = arith.constant 1 : i32
    %75 = arith.addi %0, %c1_i32_70 : i32
    %c1_i32_71 = arith.constant 1 : i32
    %76 = arith.addi %75, %c1_i32_71 : i32
    %c0_72 = arith.constant 0 : index
    %77 = arith.index_cast %76 : i32 to index
    %c0_73 = arith.constant 0 : index
    %c0_74 = arith.constant 0 : index
    %78 = vector.load %arg2[%c0_72, %77, %c0_73, %c0_74] : memref<1x18x18x4xf32, #tpu.memory_space<vmem>>, vector<1x16x18x4xf32>
    %79 = vector.shape_cast %78 : vector<1x16x18x4xf32> to vector<16x18x4xf32>
    %80 = vector.extract_strided_slice %74 {offsets = [0, 0, 0], sizes = [16, 16, 4], strides = [1, 1, 1]} : vector<16x18x4xf32> to vector<16x16x4xf32>
    %81 = vector.shape_cast %80 : vector<16x16x4xf32> to vector<256x4xf32>
    %c1_75 = arith.constant 1 : index
    %c0_76 = arith.constant 0 : index
    %c0_77 = arith.constant 0 : index
    %c0_78 = arith.constant 0 : index
    %c0_79 = arith.constant 0 : index
    %82 = vector.load %arg3[%c1_75, %c0_76, %c0_77, %c0_78, %c0_79] : memref<2x2x4x4x4xf32, #tpu.memory_space<vmem>>, vector<1x1x1x4x4xf32>
    %83 = vector.shape_cast %82 : vector<1x1x1x4x4xf32> to vector<4x4xf32>
    %cst_80 = arith.constant dense<0.000000e+00> : vector<256x4xf32>
    %84 = tpu.matmul %81, %83, %cst_80 {dimension_numbers = #tpu.dot_dimension_numbers<[1], [0], [0], [1], [0, 0, 1, 1], [], []>} : vector<256x4xf32>, vector<4x4xf32>, vector<256x4xf32> -> vector<256x4xf32>
    %85 = vector.extract_strided_slice %74 {offsets = [0, 1, 0], sizes = [16, 16, 4], strides = [1, 1, 1]} : vector<16x18x4xf32> to vector<16x16x4xf32>
    %86 = vector.shape_cast %85 : vector<16x16x4xf32> to vector<256x4xf32>
    %c1_81 = arith.constant 1 : index
    %c0_82 = arith.constant 0 : index
    %c1_83 = arith.constant 1 : index
    %c0_84 = arith.constant 0 : index
    %c0_85 = arith.constant 0 : index
    %87 = vector.load %arg3[%c1_81, %c0_82, %c1_83, %c0_84, %c0_85] : memref<2x2x4x4x4xf32, #tpu.memory_space<vmem>>, vector<1x1x1x4x4xf32>
    %88 = vector.shape_cast %87 : vector<1x1x1x4x4xf32> to vector<4x4xf32>
    %cst_86 = arith.constant dense<0.000000e+00> : vector<256x4xf32>
    %89 = tpu.matmul %86, %88, %cst_86 {dimension_numbers = #tpu.dot_dimension_numbers<[1], [0], [0], [1], [0, 0, 1, 1], [], []>} : vector<256x4xf32>, vector<4x4xf32>, vector<256x4xf32> -> vector<256x4xf32>
    %90 = arith.addf %84, %89 : vector<256x4xf32>
    %91 = vector.extract_strided_slice %79 {offsets = [0, 0, 0], sizes = [16, 16, 4], strides = [1, 1, 1]} : vector<16x18x4xf32> to vector<16x16x4xf32>
    %92 = vector.shape_cast %91 : vector<16x16x4xf32> to vector<256x4xf32>
    %c1_87 = arith.constant 1 : index
    %c0_88 = arith.constant 0 : index
    %c2_89 = arith.constant 2 : index
    %c0_90 = arith.constant 0 : index
    %c0_91 = arith.constant 0 : index
    %93 = vector.load %arg3[%c1_87, %c0_88, %c2_89, %c0_90, %c0_91] : memref<2x2x4x4x4xf32, #tpu.memory_space<vmem>>, vector<1x1x1x4x4xf32>
    %94 = vector.shape_cast %93 : vector<1x1x1x4x4xf32> to vector<4x4xf32>
    %cst_92 = arith.constant dense<0.000000e+00> : vector<256x4xf32>
    %95 = tpu.matmul %92, %94, %cst_92 {dimension_numbers = #tpu.dot_dimension_numbers<[1], [0], [0], [1], [0, 0, 1, 1], [], []>} : vector<256x4xf32>, vector<4x4xf32>, vector<256x4xf32> -> vector<256x4xf32>
    %96 = arith.addf %90, %95 : vector<256x4xf32>
    %97 = vector.extract_strided_slice %79 {offsets = [0, 1, 0], sizes = [16, 16, 4], strides = [1, 1, 1]} : vector<16x18x4xf32> to vector<16x16x4xf32>
    %98 = vector.shape_cast %97 : vector<16x16x4xf32> to vector<256x4xf32>
    %c1_93 = arith.constant 1 : index
    %c0_94 = arith.constant 0 : index
    %c3_95 = arith.constant 3 : index
    %c0_96 = arith.constant 0 : index
    %c0_97 = arith.constant 0 : index
    %99 = vector.load %arg3[%c1_93, %c0_94, %c3_95, %c0_96, %c0_97] : memref<2x2x4x4x4xf32, #tpu.memory_space<vmem>>, vector<1x1x1x4x4xf32>
    %100 = vector.shape_cast %99 : vector<1x1x1x4x4xf32> to vector<4x4xf32>
    %cst_98 = arith.constant dense<0.000000e+00> : vector<256x4xf32>
    %101 = tpu.matmul %98, %100, %cst_98 {dimension_numbers = #tpu.dot_dimension_numbers<[1], [0], [0], [1], [0, 0, 1, 1], [], []>} : vector<256x4xf32>, vector<4x4xf32>, vector<256x4xf32> -> vector<256x4xf32>
    %102 = arith.addf %96, %101 : vector<256x4xf32>
    %103 = vector.broadcast %1 : vector<1x4xf32> to vector<256x4xf32>
    %104 = arith.addf %102, %103 : vector<256x4xf32>
    %105 = vector.shape_cast %104 : vector<256x4xf32> to vector<16x16x4xf32>
    %c0_99 = arith.constant 0 : index
    %c0_100 = arith.constant 0 : index
    %c1_101 = arith.constant 1 : index
    %c0_102 = arith.constant 0 : index
    %c0_103 = arith.constant 0 : index
    %c0_104 = arith.constant 0 : index
    %106 = vector.load %arg5[%c0_99, %c0_100, %c1_101, %c0_102, %c0_103, %c0_104] : memref<1x16x2x2x16x4xf32, #tpu.memory_space<vmem>>, vector<1x16x1x1x16x4xf32>
    %107 = vector.shape_cast %106 : vector<1x16x1x1x16x4xf32> to vector<16x16x4xf32>
    %108 = vector.shape_cast %105 : vector<16x16x4xf32> to vector<1x16x1x1x16x4xf32>
    tpu.vector_store %arg5[%c0_99, %c0_100, %c1_101, %c0_102, %c0_103, %c0_104], %108 {strides = array<i32>} : memref<1x16x2x2x16x4xf32, #tpu.memory_space<vmem>>, vector<1x16x1x1x16x4xf32>,
    %109 = vector.extract_strided_slice %74 {offsets = [0, 1, 0], sizes = [16, 16, 4], strides = [1, 1, 1]} : vector<16x18x4xf32> to vector<16x16x4xf32>
    %110 = vector.shape_cast %109 : vector<16x16x4xf32> to vector<256x4xf32>
    %c1_105 = arith.constant 1 : index
    %c1_106 = arith.constant 1 : index
    %c0_107 = arith.constant 0 : index
    %c0_108 = arith.constant 0 : index
    %c0_109 = arith.constant 0 : index
    %111 = vector.load %arg3[%c1_105, %c1_106, %c0_107, %c0_108, %c0_109] : memref<2x2x4x4x4xf32, #tpu.memory_space<vmem>>, vector<1x1x1x4x4xf32>
    %112 = vector.shape_cast %111 : vector<1x1x1x4x4xf32> to vector<4x4xf32>
    %cst_110 = arith.constant dense<0.000000e+00> : vector<256x4xf32>
    %113 = tpu.matmul %110, %112, %cst_110 {dimension_numbers = #tpu.dot_dimension_numbers<[1], [0], [0], [1], [0, 0, 1, 1], [], []>} : vector<256x4xf32>, vector<4x4xf32>, vector<256x4xf32> -> vector<256x4xf32>
    %114 = vector.extract_strided_slice %74 {offsets = [0, 2, 0], sizes = [16, 16, 4], strides = [1, 1, 1]} : vector<16x18x4xf32> to vector<16x16x4xf32>
    %115 = vector.shape_cast %114 : vector<16x16x4xf32> to vector<256x4xf32>
    %c1_111 = arith.constant 1 : index
    %c1_112 = arith.constant 1 : index
    %c1_113 = arith.constant 1 : index
    %c0_114 = arith.constant 0 : index
    %c0_115 = arith.constant 0 : index
    %116 = vector.load %arg3[%c1_111, %c1_112, %c1_113, %c0_114, %c0_115] : memref<2x2x4x4x4xf32, #tpu.memory_space<vmem>>, vector<1x1x1x4x4xf32>
    %117 = vector.shape_cast %116 : vector<1x1x1x4x4xf32> to vector<4x4xf32>
    %cst_116 = arith.constant dense<0.000000e+00> : vector<256x4xf32>
    %118 = tpu.matmul %115, %117, %cst_116 {dimension_numbers = #tpu.dot_dimension_numbers<[1], [0], [0], [1], [0, 0, 1, 1], [], []>} : vector<256x4xf32>, vector<4x4xf32>, vector<256x4xf32> -> vector<256x4xf32>
    %119 = arith.addf %113, %118 : vector<256x4xf32>
    %120 = vector.extract_strided_slice %79 {offsets = [0, 1, 0], sizes = [16, 16, 4], strides = [1, 1, 1]} : vector<16x18x4xf32> to vector<16x16x4xf32>
    %121 = vector.shape_cast %120 : vector<16x16x4xf32> to vector<256x4xf32>
    %c1_117 = arith.constant 1 : index
    %c1_118 = arith.constant 1 : index
    %c2_119 = arith.constant 2 : index
    %c0_120 = arith.constant 0 : index
    %c0_121 = arith.constant 0 : index
    %122 = vector.load %arg3[%c1_117, %c1_118, %c2_119, %c0_120, %c0_121] : memref<2x2x4x4x4xf32, #tpu.memory_space<vmem>>, vector<1x1x1x4x4xf32>
    %123 = vector.shape_cast %122 : vector<1x1x1x4x4xf32> to vector<4x4xf32>
    %cst_122 = arith.constant dense<0.000000e+00> : vector<256x4xf32>
    %124 = tpu.matmul %121, %123, %cst_122 {dimension_numbers = #tpu.dot_dimension_numbers<[1], [0], [0], [1], [0, 0, 1, 1], [], []>} : vector<256x4xf32>, vector<4x4xf32>, vector<256x4xf32> -> vector<256x4xf32>
    %125 = arith.addf %119, %124 : vector<256x4xf32>
    %126 = vector.extract_strided_slice %79 {offsets = [0, 2, 0], sizes = [16, 16, 4], strides = [1, 1, 1]} : vector<16x18x4xf32> to vector<16x16x4xf32>
    %127 = vector.shape_cast %126 : vector<16x16x4xf32> to vector<256x4xf32>
    %c1_123 = arith.constant 1 : index
    %c1_124 = arith.constant 1 : index
    %c3_125 = arith.constant 3 : index
    %c0_126 = arith.constant 0 : index
    %c0_127 = arith.constant 0 : index
    %128 = vector.load %arg3[%c1_123, %c1_124, %c3_125, %c0_126, %c0_127] : memref<2x2x4x4x4xf32, #tpu.memory_space<vmem>>, vector<1x1x1x4x4xf32>
    %129 = vector.shape_cast %128 : vector<1x1x1x4x4xf32> to vector<4x4xf32>
    %cst_128 = arith.constant dense<0.000000e+00> : vector<256x4xf32>
    %130 = tpu.matmul %127, %129, %cst_128 {dimension_numbers = #tpu.dot_dimension_numbers<[1], [0], [0], [1], [0, 0, 1, 1], [], []>} : vector<256x4xf32>, vector<4x4xf32>, vector<256x4xf32> -> vector<256x4xf32>
    %131 = arith.addf %125, %130 : vector<256x4xf32>
    %132 = vector.broadcast %1 : vector<1x4xf32> to vector<256x4xf32>
    %133 = arith.addf %131, %132 : vector<256x4xf32>
    %134 = vector.shape_cast %133 : vector<256x4xf32> to vector<16x16x4xf32>
    %c0_129 = arith.constant 0 : index
    %c0_130 = arith.constant 0 : index
    %c1_131 = arith.constant 1 : index
    %c1_132 = arith.constant 1 : index
    %c0_133 = arith.constant 0 : index
    %c0_134 = arith.constant 0 : index
    %135 = vector.load %arg5[%c0_129, %c0_130, %c1_131, %c1_132, %c0_133, %c0_134] : memref<1x16x2x2x16x4xf32, #tpu.memory_space<vmem>>, vector<1x16x1x1x16x4xf32>
    %136 = vector.shape_cast %135 : vector<1x16x1x1x16x4xf32> to vector<16x16x4xf32>
    %137 = vector.shape_cast %134 : vector<16x16x4xf32> to vector<1x16x1x1x16x4xf32>
    tpu.vector_store %arg5[%c0_129, %c0_130, %c1_131, %c1_132, %c0_133, %c0_134], %137 {strides = array<i32>} : memref<1x16x2x2x16x4xf32, #tpu.memory_space<vmem>>, vector<1x16x1x1x16x4xf32>,
    return
  }
  func.func @transform_0(%arg0: i32, %arg1: i32) -> (i32, i32, i32, i32) {
    %c0_i32 = arith.constant 0 : i32
    %c0_i32_0 = arith.constant 0 : i32
    %c0_i32_1 = arith.constant 0 : i32
    %c0_i32_2 = arith.constant 0 : i32
    return %arg0, %c0_i32, %c0_i32_0, %c0_i32_1 : i32, i32, i32, i32
  }
  func.func @transform_1(%arg0: i32, %arg1: i32) -> (i32, i32, i32, i32, i32) {
    %c0_i32 = arith.constant 0 : i32
    %c0_i32_0 = arith.constant 0 : i32
    %c0_i32_1 = arith.constant 0 : i32
    %c0_i32_2 = arith.constant 0 : i32
    %c0_i32_3 = arith.constant 0 : i32
    %c0_i32_4 = arith.constant 0 : i32
    return %c0_i32, %c0_i32_0, %c0_i32_1, %c0_i32_2, %c0_i32_3 : i32, i32, i32, i32, i32
  }
  func.func @transform_2(%arg0: i32, %arg1: i32) -> (i32, i32) {
    %c0_i32 = arith.constant 0 : i32
    %c0_i32_0 = arith.constant 0 : i32
    %c0_i32_1 = arith.constant 0 : i32
    return %c0_i32, %c0_i32_0 : i32, i32
  }
  func.func @transform_3(%arg0: i32, %arg1: i32) -> (i32, i32, i32, i32, i32, i32) {
    %c0_i32 = arith.constant 0 : i32
    %c0_i32_0 = arith.constant 0 : i32
    %c0_i32_1 = arith.constant 0 : i32
    %c0_i32_2 = arith.constant 0 : i32
    %c0_i32_3 = arith.constant 0 : i32
    return %arg0, %arg1, %c0_i32, %c0_i32_0, %c0_i32_1, %c0_i32_2 : i32, i32, i32, i32, i32, i32
  }
}

</mosaic_0001>

<bundles_post_ra>
// kernel: tpu_custom_call.1
= control target key start
LH: loop header
LB: loop body
LE: loop exit
PB: predicated region body
PF: predicated region fallthrough
CT: control target
= control target key end

     0   :  { %s8890_s12 = smov 0   ;;  %s8892_s13 = smov 0   ;;  %s11663_s0 = inlined_call_operand.vmem [shape: f32[2,18,18,4], index: 0, kind: input, shape index: {}]   ;;  %s11664_s1 = inlined_call_operand.vmem [shape: f32[2,2,4,4,4], index: 1, kind: input, shape index: {}]   ;;  %s11665_s2 = inlined_call_operand.vmem [shape: f32[1,4], index: 2, kind: input, shape index: {}]   ;;  %s11666_s3 = inlined_call_operand.vmem [shape: f32[2,16,2,2,16,4], index: 3, kind: output, shape index: {}]  }
   0x1   :  { %s8894_s14 = smov 0  }
   0x2 LB: > { %s25_s15 = sadd.s32 1, %s8864_s13  ;;  %p6303_p0 = scmp.ge.s32.totalorder %s8868_s14, 1  ;;  %s8868_s14 = sphi %s8894_s14, %s13_s14   ;;  %s8864_s13 = sphi %s8892_s13, %s12016_s13   ;;  %s8860_s12 = sphi %s8890_s12, %s12015_s12  }
   0x3   : > { %p27_p1 = scmp.ge.s32.totalorder %s25_s15, 2  ;;  %p151_p2 = scmp.lt.s32.totalorder %s8868_s14, 3 }
   0x5   : > { %s12018_s15 = smov (%p27_p1, %s25_s15), 0  ;;  %p152_p3 = pnand %p6303_p0, %p151_p2 }
   0x7   : > { %155 = sbr.rel (%p152_p3) target bundleno = 749 (0x2ed), region = 32 }
   0xe   : > { %v6355_v0 = vld [vmem:[%s11664_s1 + $0x4] sm:$0xf]  ;;  %vm496_vm0 = vcmask 1043456   ;;  %v6492_v1 = vld [vmem:[%s11664_s1 + $0x14] sm:$0xf]  ;;  %p180_p4 = scmp.lt.s32.totalorder %s8860_s12, 1 }
   0xf   : > { %7622 = vmatprep.subr.msk.mxu0 %vm496_vm0, %v6355_v0  ;;  %7822 = vmatprep.subr.msk.mxu1 %vm496_vm0, %v6492_v1  ;;  %v299_v2 = vld [vmem:[%s11664_s1] sm:$0xf]  ;;  %v6491_v3 = vld [vmem:[%s11664_s1 + $0x10] sm:$0xf]  ;;  %vm348_vm1 = vcmask 1046528   ;;  %vm431_vm2 = vcmask 31744  }
  0x10   : > { %7623 = vmatpush3.msk.msra.mxu0 %vm496_vm0, %v6355_v0  ;;  %7823 = vmatpush3.msk.msra.mxu1 %vm496_vm0, %v6492_v1  ;;  %s12020_s12 = smov (!%p180_p4, %s8860_s12), 1  ;;  %vm1869_vm3 = vcmask 1045504   ;;  %v8988_v30 = vld [vmem:[%s11664_s1 + $0x8] sm:$0xf]  ;;  %v9007_v36 = vld [vmem:[%s11664_s1 + $0x18] sm:$0xf] }
  0x11   : > { %7672 = vmatprep.subr.msk.mxu0 %vm496_vm0, %v299_v2  ;;  %7872 = vmatprep.subr.msk.mxu1 %vm496_vm0, %v6491_v3  ;;  %s8806_s24 = smul.u32 432, %s12020_s12  ;;  %s7093_s30 = sshll.u32 %s12020_s12, 10 }
  0x12   : > { %s10920_s7 = scalar_lea.vmem %s11666_s3, %s7093_s30 }
  0x13   : > { %s8932_s27 = scalar_lea.vmem %s11663_s0, %s8806_s24 }
  0x14   : > { %v8935_v4 = vld [vmem:[%s8932_s27] sm:$0xff]  ;;  %v8938_v5 = vld [vmem:[%s8932_s27 + $0x8] sm:$0xff]  ;;  %v202_v6 = vld [vmem:[%s8932_s27 + $0x10] sm:$0x3] }
  0x15   : > { %v349_v7 = vrot.slane %v8935_v4, 1  ;;  %v350_v8 = vrot.slane %v8938_v5, 1  ;;  %v1870_v9 = vrot.slane %v8935_v4, 2  ;;  %v1871_v10 = vrot.slane %v8938_v5, 2  ;;  %v8946_v11 = vld [vmem:[%s8932_s27 + $0x18] sm:$0xff]  ;;  %v8949_v12 = vld [vmem:[%s8932_s27 + $0x20] sm:$0xff] }
  0x16   : > { %v352_v13 = vrot.slane %v202_v6, 1  ;;  %v1873_v14 = vrot.slane %v202_v6, 2  ;;  %v354_v15 = vrot.slane %v8946_v11, 1  ;;  %v8953_v16 = vrot.slane %v8949_v12, 1  ;;  %v205_v17 = vld [vmem:[%s8932_s27 + $0x28] sm:$0x3] }
  0x17   : > { %v8957_v18 = vsel %vm348_vm1, %v349_v7, %v350_v8  ;;  %v1872_v19 = vsel %vm1869_vm3, %v1870_v9, %v1871_v10  ;;  %v1875_v20 = vrot.slane %v8946_v11, 2  ;;  %v8962_v21 = vrot.slane %v8949_v12, 2  ;;  %v8965_v22 = vld [vmem:[%s8932_s27 + $0x30] sm:$0xff]  ;;  %v8968_v23 = vld [vmem:[%s8932_s27 + $0x38] sm:$0xff]  ;;  %v208_v24 = vld [vmem:[%s8932_s27 + $0x40] sm:$0x3] }
  0x18   : > { %11794 = vst [vmem:[#allocation2_spill] sm:$0xff] %v8953_v16  ;;  %7624 = vmatprep.mubr.msk.f32.mxu0 %vm431_vm2, %v8957_v18  ;;  %7824 = vmatprep.mubr.msk.f32.mxu1 %vm431_vm2, %v1872_v19  ;;  %v8975_v25 = vsel %vm348_vm1, %v350_v8, %v352_v13  ;;  %v1874_v26 = vsel %vm1869_vm3, %v1871_v10, %v1873_v14  ;;  %v357_v28 = vrot.slane %v205_v17, 1  ;;  %v8983_v29 = vld [vmem:[%s8932_s27 + $0x48] sm:$0xff]  ;;  %v1878_v32 = vrot.slane %v205_v17, 2  ;;  %v9002_v35 = vld [vmem:[%s8932_s27 + $0x50] sm:$0xff]  ;;  %v9032_v46 = vld [vmem:[%s8932_s27 + $0x60] sm:$0xff] }
  0x19   : > { %11795 = vst [vmem:[#allocation3_spill] sm:$0xff] %v8962_v21  ;;  %v8980_v27 = vsel %vm348_vm1, %v354_v15, %v8953_v16  ;;  %7625 = vmatmul.mubr.msk.f32.vlgmr.msra.gmra.mrb[0].mxu0 %vm431_vm2, %v8975_v25  ;;  %7825 = vmatmul.mubr.msk.f32.vlgmr.msra.gmra.mrb[0].mxu1 %vm431_vm2, %v1874_v26  ;;  %v8995_v31 = vsel %vm1869_vm3, %v1875_v20, %v8962_v21  ;;  %v359_v33 = vrot.slane %v8965_v22, 1  ;;  %v8999_v34 = vrot.slane %v8968_v23, 1  ;;  %v211_v41 = vld [vmem:[%s8932_s27 + $0x58] sm:$0x3]  ;;  %v9035_v47 = vld [vmem:[%s8932_s27 + $0x68] sm:$0xff] }
  0x1a   : > { %11796 = vst [vmem:[#allocation4_spill] sm:$0xff] %v8995_v31  ;;  %7673 = vmatpush3.msk.msra.mxu0 %vm496_vm0, %v299_v2  ;;  %7873 = vmatpush3.msk.msra.mxu1 %vm496_vm0, %v6491_v3  ;;  %v9013_v37 = vsel %vm348_vm1, %v8953_v16, %v357_v28  ;;  %v1880_v38 = vrot.slane %v8965_v22, 2  ;;  %v9017_v39 = vrot.slane %v8968_v23, 2  ;;  %v362_v40 = vrot.slane %v208_v24, 1  ;;  %v214_v62 = vld [vmem:[%s8932_s27 + $0x70] sm:$0x3] }
  0x1b   : > { %11797 = vst [vmem:[#allocation5_spill] sm:$0xff] %v8999_v34  ;;  %7627 = vmatprep.mubr.msk.f32.mxu0 %vm431_vm2, %v8980_v27  ;;  %7827 = vmatprep.mubr.msk.f32.mxu1 %vm431_vm2, %v8995_v31  ;;  %v1879_v42 = vsel %vm1869_vm3, %v8962_v21, %v1878_v32  ;;  %v9028_v43 = vsel %vm348_vm1, %v359_v33, %v8999_v34  ;;  %v1883_v44 = vrot.slane %v208_v24, 2  ;;  %v364_v45 = vrot.slane %v8983_v29, 1  ;;  %v9083_v63 = vld [vmem:[%s8932_s27 + $0x78] sm:$0xff]  ;;  %v9086_v0 = vld [vmem:[%s8932_s27 + $0x80] sm:$0xff]  ;;  %v9119_v17 = vld [vmem:[%s8932_s27 + $0x90] sm:$0xff] }
  0x1c   : > { %11798 = vst [vmem:[#allocation6_spill] sm:$0xff] %v9017_v39  ;;  %v9039_v48 = vsel %vm1869_vm3, %v1880_v38, %v9017_v39  ;;  %v9042_v49 = vrot.slane %v9002_v35, 1  ;;  %v1885_v50 = vrot.slane %v8983_v29, 2  ;;  %7722 = vmatprep.subr.msk.mxu0 %vm496_vm0, %v8988_v30  ;;  %7922 = vmatprep.subr.msk.mxu1 %vm496_vm0, %v9007_v36  ;;  %v9053_v51 = vrot.slane %v9002_v35, 2  ;;  %v217_v9 = vld [vmem:[%s8932_s27 + $0x88] sm:$0x3] }
  0x1d   : > { %11799 = vst [vmem:[#allocation7_spill] sm:$0xff] %v9039_v48  ;;  %7628 = vmatmul.mubr.msk.f32.gmra.mrb[2].mxu0 %vm431_vm2, %v9013_v37  ;;  %7828 = vmatmul.mubr.msk.f32.gmra.mrb[2].mxu1 %vm431_vm2, %v1879_v42  ;;  %v367_v52 = vrot.slane %v211_v41, 1  ;;  %v1888_v53 = vrot.slane %v211_v41, 2  ;;  %v9061_v54 = vsel %vm348_vm1, %v8999_v34, %v362_v40  ;;  %v1884_v55 = vsel %vm1869_vm3, %v9017_v39, %v1883_v44  ;;  %v9122_v19 = vld [vmem:[%s8932_s27 + $0x98] sm:$0xff]  ;;  %v220_v44 = vld [vmem:[%s8932_s27 + $0xa0] sm:$0x3] }
  0x1e   : > { %11800 = vst [vmem:[#allocation8_spill] sm:$0xff] %v9042_v49  ;;  %11801 = vst [vmem:[#allocation9_spill] sm:$0xff] %v9053_v51  ;;  %7630 = vmatprep.mubr.msk.f32.mxu0 %vm431_vm2, %v9028_v43  ;;  %7830 = vmatprep.mubr.msk.f32.mxu1 %vm431_vm2, %v9039_v48  ;;  %v369_v56 = vrot.slane %v9032_v46, 1  ;;  %v9067_v57 = vrot.slane %v9035_v47, 1  ;;  %v9071_v58 = vsel %vm348_vm1, %v364_v45, %v9042_v49  ;;  %v1890_v60 = vrot.slane %v9032_v46, 2  ;;  %v9155_v45 = vld [vmem:[%s8932_s27 + $0xa8] sm:$0xff] }
  0x1f   : > { %v9075_v59 = vsel %vm1869_vm3, %v1885_v50, %v9053_v51  ;;  %v9079_v61 = vrot.slane %v9035_v47, 2  ;;  %v9093_v1 = vsel %vm348_vm1, %v9042_v49, %v367_v52  ;;  %v1889_v2 = vsel %vm1869_vm3, %v9053_v51, %v1888_v53  ;;  %v9158_v50 = vld [vmem:[%s8932_s27 + $0xb0] sm:$0xff]  ;;  %v235_v49 = vld [vmem:[%s8932_s27 + $0x118] sm:$0x3] }
  0x20   : > { %11802 = vst [vmem:[#allocation10_spill] sm:$0xff] %v9067_v57  ;;  %11803 = vst [vmem:[#allocation11_spill] sm:$0xff] %v9075_v59  ;;  %v9103_v3 = vsel %vm348_vm1, %v369_v56, %v9067_v57  ;;  %v372_v6 = vrot.slane %v214_v62, 1  ;;  %v1893_v7 = vrot.slane %v214_v62, 2  ;;  %v374_v8 = vrot.slane %v9083_v63, 1  ;;  %v9263_v48 = vld [vmem:[%s8932_s27 + $0xf0] sm:$0xff] }
  0x21   : > { %11804 = vst [vmem:[#allocation12_spill] sm:$0xff] %v9079_v61  ;;  %7631 = vmatmul.mubr.msk.f32.gmra.mrb[4].mxu0 %vm431_vm2, %v9061_v54  ;;  %7831 = vmatmul.mubr.msk.f32.gmra.mrb[4].mxu1 %vm431_vm2, %v1884_v55  ;;  %v9109_v10 = vsel %vm1869_vm3, %v1890_v60, %v9079_v61  ;;  %v9112_v13 = vrot.slane %v9086_v0, 1  ;;  %v1895_v14 = vrot.slane %v9083_v63, 2  ;;  %v9116_v15 = vrot.slane %v9086_v0, 2 }
  0x22   : > { %7633 = vmatprep.mubr.msk.f32.mxu0 %vm431_vm2, %v9071_v58  ;;  %7833 = vmatprep.mubr.msk.f32.mxu1 %vm431_vm2, %v9075_v59  ;;  %11805 = vst [vmem:[#allocation13_spill] sm:$0xff] %v9109_v10  ;;  %v377_v20 = vrot.slane %v217_v9, 1  ;;  %v1898_v24 = vrot.slane %v217_v9, 2  ;;  %v9133_v26 = vsel %vm348_vm1, %v9067_v57, %v372_v6  ;;  %v1894_v28 = vsel %vm1869_vm3, %v9079_v61, %v1893_v7  ;;  %v229_v59 = vld [vmem:[%s8932_s27 + $0xe8] sm:$0x3] }
  0x23   : > { %11806 = vst [vmem:[#allocation14_spill] sm:$0xff] %v9112_v13  ;;  %11807 = vst [vmem:[#allocation15_spill] sm:$0xff] %v9116_v15  ;;  %v379_v32 = vrot.slane %v9119_v17, 1  ;;  %v9139_v33 = vrot.slane %v9122_v19, 1  ;;  %v9143_v38 = vsel %vm348_vm1, %v374_v8, %v9112_v13  ;;  %v9147_v40 = vsel %vm1869_vm3, %v1895_v14, %v9116_v15  ;;  %v9191_v14 = vld [vmem:[%s8932_s27 + $0xc0] sm:$0xff] }
  0x24   : > { %11809 = vst [vmem:[#allocation17_spill] sm:$0xff] %v9147_v40  ;;  %v1900_v41 = vrot.slane %v9119_v17, 2  ;;  %v9151_v42 = vrot.slane %v9122_v19, 2  ;;  %v9165_v52 = vsel %vm348_vm1, %v9112_v13, %v377_v20  ;;  %v1899_v53 = vsel %vm1869_vm3, %v9116_v15, %v1898_v24  ;;  %v9194_v20 = vld [vmem:[%s8932_s27 + $0xc8] sm:$0xff] }
  0x25   : > { %7634 = vmatmul.mubr.msk.f32.gmra.mrb[6].mxu0 %vm431_vm2, %v9093_v1  ;;  %7834 = vmatmul.mubr.msk.f32.gmra.mrb[6].mxu1 %vm431_vm2, %v1889_v2  ;;  %11808 = vst [vmem:[#allocation16_spill] sm:$0xff] %v9139_v33  ;;  %v9175_v55 = vsel %vm348_vm1, %v379_v32, %v9139_v33  ;;  %v382_v56 = vrot.slane %v220_v44, 1  ;;  %v1903_v60 = vrot.slane %v220_v44, 2  ;;  %v384_v62 = vrot.slane %v9155_v45, 1  ;;  %v223_v2 = vld [vmem:[%s8932_s27 + $0xb8] sm:$0x3] }
  0x26   : > { %7636 = vmatprep.mubr.msk.f32.mxu0 %vm431_vm2, %v9103_v3  ;;  %7836 = vmatprep.mubr.msk.f32.mxu1 %vm431_vm2, %v9109_v10  ;;  %11810 = vst [vmem:[#allocation18_spill] sm:$0xff] %v9151_v42  ;;  %v9181_v6 = vsel %vm1869_vm3, %v1900_v41, %v9151_v42  ;;  %v9184_v7 = vrot.slane %v9158_v50, 1  ;;  %v1905_v8 = vrot.slane %v9155_v45, 2  ;;  %v9188_v9 = vrot.slane %v9158_v50, 2 }
  0x27   : > { %11811 = vst [vmem:[#allocation19_spill] sm:$0xff] %v9181_v6  ;;  %v387_v24 = vrot.slane %v223_v2, 1  ;;  %v9205_v32 = vsel %vm348_vm1, %v9139_v33, %v382_v56  ;;  %v1904_v41 = vsel %vm1869_vm3, %v9151_v42, %v1903_v60  ;;  %v389_v44 = vrot.slane %v9191_v14, 1  ;;  %v226_v60 = vld [vmem:[%s8932_s27 + $0xd0] sm:$0x3]  ;;  %v9227_v42 = vld [vmem:[%s8932_s27 + $0xd8] sm:$0xff] }
  0x28   : > { %11812 = vst [vmem:[#allocation20_spill] sm:$0xff] %v9184_v7  ;;  %11813 = vst [vmem:[#allocation21_spill] sm:$0xff] %v9188_v9  ;;  %v9211_v15 = vrot.slane %v9194_v20, 1  ;;  %v1910_v56 = vrot.slane %v9191_v14, 2  ;;  %v392_v10 = vrot.slane %v226_v60, 1  ;;  %v1913_v51 = vrot.slane %v226_v60, 2 }
  0x29   : > { %7637 = vmatmul.mubr.msk.f32.gmra.mrb[8].mxu0 %vm431_vm2, %v9133_v26  ;;  %7837 = vmatmul.mubr.msk.f32.gmra.mrb[8].mxu1 %vm431_vm2, %v1894_v28  ;;  %v1908_v28 = vrot.slane %v223_v2, 2  ;;  %v9219_v2 = vsel %vm1869_vm3, %v1905_v8, %v9188_v9  ;;  %v1918_v60 = vrot.slane %v229_v59, 2  ;;  %v399_v31 = vrot.slane %v9263_v48, 1 }
  0x2a   : > { %7639 = vmatprep.mubr.msk.f32.mxu0 %vm431_vm2, %v9143_v38  ;;  %7839 = vmatprep.mubr.msk.f32.mxu1 %vm431_vm2, %v9147_v40  ;;  %11814 = vst [vmem:[#allocation22_spill] sm:$0xff] %v9211_v15  ;;  %11815 = vst [vmem:[#allocation23_spill] sm:$0xff] %v9219_v2  ;;  %v9230_v40 = vld [vmem:[%s8932_s27 + $0xe0] sm:$0xff]  ;;  %v9247_v61 = vsel %vm348_vm1, %v389_v44, %v9211_v15  ;;  %v9266_v44 = vld [vmem:[%s8932_s27 + $0xf8] sm:$0xff]  ;;  %v9277_v39 = vsel %vm348_vm1, %v9211_v15, %v392_v10  ;;  %v1920_v10 = vrot.slane %v9263_v48, 2 }
  0x2b   : > { %v1909_v8 = vsel %vm1869_vm3, %v9188_v9, %v1908_v28  ;;  %v9256_v28 = vrot.slane %v9230_v40, 1  ;;  %v1915_v9 = vrot.slane %v9227_v42, 2  ;;  %11820 = vst [vmem:[#allocation28_spill] sm:$0xff] %v9266_v44  ;;  %v9302_v15 = vld [vmem:[%s8932_s27 + $0x110] sm:$0xff] }
  0x2c   : > { %11825 = vst [vmem:[#allocation33_spill] sm:$0xff] %v9302_v15 }
  0x2d   : > { %7640 = vmatmul.mubr.msk.f32.gmra.mrb[10].mxu0 %vm431_vm2, %v9165_v52  ;;  %7840 = vmatmul.mubr.msk.f32.gmra.mrb[10].mxu1 %vm431_vm2, %v1899_v53  ;;  %v9215_v53 = vsel %vm348_vm1, %v384_v62, %v9184_v7  ;;  %v9237_v62 = vsel %vm348_vm1, %v9184_v7, %v387_v24  ;;  %11818 = vst [vmem:[#allocation26_spill] sm:$0xff] %v9256_v28  ;;  %v9283_v7 = vrot.slane %v9266_v44, 1 }
  0x2e   : > { %7642 = vmatprep.mubr.msk.f32.mxu0 %vm431_vm2, %v9175_v55  ;;  %7842 = vmatprep.mubr.msk.f32.mxu1 %vm431_vm2, %v9181_v6  ;;  %v9223_v6 = vrot.slane %v9194_v20, 2 }
  0x2f   : > { %11821 = vst [vmem:[#allocation29_spill] sm:$0xff] %v9283_v7  ;;  %v9319_v33 = vsel %vm348_vm1, %v399_v31, %v9283_v7  ;;  %v9338_v31 = vld [vmem:[%s8932_s27 + $0x128] sm:$0xff] }
  0x30   : > { %11816 = vst [vmem:[#allocation24_spill] sm:$0xff] %v9223_v6  ;;  %v9253_v24 = vsel %vm1869_vm3, %v1910_v56, %v9223_v6  ;;  %v397_v56 = vrot.slane %v229_v59, 1  ;;  %v1914_v21 = vsel %vm1869_vm3, %v9223_v6, %v1913_v51  ;;  %v232_v51 = vld [vmem:[%s8932_s27 + $0x100] sm:$0x3]  ;;  %v9299_v6 = vld [vmem:[%s8932_s27 + $0x108] sm:$0xff]  ;;  %11830 = vst [vmem:[#allocation38_spill] sm:$0xff] %v9338_v31 }
  0x31   : > { %7643 = vmatmul.mubr.msk.f32.gmra.mrb[12].mxu0 %vm431_vm2, %v9205_v32  ;;  %7843 = vmatmul.mubr.msk.f32.gmra.mrb[12].mxu1 %vm431_vm2, %v1904_v41  ;;  %v394_v41 = vrot.slane %v9227_v42, 1  ;;  %11817 = vst [vmem:[#allocation25_spill] sm:$0xff] %v9253_v24  ;;  %11824 = vst [vmem:[#allocation32_spill] sm:$0xff] %v9299_v6  ;;  %v402_v13 = vrot.slane %v232_v51, 1  ;;  %v1923_v57 = vrot.slane %v232_v51, 2  ;;  %v1928_v51 = vrot.slane %v235_v49, 2 }
  0x32   : > { %7645 = vmatprep.mubr.msk.f32.mxu0 %vm431_vm2, %v9215_v53  ;;  %7845 = vmatprep.mubr.msk.f32.mxu1 %vm431_vm2, %v9219_v2  ;;  %v9260_v2 = vrot.slane %v9230_v40, 2 }
  0x33   : > { %v9287_v59 = vsel %vm348_vm1, %v394_v41, %v9256_v28  ;;  %v9349_v34 = vsel %vm348_vm1, %v9283_v7, %v402_v13  ;;  %v9374_v7 = vld [vmem:[%s8932_s27 + $0x140] sm:$0xff] }
  0x34   : > { %11819 = vst [vmem:[#allocation27_spill] sm:$0xff] %v9260_v2  ;;  %v1919_v41 = vsel %vm1869_vm3, %v9260_v2, %v1918_v60  ;;  %v9328_v60 = vrot.slane %v9302_v15, 1  ;;  %11831 = vst [vmem:[#allocation39_spill] sm:$0xff] %v9349_v34 }
  0x35   : > { %7646 = vmatmul.mubr.msk.f32.gmra.mrb[14].mxu0 %vm431_vm2, %v9237_v62  ;;  %7846 = vmatmul.mubr.msk.f32.gmra.mrb[14].mxu1 %vm431_vm2, %v1909_v8  ;;  %v9291_v8 = vsel %vm1869_vm3, %v1915_v9, %v9260_v2  ;;  %v9309_v9 = vsel %vm348_vm1, %v9256_v28, %v397_v56  ;;  %v1925_v2 = vrot.slane %v9299_v6, 2  ;;  %v9335_v28 = vld [vmem:[%s8932_s27 + $0x120] sm:$0xff]  ;;  %11837 = vst [vmem:[#allocation45_spill] sm:$0xff] %v9374_v7 }
  0x36   : > { %7648 = vmatprep.mubr.msk.f32.mxu0 %vm431_vm2, %v9247_v61  ;;  %7848 = vmatprep.mubr.msk.f32.mxu1 %vm431_vm2, %v9253_v24  ;;  %11822 = vst [vmem:[#allocation30_spill] sm:$0xff] %v9291_v8  ;;  %v9295_v24 = vrot.slane %v9266_v44, 2  ;;  %11827 = vst [vmem:[#allocation35_spill] sm:$0xff] %v9328_v60  ;;  %v1930_v13 = vrot.slane %v9335_v28, 2  ;;  %v241_v44 = vld [vmem:[%s8932_s27 + $0x148] sm:$0x3] }
  0x37   : > { %11829 = vst [vmem:[#allocation37_spill] sm:$0xff] %v9335_v28 }
  0x38   : > { %11823 = vst [vmem:[#allocation31_spill] sm:$0xff] %v9295_v24  ;;  %v9325_v56 = vsel %vm1869_vm3, %v1920_v10, %v9295_v24  ;;  %v407_v10 = vrot.slane %v235_v49, 1  ;;  %v1924_v16 = vsel %vm1869_vm3, %v9295_v24, %v1923_v57  ;;  %v238_v57 = vld [vmem:[%s8932_s27 + $0x130] sm:$0x3]  ;;  %v9371_v24 = vld [vmem:[%s8932_s27 + $0x138] sm:$0xff] }
  0x39   : > { %7649 = vmatmul.mubr.msk.f32.gmra.mrb[16].mxu0 %vm431_vm2, %v9277_v39  ;;  %7849 = vmatmul.mubr.msk.f32.gmra.mrb[16].mxu1 %vm431_vm2, %v1914_v21  ;;  %v404_v21 = vrot.slane %v9299_v6, 1  ;;  %11826 = vst [vmem:[#allocation34_spill] sm:$0xff] %v9325_v56  ;;  %v9355_v6 = vrot.slane %v9338_v31, 1  ;;  %11836 = vst [vmem:[#allocation44_spill] sm:$0xff] %v9371_v24 }
  0x3a   : > { %7651 = vmatprep.mubr.msk.f32.mxu0 %vm431_vm2, %v9287_v59  ;;  %7851 = vmatprep.mubr.msk.f32.mxu1 %vm431_vm2, %v9291_v8  ;;  %v9332_v8 = vrot.slane %v9302_v15, 2  ;;  %v409_v15 = vrot.slane %v9335_v28, 1  ;;  %v412_v28 = vrot.slane %v238_v57, 1 }
  0x3b   : > { %11832 = vst [vmem:[#allocation40_spill] sm:$0xff] %v9355_v6  ;;  %v9359_v49 = vsel %vm348_vm1, %v404_v21, %v9328_v60 }
  0x3c   : > { %11828 = vst [vmem:[#allocation36_spill] sm:$0xff] %v9332_v8  ;;  %11833 = vst [vmem:[#allocation41_spill] sm:$0xff] %v9359_v49  ;;  %v1929_v21 = vsel %vm1869_vm3, %v9332_v8, %v1928_v51  ;;  %v9400_v51 = vrot.slane %v9374_v7, 1 }
  0x3d   : > { %7652 = vmatmul.mubr.msk.f32.gmra.mrb[18].mxu0 %vm431_vm2, %v9309_v9  ;;  %7852 = vmatmul.mubr.msk.f32.gmra.mrb[18].mxu1 %vm431_vm2, %v1919_v41  ;;  %v9363_v41 = vsel %vm1869_vm3, %v1925_v2, %v9332_v8  ;;  %v9381_v2 = vsel %vm348_vm1, %v9328_v60, %v407_v10  ;;  %v1935_v8 = vrot.slane %v9371_v24, 2  ;;  %v9407_v60 = vld [vmem:[%s8932_s27 + $0x150] sm:$0xff] }
  0x3e   : > { %7654 = vmatprep.mubr.msk.f32.mxu0 %vm431_vm2, %v9319_v33  ;;  %7854 = vmatprep.mubr.msk.f32.mxu1 %vm431_vm2, %v9325_v56  ;;  %11834 = vst [vmem:[#allocation42_spill] sm:$0xff] %v9363_v41  ;;  %v9367_v56 = vrot.slane %v9338_v31, 2  ;;  %11838 = vst [vmem:[#allocation46_spill] sm:$0xff] %v9381_v2  ;;  %v9391_v31 = vsel %vm348_vm1, %v409_v15, %v9355_v6  ;;  %v9410_v15 = vld [vmem:[%s8932_s27 + $0x158] sm:$0xff] }
  0x3f   : > { %11840 = vst [vmem:[#allocation48_spill] sm:$0xff] %v9400_v51  ;;  %11842 = vst [vmem:[#allocation50_spill] sm:$0xff] %v9407_v60 }
  0x40   : > { %11835 = vst [vmem:[#allocation43_spill] sm:$0xff] %v9367_v56  ;;  %v9397_v10 = vsel %vm1869_vm3, %v1930_v13, %v9367_v56  ;;  %11843 = vst [vmem:[#allocation51_spill] sm:$0xff] %v9410_v15  ;;  %v417_v13 = vrot.slane %v241_v44, 1 }
  0x41   : > { %7655 = vmatmul.mubr.msk.f32.gmra.mrb[20].mxu0 %vm431_vm2, %v9349_v34  ;;  %7855 = vmatmul.mubr.msk.f32.gmra.mrb[20].mxu1 %vm431_vm2, %v1924_v16  ;;  %v1933_v34 = vrot.slane %v238_v57, 2  ;;  %v414_v16 = vrot.slane %v9371_v24, 1  ;;  %11839 = vst [vmem:[#allocation47_spill] sm:$0xff] %v9397_v10  ;;  %v1938_v57 = vrot.slane %v241_v44, 2 }
  0x42   : > { %7657 = vmatprep.mubr.msk.f32.mxu0 %vm431_vm2, %v9359_v49  ;;  %7857 = vmatprep.mubr.msk.f32.mxu1 %vm431_vm2, %v9363_v41  ;;  %v9404_v41 = vrot.slane %v9374_v7, 2  ;;  %v9421_v7 = vsel %vm348_vm1, %v9355_v6, %v412_v28  ;;  %v9427_v49 = vrot.slane %v9410_v15, 1  ;;  %v9439_v28 = vrot.slane %v9410_v15, 2  ;;  %v244_v6 = vld [vmem:[%s8932_s27 + $0x160] sm:$0x3] }
  0x43   : > { %11844 = vst [vmem:[#allocation52_spill] sm:$0xff] %v9421_v7  ;;  %v1934_v24 = vsel %vm1869_vm3, %v9367_v56, %v1933_v34  ;;  %v9431_v44 = vsel %vm348_vm1, %v414_v16, %v9400_v51  ;;  %v9443_v34 = vld [vmem:[%s8932_s27 + $0x168] sm:$0xff]  ;;  %v9446_v56 = vld [vmem:[%s8932_s27 + $0x170] sm:$0xff] }
  0x44   : > { %11841 = vst [vmem:[#allocation49_spill] sm:$0xff] %v9404_v41  ;;  %11846 = vst [vmem:[#allocation54_spill] sm:$0xff] %v9443_v34  ;;  %v1939_v16 = vsel %vm1869_vm3, %v9404_v41, %v1938_v57  ;;  %v9471_v57 = vrot.slane %v9446_v56, 1 }
  0x45   : > { %7658 = vmatmul.mubr.msk.f32.gmra.mrb[22].mxu0 %vm431_vm2, %v9381_v2  ;;  %7858 = vmatmul.mubr.msk.f32.gmra.mrb[22].mxu1 %vm431_vm2, %v1929_v21  ;;  %v419_v2 = vrot.slane %v9407_v60, 1  ;;  %v9435_v21 = vsel %vm1869_vm3, %v1935_v8, %v9404_v41  ;;  %11847 = vst [vmem:[#allocation55_spill] sm:$0xff] %v9446_v56  ;;  %v9453_v8 = vsel %vm348_vm1, %v9400_v51, %v417_v13  ;;  %v1945_v41 = vrot.slane %v9443_v34, 2 }
  0x46   : > { %7660 = vmatprep.mubr.msk.f32.mxu0 %vm431_vm2, %v9391_v31  ;;  %7860 = vmatprep.mubr.msk.f32.mxu1 %vm431_vm2, %v9397_v10  ;;  %11845 = vst [vmem:[#allocation53_spill] sm:$0xff] %v9435_v21  ;;  %v1940_v10 = vrot.slane %v9407_v60, 2  ;;  %v422_v60 = vrot.slane %v244_v6, 1  ;;  %v9475_v51 = vrot.slane %v9446_v56, 2 }
  0x47   : > { %v9463_v15 = vsel %vm348_vm1, %v419_v2, %v9427_v49 }
  0x48   : > { %v9468_v13 = vsel %vm1869_vm3, %v1940_v10, %v9439_v28 }
  0x49   : > { %7661 = vmatmul.mubr.msk.f32.gmra.mrb[24].mxu0 %vm431_vm2, %v9421_v7  ;;  %7861 = vmatmul.mubr.msk.f32.gmra.mrb[24].mxu1 %vm431_vm2, %v1934_v24  ;;  %v1943_v7 = vrot.slane %v244_v6, 2  ;;  %v424_v24 = vrot.slane %v9443_v34, 1  ;;  %v9487_v6 = vsel %vm348_vm1, %v9427_v49, %v422_v60 }
  0x4a   : > { %7663 = vmatprep.mubr.msk.f32.mxu0 %vm431_vm2, %v9431_v44  ;;  %7863 = vmatprep.mubr.msk.f32.mxu1 %vm431_vm2, %v9435_v21  ;;  %v247_v21 = vld [vmem:[%s8932_s27 + $0x178] sm:$0x3] }
  0x4b   : > { %v1944_v2 = vsel %vm1869_vm3, %v9439_v28, %v1943_v7  ;;  %v427_v10 = vrot.slane %v247_v21, 1  ;;  %v1948_v56 = vrot.slane %v247_v21, 2  ;;  %v9493_v34 = vsel %vm348_vm1, %v424_v24, %v9471_v57 }
  0x4c   : > { %v11862_v24 = vld [vmem:[#allocation55_spill] sm:$0xff] }
  0x4d   : > { %7664 = vmatmul.mubr.msk.f32.gmra.mrb[26].mxu0 %vm431_vm2, %v9453_v8  ;;  %7864 = vmatmul.mubr.msk.f32.gmra.mrb[26].mxu1 %vm431_vm2, %v1939_v16  ;;  %v9497_v16 = vsel %vm1869_vm3, %v1945_v41, %v9475_v51  ;;  %v9508_v7 = vsel %vm348_vm1, %v9471_v57, %v427_v10  ;;  %v1949_v60 = vsel %vm1869_vm3, %v9475_v51, %v1948_v56  ;;  %v9526_v56 = vld [vmem:[%s11664_s1 + $0xc] sm:$0xf]  ;;  %v9531_v41 = vld [vmem:[%s11664_s1 + $0x1c] sm:$0xf] }
  0x4e   : > { %7666 = vmatprep.mubr.msk.f32.mxu0 %vm431_vm2, %v9463_v15  ;;  %7866 = vmatprep.mubr.msk.f32.mxu1 %vm431_vm2, %v9468_v13 }
  0x51   : > { %7667 = vmatmul.mubr.msk.f32.gmra.mrb[28].mxu0 %vm431_vm2, %v9487_v6  ;;  %7867 = vmatmul.mubr.msk.f32.gmra.mrb[28].mxu1 %vm431_vm2, %v1944_v2 }
  0x52   : > { %7669 = vmatprep.mubr.msk.f32.mxu0 %vm431_vm2, %v9493_v34  ;;  %7869 = vmatprep.mubr.msk.f32.mxu1 %vm431_vm2, %v9497_v16 }
  0x55   : > { %7670 = vmatmul.mubr.msk.f32.gmra.mrb[30].mxu0 %vm431_vm2, %v9508_v7  ;;  %7870 = vmatmul.mubr.msk.f32.gmra.mrb[30].mxu1 %vm431_vm2, %v1949_v60  ;;  %v9678_v60 = vld [vmem:[%s8932_s27 + $0x58] sm:$0x3] }
  0x56   : > { %7674 = vmatprep.mubr.msk.f32.mxu0 %vm431_vm2, %v8935_v4  ;;  %7874 = vmatprep.mubr.msk.f32.mxu1 %vm431_vm2, %v8957_v18  ;;  %v11848_v4 = vld [vmem:[#allocation28_spill] sm:$0xff] }
  0x57   : > { %v11850_v18 = vld [vmem:[#allocation32_spill] sm:$0xff] }
  0x59   : > { %7675 = vmatmul.mubr.msk.f32.vlgmr.msra.gmra.mrb[0].mxu0 %vm431_vm2, %v8938_v5  ;;  %7875 = vmatmul.mubr.msk.f32.vlgmr.msra.gmra.mrb[0].mxu1 %vm431_vm2, %v8975_v25  ;;  %v11849_v5 = vld [vmem:[#allocation39_spill] sm:$0xff]  ;;  %v11851_v25 = vld [vmem:[#allocation41_spill] sm:$0xff] }
  0x5a   : > { %7723 = vmatpush3.msk.msra.mxu0 %vm496_vm0, %v8988_v30  ;;  %7923 = vmatpush3.msk.msra.mxu1 %vm496_vm0, %v9007_v36  ;;  %v11852_v30 = vld [vmem:[#allocation33_spill] sm:$0xff]  ;;  %v11853_v36 = vld [vmem:[#allocation46_spill] sm:$0xff] }
  0x5b   : > { %7677 = vmatprep.mubr.msk.f32.mxu0 %vm431_vm2, %v8946_v11  ;;  %7877 = vmatprep.mubr.msk.f32.mxu1 %vm431_vm2, %v8980_v27 }
  0x5c   : > { %7772 = vmatprep.subr.msk.mxu0 %vm496_vm0, %v9526_v56  ;;  %7972 = vmatprep.subr.msk.mxu1 %vm496_vm0, %v9531_v41 }
  0x5d   : > { %7678 = vmatmul.mubr.msk.f32.gmra.mrb[2].mxu0 %vm431_vm2, %v8949_v12  ;;  %7878 = vmatmul.mubr.msk.f32.gmra.mrb[2].mxu1 %vm431_vm2, %v9013_v37  ;;  %v11854_v37 = vld [vmem:[#allocation37_spill] sm:$0xff] }
  0x5e   : > { %7680 = vmatprep.mubr.msk.f32.mxu0 %vm431_vm2, %v8965_v22  ;;  %7880 = vmatprep.mubr.msk.f32.mxu1 %vm431_vm2, %v9028_v43 }
  0x61   : > { %7681 = vmatmul.mubr.msk.f32.gmra.mrb[4].mxu0 %vm431_vm2, %v8968_v23  ;;  %7881 = vmatmul.mubr.msk.f32.gmra.mrb[4].mxu1 %vm431_vm2, %v9061_v54  ;;  %v11856_v54 = vld [vmem:[#allocation52_spill] sm:$0xff] }
  0x62   : > { %7683 = vmatprep.mubr.msk.f32.mxu0 %vm431_vm2, %v8983_v29  ;;  %7883 = vmatprep.mubr.msk.f32.mxu1 %vm431_vm2, %v9071_v58 }
  0x65   : > { %7684 = vmatmul.mubr.msk.f32.gmra.mrb[6].mxu0 %vm431_vm2, %v9002_v35  ;;  %7884 = vmatmul.mubr.msk.f32.gmra.mrb[6].mxu1 %vm431_vm2, %v9093_v1  ;;  %v11857_v1 = vld [vmem:[#allocation44_spill] sm:$0xff] }
  0x66   : > { %7686 = vmatprep.mubr.msk.f32.mxu0 %vm431_vm2, %v9032_v46  ;;  %7886 = vmatprep.mubr.msk.f32.mxu1 %vm431_vm2, %v9103_v3 }
  0x69   : > { %7687 = vmatmul.mubr.msk.f32.gmra.mrb[8].mxu0 %vm431_vm2, %v9035_v47  ;;  %7887 = vmatmul.mubr.msk.f32.gmra.mrb[8].mxu1 %vm431_vm2, %v9133_v26  ;;  %v11858_v26 = vld [vmem:[#allocation45_spill] sm:$0xff] }
  0x6a   : > { %7689 = vmatprep.mubr.msk.f32.mxu0 %vm431_vm2, %v9083_v63  ;;  %7889 = vmatprep.mubr.msk.f32.mxu1 %vm431_vm2, %v9143_v38 }
  0x6d   : > { %7690 = vmatmul.mubr.msk.f32.gmra.mrb[10].mxu0 %vm431_vm2, %v9086_v0  ;;  %7890 = vmatmul.mubr.msk.f32.gmra.mrb[10].mxu1 %vm431_vm2, %v9165_v52  ;;  %v11859_v52 = vld [vmem:[#allocation50_spill] sm:$0xff] }
  0x6e   : > { %7692 = vmatprep.mubr.msk.f32.mxu0 %vm431_vm2, %v9119_v17  ;;  %7892 = vmatprep.mubr.msk.f32.mxu1 %vm431_vm2, %v9175_v55 }
  0x71   : > { %7693 = vmatmul.mubr.msk.f32.gmra.mrb[12].mxu0 %vm431_vm2, %v9122_v19  ;;  %7893 = vmatmul.mubr.msk.f32.gmra.mrb[12].mxu1 %vm431_vm2, %v9205_v32  ;;  %v9650_v32 = vld [vmem:[%s8932_s27 + $0x28] sm:$0x3] }
  0x72   : > { %7695 = vmatprep.mubr.msk.f32.mxu0 %vm431_vm2, %v9155_v45  ;;  %7895 = vmatprep.mubr.msk.f32.mxu1 %vm431_vm2, %v9215_v53  ;;  %v1394_v21 = vrot.slane %v9650_v32, 1 }
  0x75   : > { %7696 = vmatmul.mubr.msk.f32.gmra.mrb[14].mxu0 %vm431_vm2, %v9158_v50  ;;  %7896 = vmatmul.mubr.msk.f32.gmra.mrb[14].mxu1 %vm431_vm2, %v9237_v62  ;;  %v11860_v62 = vld [vmem:[#allocation51_spill] sm:$0xff] }
  0x76   : > { %7698 = vmatprep.mubr.msk.f32.mxu0 %vm431_vm2, %v9191_v14  ;;  %7898 = vmatprep.mubr.msk.f32.mxu1 %vm431_vm2, %v9247_v61 }
  0x79   : > { %7699 = vmatmul.mubr.msk.f32.gmra.mrb[16].mxu0 %vm431_vm2, %v9194_v20  ;;  %7899 = vmatmul.mubr.msk.f32.gmra.mrb[16].mxu1 %vm431_vm2, %v9277_v39  ;;  %v11855_v39 = vld [vmem:[#allocation38_spill] sm:$0xff] }
  0x7a   : > { %7701 = vmatprep.mubr.msk.f32.mxu0 %vm431_vm2, %v9227_v42  ;;  %7901 = vmatprep.mubr.msk.f32.mxu1 %vm431_vm2, %v9287_v59 }
  0x7d   : > { %7702 = vmatmul.mubr.msk.f32.gmra.mrb[18].mxu0 %vm431_vm2, %v9230_v40  ;;  %7902 = vmatmul.mubr.msk.f32.gmra.mrb[18].mxu1 %vm431_vm2, %v9309_v9  ;;  %v11861_v9 = vld [vmem:[#allocation54_spill] sm:$0xff] }
  0x7e   : > { %7704 = vmatprep.mubr.msk.f32.mxu0 %vm431_vm2, %v9263_v48  ;;  %7904 = vmatprep.mubr.msk.f32.mxu1 %vm431_vm2, %v9319_v33 }
  0x81   : > { %7705 = vmatmul.mubr.msk.f32.gmra.mrb[20].mxu0 %vm431_vm2, %v11848_v4  ;;  %7905 = vmatmul.mubr.msk.f32.gmra.mrb[20].mxu1 %vm431_vm2, %v11849_v5 }
  0x82   : > { %7707 = vmatprep.mubr.msk.f32.mxu0 %vm431_vm2, %v11850_v18  ;;  %7907 = vmatprep.mubr.msk.f32.mxu1 %vm431_vm2, %v11851_v25 }
  0x85   : > { %7708 = vmatmul.mubr.msk.f32.gmra.mrb[22].mxu0 %vm431_vm2, %v11852_v30  ;;  %7908 = vmatmul.mubr.msk.f32.gmra.mrb[22].mxu1 %vm431_vm2, %v11853_v36  ;;  %v1404_v36 = vrot.slane %v9678_v60, 1 }
  0x86   : > { %7710 = vmatprep.mubr.msk.f32.mxu0 %vm431_vm2, %v11854_v37  ;;  %7910 = vmatprep.mubr.msk.f32.mxu1 %vm431_vm2, %v9391_v31 }
  0x89   : > { %7711 = vmatmul.mubr.msk.f32.gmra.mrb[24].mxu0 %vm431_vm2, %v11855_v39  ;;  %7911 = vmatmul.mubr.msk.f32.gmra.mrb[24].mxu1 %vm431_vm2, %v11856_v54  ;;  %v9708_v54 = vld [vmem:[%s8932_s27 + $0x70] sm:$0x3] }
  0x8a   : > { %7713 = vmatprep.mubr.msk.f32.mxu0 %vm431_vm2, %v11857_v1  ;;  %7913 = vmatprep.mubr.msk.f32.mxu1 %vm431_vm2, %v9431_v44 }
  0x8d   : > { %7714 = vmatmul.mubr.msk.f32.gmra.mrb[26].mxu0 %vm431_vm2, %v11858_v26  ;;  %7914 = vmatmul.mubr.msk.f32.gmra.mrb[26].mxu1 %vm431_vm2, %v9453_v8  ;;  %v9662_v8 = vld [vmem:[%s8932_s27 + $0x40] sm:$0x3] }
  0x8e   : > { %7716 = vmatprep.mubr.msk.f32.mxu0 %vm431_vm2, %v11859_v52  ;;  %7916 = vmatprep.mubr.msk.f32.mxu1 %vm431_vm2, %v9463_v15  ;;  %v1399_v10 = vrot.slane %v9662_v8, 1 }
  0x91   : > { %7717 = vmatmul.mubr.msk.f32.gmra.mrb[28].mxu0 %vm431_vm2, %v11860_v62  ;;  %7917 = vmatmul.mubr.msk.f32.gmra.mrb[28].mxu1 %vm431_vm2, %v9487_v6  ;;  %v11863_v6 = vld [vmem:[#allocation2_spill] sm:$0xff] }
  0x92   : > { %7719 = vmatprep.mubr.msk.f32.mxu0 %vm431_vm2, %v11861_v9  ;;  %7919 = vmatprep.mubr.msk.f32.mxu1 %vm431_vm2, %v9493_v34  ;;  %v9674_v2 = vsel %vm348_vm1, %v11863_v6, %v1394_v21  ;;  %v9728_v21 = vld [vmem:[%s8932_s27 + $0x88] sm:$0x3] }
  0x93   : > { %v1414_v6 = vrot.slane %v9728_v21, 1 }
  0x95   : > { %7720 = vmatmul.mubr.msk.f32.gmra.mrb[30].mxu0 %vm431_vm2, %v11862_v24  ;;  %7920 = vmatmul.mubr.msk.f32.gmra.mrb[30].mxu1 %vm431_vm2, %v9508_v7  ;;  %v9692_v7 = vld [vmem:[%s11664_s1 + $0x34] sm:$0xf] }
  0x96   : > { %7724 = vmatprep.mubr.msk.f32.mxu0 %vm431_vm2, %v8946_v11  ;;  %7924 = vmatprep.mubr.msk.f32.mxu1 %vm431_vm2, %v8980_v27  ;;  %v9687_v11 = vld [vmem:[%s11664_s1 + $0x24] sm:$0xf] }
  0x99   : > { %7725 = vmatmul.mubr.msk.f32.vlgmr.msra.gmra.mrb[0].mxu0 %vm431_vm2, %v8949_v12  ;;  %7925 = vmatmul.mubr.msk.f32.vlgmr.msra.gmra.mrb[0].mxu1 %vm431_vm2, %v9674_v2  ;;  %v11864_v12 = vld [vmem:[#allocation5_spill] sm:$0xff] }
  0x9a   : > { %7773 = vmatpush3.msk.msra.mxu0 %vm496_vm0, %v9526_v56  ;;  %7973 = vmatpush3.msk.msra.mxu1 %vm496_vm0, %v9531_v41  ;;  %v9700_v5 = vsel %vm348_vm1, %v11864_v12, %v1399_v10  ;;  %v1409_v41 = vrot.slane %v9708_v54, 1  ;;  %v9744_v10 = vld [vmem:[%s8932_s27 + $0xa0] sm:$0x3] }
  0x9b   : > { %7727 = vmatprep.mubr.msk.f32.mxu0 %vm431_vm2, %v8965_v22  ;;  %7927 = vmatprep.mubr.msk.f32.mxu1 %vm431_vm2, %v9028_v43  ;;  %v11865_v22 = vld [vmem:[#allocation8_spill] sm:$0xff]  ;;  %v1419_v12 = vrot.slane %v9744_v10, 1 }
  0x9c   : > { %8022 = vmatprep.subr.msk.mxu0 %vm496_vm0, %v9687_v11  ;;  %8222 = vmatprep.subr.msk.mxu1 %vm496_vm0, %v9692_v7  ;;  %v9724_v56 = vsel %vm348_vm1, %v11865_v22, %v1404_v36  ;;  %v9760_v36 = vld [vmem:[%s8932_s27 + $0xb8] sm:$0x3] }
  0x9d   : > { %7728 = vmatmul.mubr.msk.f32.gmra.mrb[2].mxu0 %vm431_vm2, %v8968_v23  ;;  %7928 = vmatmul.mubr.msk.f32.gmra.mrb[2].mxu1 %vm431_vm2, %v9700_v5  ;;  %v11866_v23 = vld [vmem:[#allocation10_spill] sm:$0xff]  ;;  %v1424_v22 = vrot.slane %v9760_v36, 1 }
  0x9e   : > { %7730 = vmatprep.mubr.msk.f32.mxu0 %vm431_vm2, %v8983_v29  ;;  %7930 = vmatprep.mubr.msk.f32.mxu1 %vm431_vm2, %v9071_v58  ;;  %v9740_v29 = vsel %vm348_vm1, %v11866_v23, %v1409_v41  ;;  %v9776_v41 = vld [vmem:[%s8932_s27 + $0xd0] sm:$0x3] }
  0x9f   : > { %v1429_v23 = vrot.slane %v9776_v41, 1 }
  0xa1   : > { %7731 = vmatmul.mubr.msk.f32.gmra.mrb[4].mxu0 %vm431_vm2, %v9002_v35  ;;  %7931 = vmatmul.mubr.msk.f32.gmra.mrb[4].mxu1 %vm431_vm2, %v9724_v56  ;;  %v11867_v35 = vld [vmem:[#allocation14_spill] sm:$0xff] }
  0xa2   : > { %7733 = vmatprep.mubr.msk.f32.mxu0 %vm431_vm2, %v9032_v46  ;;  %7933 = vmatprep.mubr.msk.f32.mxu1 %vm431_vm2, %v9103_v3  ;;  %v9756_v46 = vsel %vm348_vm1, %v11867_v35, %v1414_v6  ;;  %v9792_v6 = vld [vmem:[%s8932_s27 + $0xe8] sm:$0x3] }
  0xa3   : > { %v1434_v35 = vrot.slane %v9792_v6, 1 }
  0xa5   : > { %7734 = vmatmul.mubr.msk.f32.gmra.mrb[6].mxu0 %vm431_vm2, %v9035_v47  ;;  %7934 = vmatmul.mubr.msk.f32.gmra.mrb[6].mxu1 %vm431_vm2, %v9740_v29  ;;  %v11868_v47 = vld [vmem:[#allocation16_spill] sm:$0xff] }
  0xa6   : > { %7736 = vmatprep.mubr.msk.f32.mxu0 %vm431_vm2, %v9083_v63  ;;  %7936 = vmatprep.mubr.msk.f32.mxu1 %vm431_vm2, %v9143_v38  ;;  %v9772_v63 = vsel %vm348_vm1, %v11868_v47, %v1419_v12  ;;  %v9808_v12 = vld [vmem:[%s8932_s27 + $0x100] sm:$0x3] }
  0xa7   : > { %v1439_v47 = vrot.slane %v9808_v12, 1 }
  0xa9   : > { %7737 = vmatmul.mubr.msk.f32.gmra.mrb[8].mxu0 %vm431_vm2, %v9086_v0  ;;  %7937 = vmatmul.mubr.msk.f32.gmra.mrb[8].mxu1 %vm431_vm2, %v9756_v46  ;;  %v11869_v0 = vld [vmem:[#allocation20_spill] sm:$0xff] }
  0xaa   : > { %7739 = vmatprep.mubr.msk.f32.mxu0 %vm431_vm2, %v9119_v17  ;;  %7939 = vmatprep.mubr.msk.f32.mxu1 %vm431_vm2, %v9175_v55  ;;  %v9788_v17 = vsel %vm348_vm1, %v11869_v0, %v1424_v22  ;;  %v9824_v22 = vld [vmem:[%s8932_s27 + $0x118] sm:$0x3] }
  0xab   : > { %v1444_v0 = vrot.slane %v9824_v22, 1 }
  0xad   : > { %7740 = vmatmul.mubr.msk.f32.gmra.mrb[10].mxu0 %vm431_vm2, %v9122_v19  ;;  %7940 = vmatmul.mubr.msk.f32.gmra.mrb[10].mxu1 %vm431_vm2, %v9772_v63  ;;  %v11870_v19 = vld [vmem:[#allocation22_spill] sm:$0xff] }
  0xae   : > { %7742 = vmatprep.mubr.msk.f32.mxu0 %vm431_vm2, %v9155_v45  ;;  %7942 = vmatprep.mubr.msk.f32.mxu1 %vm431_vm2, %v9215_v53  ;;  %v9804_v45 = vsel %vm348_vm1, %v11870_v19, %v1429_v23  ;;  %v9840_v23 = vld [vmem:[%s8932_s27 + $0x130] sm:$0x3] }
  0xaf   : > { %v1449_v19 = vrot.slane %v9840_v23, 1 }
  0xb1   : > { %7743 = vmatmul.mubr.msk.f32.gmra.mrb[12].mxu0 %vm431_vm2, %v9158_v50  ;;  %7943 = vmatmul.mubr.msk.f32.gmra.mrb[12].mxu1 %vm431_vm2, %v9788_v17  ;;  %v11871_v50 = vld [vmem:[#allocation26_spill] sm:$0xff] }
  0xb2   : > { %7745 = vmatprep.mubr.msk.f32.mxu0 %vm431_vm2, %v9191_v14  ;;  %7945 = vmatprep.mubr.msk.f32.mxu1 %vm431_vm2, %v9247_v61  ;;  %v9820_v14 = vsel %vm348_vm1, %v11871_v50, %v1434_v35  ;;  %v9856_v35 = vld [vmem:[%s8932_s27 + $0x148] sm:$0x3] }
  0xb3   : > { %v1454_v50 = vrot.slane %v9856_v35, 1 }
  0xb5   : > { %7746 = vmatmul.mubr.msk.f32.gmra.mrb[14].mxu0 %vm431_vm2, %v9194_v20  ;;  %7946 = vmatmul.mubr.msk.f32.gmra.mrb[14].mxu1 %vm431_vm2, %v9804_v45 }
  0xb6   : > { %7748 = vmatprep.mubr.msk.f32.mxu0 %vm431_vm2, %v9227_v42  ;;  %7948 = vmatprep.mubr.msk.f32.mxu1 %vm431_vm2, %v9287_v59  ;;  %v11872_v42 = vld [vmem:[#allocation29_spill] sm:$0xff] }
  0xb7   : > { %v9836_v20 = vsel %vm348_vm1, %v11872_v42, %v1439_v47  ;;  %v9872_v47 = vld [vmem:[%s8932_s27 + $0x160] sm:$0x3] }
  0xb8   : > { %v1459_v42 = vrot.slane %v9872_v47, 1 }
  0xb9   : > { %7749 = vmatmul.mubr.msk.f32.gmra.mrb[16].mxu0 %vm431_vm2, %v9230_v40  ;;  %7949 = vmatmul.mubr.msk.f32.gmra.mrb[16].mxu1 %vm431_vm2, %v9820_v14 }
  0xba   : > { %7751 = vmatprep.mubr.msk.f32.mxu0 %vm431_vm2, %v9263_v48  ;;  %7951 = vmatprep.mubr.msk.f32.mxu1 %vm431_vm2, %v9319_v33  ;;  %v11873_v48 = vld [vmem:[#allocation35_spill] sm:$0xff] }
  0xbb   : > { %v9852_v40 = vsel %vm348_vm1, %v11873_v48, %v1444_v0  ;;  %v9888_v0 = vld [vmem:[%s8932_s27 + $0x178] sm:$0x3]  ;;  %v9891_v48 = vld [vmem:[%s8932_s27 + $0x180] sm:$0xff] }
  0xbc   : > { %11876 = vst [vmem:[#allocation28_spill] sm:$0xff] %v9891_v48 }
  0xbd   : > { %7752 = vmatmul.mubr.msk.f32.gmra.mrb[18].mxu0 %vm431_vm2, %v11848_v4  ;;  %7952 = vmatmul.mubr.msk.f32.gmra.mrb[18].mxu1 %vm431_vm2, %v9836_v20  ;;  %v11874_v4 = vld [vmem:[#allocation40_spill] sm:$0xff] }
  0xbe   : > { %7754 = vmatprep.mubr.msk.f32.mxu0 %vm431_vm2, %v11850_v18  ;;  %7954 = vmatprep.mubr.msk.f32.mxu1 %vm431_vm2, %v11851_v25  ;;  %v9868_v18 = vsel %vm348_vm1, %v11874_v4, %v1449_v19  ;;  %v1464_v19 = vrot.slane %v9888_v0, 1  ;;  %v1466_v4 = vrot.slane %v9891_v48, 1 }
  0xc1   : > { %7755 = vmatmul.mubr.msk.f32.gmra.mrb[20].mxu0 %vm431_vm2, %v11852_v30  ;;  %7955 = vmatmul.mubr.msk.f32.gmra.mrb[20].mxu1 %vm431_vm2, %v9852_v40  ;;  %v11875_v30 = vld [vmem:[#allocation48_spill] sm:$0xff] }
  0xc2   : > { %7757 = vmatprep.mubr.msk.f32.mxu0 %vm431_vm2, %v11854_v37  ;;  %7957 = vmatprep.mubr.msk.f32.mxu1 %vm431_vm2, %v9391_v31  ;;  %v9884_v37 = vsel %vm348_vm1, %v11875_v30, %v1454_v50 }
  0xc5   : > { %7758 = vmatmul.mubr.msk.f32.gmra.mrb[22].mxu0 %vm431_vm2, %v11855_v39  ;;  %7958 = vmatmul.mubr.msk.f32.gmra.mrb[22].mxu1 %vm431_vm2, %v9868_v18  ;;  %v9894_v39 = vld [vmem:[%s8932_s27 + $0x188] sm:$0xff] }
  0xc6   : > { %7760 = vmatprep.mubr.msk.f32.mxu0 %vm431_vm2, %v11857_v1  ;;  %7960 = vmatprep.mubr.msk.f32.mxu1 %vm431_vm2, %v9431_v44  ;;  %11877 = vst [vmem:[#allocation39_spill] sm:$0xff] %v9894_v39  ;;  %v9906_v1 = vsel %vm348_vm1, %v9427_v49, %v1459_v42  ;;  %v9911_v50 = vrot.slane %v9894_v39, 1  ;;  %v9926_v49 = vsel %vm348_vm1, %v9471_v57, %v1464_v19  ;;  %v2742_v19 = vrot.slane %v9662_v8, 2  ;;  %v11880_v8 = vld [vmem:[#allocation6_spill] sm:$0xff] }
  0xc8   : > { %v9931_v30 = vsel %vm348_vm1, %v1466_v4, %v9911_v50  ;;  %v2747_v4 = vrot.slane %v9678_v60, 2  ;;  %v11882_v60 = vld [vmem:[#allocation11_spill] sm:$0xff] }
  0xc9   : > { %7761 = vmatmul.mubr.msk.f32.gmra.mrb[24].mxu0 %vm431_vm2, %v11858_v26  ;;  %7961 = vmatmul.mubr.msk.f32.gmra.mrb[24].mxu1 %vm431_vm2, %v9884_v37  ;;  %v9914_v26 = vld [vmem:[%s8932_s27 + $0x190] sm:$0x3] }
  0xca   : > { %7763 = vmatprep.mubr.msk.f32.mxu0 %vm431_vm2, %v11859_v52  ;;  %7963 = vmatprep.mubr.msk.f32.mxu1 %vm431_vm2, %v9463_v15  ;;  %v1469_v52 = vrot.slane %v9914_v26, 1 }
  0xcc   : > { %v9943_v57 = vsel %vm348_vm1, %v9911_v50, %v1469_v52  ;;  %v11881_v52 = vld [vmem:[#allocation7_spill] sm:$0xff] }
  0xcd   : > { %7764 = vmatmul.mubr.msk.f32.gmra.mrb[26].mxu0 %vm431_vm2, %v11860_v62  ;;  %7964 = vmatmul.mubr.msk.f32.gmra.mrb[26].mxu1 %vm431_vm2, %v9906_v1  ;;  %v2737_v62 = vrot.slane %v9650_v32, 2  ;;  %v9963_v32 = vld [vmem:[%s11664_s1 + $0x20] sm:$0xf] }
  0xce   : > { %7766 = vmatprep.mubr.msk.f32.mxu0 %vm431_vm2, %v11861_v9  ;;  %7966 = vmatprep.mubr.msk.f32.mxu1 %vm431_vm2, %v9493_v34  ;;  %v11878_v9 = vld [vmem:[#allocation4_spill] sm:$0xff] }
  0xd1   : > { %7767 = vmatmul.mubr.msk.f32.gmra.mrb[28].mxu0 %vm431_vm2, %v11862_v24  ;;  %7967 = vmatmul.mubr.msk.f32.gmra.mrb[28].mxu1 %vm431_vm2, %v9926_v49  ;;  %v11879_v24 = vld [vmem:[#allocation3_spill] sm:$0xff] }
  0xd2   : > { %7769 = vmatprep.mubr.msk.f32.mxu0 %vm431_vm2, %v9891_v48  ;;  %7969 = vmatprep.mubr.msk.f32.mxu1 %vm431_vm2, %v9931_v30  ;;  %v2738_v42 = vsel %vm1869_vm3, %v11879_v24, %v2737_v62  ;;  %v2762_v24 = vrot.slane %v9744_v10, 2  ;;  %v11890_v10 = vld [vmem:[#allocation23_spill] sm:$0xff] }
  0xd5   : > { %7770 = vmatmul.mubr.msk.f32.gmra.mrb[30].mxu0 %vm431_vm2, %v9894_v39  ;;  %7970 = vmatmul.mubr.msk.f32.gmra.mrb[30].mxu1 %vm431_vm2, %v9943_v57 }
  0xd6   : > { %7774 = vmatprep.mubr.msk.f32.mxu0 %vm431_vm2, %v8980_v27  ;;  %7974 = vmatprep.mubr.msk.f32.mxu1 %vm431_vm2, %v11878_v9  ;;  %v9968_v27 = vld [vmem:[%s11664_s1 + $0x30] sm:$0xf]  ;;  %v2757_v9 = vrot.slane %v9728_v21, 2  ;;  %v11888_v21 = vld [vmem:[#allocation19_spill] sm:$0xff] }
  0xd9   : > { %7775 = vmatmul.mubr.msk.f32.vlgmr.msra.gmra.mrb[0].mxu0 %vm431_vm2, %v9674_v2  ;;  %7975 = vmatmul.mubr.msk.f32.vlgmr.msra.gmra.mrb[0].mxu1 %vm431_vm2, %v2738_v42  ;;  %v2743_v2 = vsel %vm1869_vm3, %v11880_v8, %v2742_v19  ;;  %v2767_v42 = vrot.slane %v9760_v36, 2  ;;  %v2772_v19 = vrot.slane %v9776_v41, 2  ;;  %v11892_v36 = vld [vmem:[#allocation25_spill] sm:$0xff]  ;;  %v2777_v8 = vrot.slane %v9792_v6, 2  ;;  %v11894_v41 = vld [vmem:[#allocation30_spill] sm:$0xff] }
  0xda   : > { %8023 = vmatpush3.msk.msra.mxu0 %vm496_vm0, %v9687_v11  ;;  %8223 = vmatpush3.msk.msra.mxu1 %vm496_vm0, %v9692_v7  ;;  %v2752_v7 = vrot.slane %v9708_v54, 2  ;;  %v11886_v54 = vld [vmem:[#allocation17_spill] sm:$0xff]  ;;  %v11896_v6 = vld [vmem:[#allocation34_spill] sm:$0xff] }
  0xdb   : > { %7777 = vmatprep.mubr.msk.f32.mxu0 %vm431_vm2, %v9028_v43  ;;  %7977 = vmatprep.mubr.msk.f32.mxu1 %vm431_vm2, %v11881_v52  ;;  %v11883_v43 = vld [vmem:[#allocation9_spill] sm:$0xff]  ;;  %v2792_v52 = vrot.slane %v9840_v23, 2 }
  0xdc   : > { %8072 = vmatprep.subr.msk.mxu0 %vm496_vm0, %v9963_v32  ;;  %8272 = vmatprep.subr.msk.mxu1 %vm496_vm0, %v9968_v27  ;;  %v2748_v11 = vsel %vm1869_vm3, %v11883_v43, %v2747_v4  ;;  %v2787_v4 = vrot.slane %v9824_v22, 2  ;;  %v11900_v22 = vld [vmem:[#allocation47_spill] sm:$0xff]  ;;  %v11902_v23 = vld [vmem:[#allocation53_spill] sm:$0xff]  ;;  %v2802_v43 = vrot.slane %v9872_v47, 2  ;;  %v10107_v47 = vrot.slane %v9894_v39, 2 }
  0xdd   : > { %7778 = vmatmul.mubr.msk.f32.gmra.mrb[2].mxu0 %vm431_vm2, %v9700_v5  ;;  %7978 = vmatmul.mubr.msk.f32.gmra.mrb[2].mxu1 %vm431_vm2, %v2743_v2  ;;  %v11884_v5 = vld [vmem:[#allocation13_spill] sm:$0xff]  ;;  %v2782_v2 = vrot.slane %v9808_v12, 2  ;;  %v11898_v12 = vld [vmem:[#allocation42_spill] sm:$0xff] }
  0xde   : > { %7780 = vmatprep.mubr.msk.f32.mxu0 %vm431_vm2, %v9071_v58  ;;  %7980 = vmatprep.mubr.msk.f32.mxu1 %vm431_vm2, %v11882_v60  ;;  %v11885_v58 = vld [vmem:[#allocation12_spill] sm:$0xff]  ;;  %v2797_v60 = vrot.slane %v9856_v35, 2  ;;  %v2809_v35 = vrot.slane %v9891_v48, 2 }
  0xdf   : > { %v2753_v62 = vsel %vm1869_vm3, %v11885_v58, %v2752_v7 }
  0xe1   : > { %7781 = vmatmul.mubr.msk.f32.gmra.mrb[4].mxu0 %vm431_vm2, %v9724_v56  ;;  %7981 = vmatmul.mubr.msk.f32.gmra.mrb[4].mxu1 %vm431_vm2, %v2748_v11  ;;  %v10113_v11 = vld [vmem:[%s8932_s27 + $0x20] sm:$0xff] }
  0xe2   : > { %7783 = vmatprep.mubr.msk.f32.mxu0 %vm431_vm2, %v9103_v3  ;;  %7983 = vmatprep.mubr.msk.f32.mxu1 %vm431_vm2, %v11884_v5  ;;  %v11887_v3 = vld [vmem:[#allocation15_spill] sm:$0xff] }
  0xe3   : > { %v2758_v56 = vsel %vm1869_vm3, %v11887_v3, %v2757_v9  ;;  %v6661_v5 = vld [vmem:[%s8932_s27 + $0x28] sm:$0x3] }
  0xe4   : > { %v3357_v58 = vrot.slane %v6661_v5, 1 }
  0xe5   : > { %7784 = vmatmul.mubr.msk.f32.gmra.mrb[6].mxu0 %vm431_vm2, %v9740_v29  ;;  %7984 = vmatmul.mubr.msk.f32.gmra.mrb[6].mxu1 %vm431_vm2, %v2753_v62  ;;  %v4870_v62 = vrot.slane %v6661_v5, 2 }
  0xe6   : > { %7786 = vmatprep.mubr.msk.f32.mxu0 %vm431_vm2, %v9143_v38  ;;  %7986 = vmatprep.mubr.msk.f32.mxu1 %vm431_vm2, %v11886_v54  ;;  %v11889_v38 = vld [vmem:[#allocation18_spill] sm:$0xff] }
  0xe7   : > { %v2763_v29 = vsel %vm1869_vm3, %v11889_v38, %v2762_v24  ;;  %v10161_v38 = vld [vmem:[%s8932_s27 + $0x48] sm:$0xff] }
  0xe9   : > { %7787 = vmatmul.mubr.msk.f32.gmra.mrb[8].mxu0 %vm431_vm2, %v9756_v46  ;;  %7987 = vmatmul.mubr.msk.f32.gmra.mrb[8].mxu1 %vm431_vm2, %v2758_v56 }
  0xea   : > { %7789 = vmatprep.mubr.msk.f32.mxu0 %vm431_vm2, %v9175_v55  ;;  %7989 = vmatprep.mubr.msk.f32.mxu1 %vm431_vm2, %v11888_v21  ;;  %v11891_v55 = vld [vmem:[#allocation21_spill] sm:$0xff] }
  0xeb   : > { %v2768_v46 = vsel %vm1869_vm3, %v11891_v55, %v2767_v42 }
  0xed   : > { %7790 = vmatmul.mubr.msk.f32.gmra.mrb[10].mxu0 %vm431_vm2, %v9772_v63  ;;  %7990 = vmatmul.mubr.msk.f32.gmra.mrb[10].mxu1 %vm431_vm2, %v2763_v29  ;;  %v10164_v29 = vld [vmem:[%s8932_s27 + $0x50] sm:$0xff] }
  0xee   : > { %7792 = vmatprep.mubr.msk.f32.mxu0 %vm431_vm2, %v9215_v53  ;;  %7992 = vmatprep.mubr.msk.f32.mxu1 %vm431_vm2, %v11890_v10  ;;  %v11893_v53 = vld [vmem:[#allocation24_spill] sm:$0xff] }
  0xef   : > { %v2773_v63 = vsel %vm1869_vm3, %v11893_v53, %v2772_v19  ;;  %v6667_v19 = vld [vmem:[%s8932_s27 + $0x58] sm:$0x3]  ;;  %v10179_v53 = vrot.slane %v10164_v29, 1 }
  0xf1   : > { %7793 = vmatmul.mubr.msk.f32.gmra.mrb[12].mxu0 %vm431_vm2, %v9788_v17  ;;  %7993 = vmatmul.mubr.msk.f32.gmra.mrb[12].mxu1 %vm431_vm2, %v2768_v46  ;;  %11905 = vst [vmem:[#allocation41_spill] sm:$0xff] %v10179_v53 }
  0xf2   : > { %7795 = vmatprep.mubr.msk.f32.mxu0 %vm431_vm2, %v9247_v61  ;;  %7995 = vmatprep.mubr.msk.f32.mxu1 %vm431_vm2, %v11892_v36  ;;  %v11895_v61 = vld [vmem:[#allocation27_spill] sm:$0xff]  ;;  %v3364_v36 = vrot.slane %v10161_v38, 1 }
  0xf3   : > { %v2778_v17 = vsel %vm1869_vm3, %v11895_v61, %v2777_v8  ;;  %v10184_v8 = vld [vmem:[%s8932_s27 + $0x60] sm:$0xff] }
  0xf5   : > { %7796 = vmatmul.mubr.msk.f32.gmra.mrb[14].mxu0 %vm431_vm2, %v9804_v45  ;;  %7996 = vmatmul.mubr.msk.f32.gmra.mrb[14].mxu1 %vm431_vm2, %v2773_v63  ;;  %v4878_v63 = vrot.slane %v10164_v29, 2 }
  0xf6   : > { %7798 = vmatprep.mubr.msk.f32.mxu0 %vm431_vm2, %v9287_v59  ;;  %7998 = vmatprep.mubr.msk.f32.mxu1 %vm431_vm2, %v11894_v41  ;;  %v11897_v59 = vld [vmem:[#allocation31_spill] sm:$0xff] }
  0xf7   : > { %v2783_v45 = vsel %vm1869_vm3, %v11897_v59, %v2782_v2  ;;  %v10187_v41 = vld [vmem:[%s8932_s27 + $0x68] sm:$0xff]  ;;  %v3367_v59 = vrot.slane %v6667_v19, 1 }
  0xf9   : > { %7799 = vmatmul.mubr.msk.f32.gmra.mrb[16].mxu0 %vm431_vm2, %v9820_v14  ;;  %7999 = vmatmul.mubr.msk.f32.gmra.mrb[16].mxu1 %vm431_vm2, %v2778_v17 }
  0xfa   : > { %7801 = vmatprep.mubr.msk.f32.mxu0 %vm431_vm2, %v9319_v33  ;;  %8001 = vmatprep.mubr.msk.f32.mxu1 %vm431_vm2, %v11896_v6  ;;  %v11899_v33 = vld [vmem:[#allocation36_spill] sm:$0xff] }
  0xfb   : > { %v2788_v14 = vsel %vm1869_vm3, %v11899_v33, %v2787_v4  ;;  %v10207_v4 = vld [vmem:[%s11664_s1 + $0x28] sm:$0xf]  ;;  %v3369_v33 = vrot.slane %v10184_v8, 1 }
  0xfd   : > { %7802 = vmatmul.mubr.msk.f32.gmra.mrb[18].mxu0 %vm431_vm2, %v9836_v20  ;;  %8002 = vmatmul.mubr.msk.f32.gmra.mrb[18].mxu1 %vm431_vm2, %v2783_v45  ;;  %v4880_v45 = vrot.slane %v6667_v19, 2  ;;  %v10302_v19 = vld [vmem:[%s8932_s27 + $0xa8] sm:$0xff] }
  0xfe   : > { %7804 = vmatprep.mubr.msk.f32.mxu0 %vm431_vm2, %v11851_v25  ;;  %8004 = vmatprep.mubr.msk.f32.mxu1 %vm431_vm2, %v11898_v12  ;;  %v11901_v25 = vld [vmem:[#allocation43_spill] sm:$0xff]  ;;  %v10212_v12 = vld [vmem:[%s11664_s1 + $0x38] sm:$0xf]  ;;  %11909 = vst [vmem:[#allocation38_spill] sm:$0xff] %v10302_v19 }
  0xff   : > { %v2793_v20 = vsel %vm1869_vm3, %v11901_v25, %v2792_v52  ;;  %v11736_v52 = vrot.slane %v10184_v8, 2  ;;  %v6670_v25 = vld [vmem:[%s8932_s27 + $0x70] sm:$0x3] }
 0x101   : > { %7805 = vmatmul.mubr.msk.f32.gmra.mrb[20].mxu0 %vm431_vm2, %v9852_v40  ;;  %8005 = vmatmul.mubr.msk.f32.gmra.mrb[20].mxu1 %vm431_vm2, %v2788_v14  ;;  %v10220_v14 = vrot.slane %v10187_v41, 1 }
 0x102   : > { %7807 = vmatprep.mubr.msk.f32.mxu0 %vm431_vm2, %v9391_v31  ;;  %8007 = vmatprep.mubr.msk.f32.mxu1 %vm431_vm2, %v11900_v22  ;;  %v11903_v31 = vld [vmem:[#allocation49_spill] sm:$0xff]  ;;  %v4883_v22 = vrot.slane %v10187_v41, 2 }
 0x103   : > { %v2798_v40 = vsel %vm1869_vm3, %v11903_v31, %v2797_v60  ;;  %11906 = vst [vmem:[#allocation33_spill] sm:$0xff] %v10220_v14  ;;  %v10239_v60 = vld [vmem:[%s8932_s27 + $0x80] sm:$0xff]  ;;  %v3372_v31 = vrot.slane %v6670_v25, 1 }
 0x105   : > { %7808 = vmatmul.mubr.msk.f32.gmra.mrb[22].mxu0 %vm431_vm2, %v9868_v18  ;;  %8008 = vmatmul.mubr.msk.f32.gmra.mrb[22].mxu1 %vm431_vm2, %v2793_v20  ;;  %v2807_v18 = vrot.slane %v9888_v0, 2  ;;  %v10236_v20 = vld [vmem:[%s8932_s27 + $0x78] sm:$0xff]  ;;  %v10281_v5 = vsel %vm348_vm1, %v10220_v14, %v3372_v31  ;;  %v11733_v31 = vrot.slane %v10302_v19, 2 }
 0x106   : > { %7810 = vmatprep.mubr.msk.f32.mxu0 %vm431_vm2, %v9431_v44  ;;  %8010 = vmatprep.mubr.msk.f32.mxu1 %vm431_vm2, %v11902_v23  ;;  %v2803_v44 = vsel %vm1869_vm3, %v9439_v28, %v2802_v43  ;;  %v10126_v28 = vsel %vm1869_vm3, %v2809_v35, %v10107_v47  ;;  %v10250_v23 = vsel %vm348_vm1, %v10179_v53, %v3367_v59 }
 0x107   : > { %v4881_v43 = vsel %vm1869_vm3, %v4878_v63, %v4880_v45  ;;  %v10258_v35 = vsel %vm348_vm1, %v3369_v33, %v10220_v14 }
 0x109   : > { %7811 = vmatmul.mubr.msk.f32.gmra.mrb[24].mxu0 %vm431_vm2, %v9884_v37  ;;  %8011 = vmatmul.mubr.msk.f32.gmra.mrb[24].mxu1 %vm431_vm2, %v2798_v40  ;;  %v10110_v37 = vld [vmem:[%s8932_s27 + $0x18] sm:$0xff]  ;;  %v4885_v40 = vrot.slane %v6670_v25, 2  ;;  %v3384_v25 = vrot.slane %v10302_v19, 1 }
 0x10a   : > { %7813 = vmatprep.mubr.msk.f32.mxu0 %vm431_vm2, %v9463_v15  ;;  %8013 = vmatprep.mubr.msk.f32.mxu1 %vm431_vm2, %v9468_v13  ;;  %v2808_v15 = vsel %vm1869_vm3, %v9475_v51, %v2807_v18  ;;  %v2812_v13 = vrot.slane %v9914_v26, 2  ;;  %v3354_v0 = vrot.slane %v10110_v37, 1  ;;  %v4867_v7 = vrot.slane %v10110_v37, 2  ;;  %v10138_v51 = vld [vmem:[%s8932_s27 + $0x30] sm:$0xff]  ;;  %v6673_v18 = vld [vmem:[%s8932_s27 + $0x88] sm:$0x3] }
 0x10b   : > { %v3359_v3 = vrot.slane %v10138_v51, 1  ;;  %v11739_v24 = vrot.slane %v10138_v51, 2 }
 0x10c   : > { %v2813_v26 = vsel %vm1869_vm3, %v10107_v47, %v2812_v13  ;;  %v10266_v13 = vrot.slane %v10239_v60, 1 }
 0x10d   : > { %7814 = vmatmul.mubr.msk.f32.gmra.mrb[26].mxu0 %vm431_vm2, %v9906_v1  ;;  %8014 = vmatmul.mubr.msk.f32.gmra.mrb[26].mxu1 %vm431_vm2, %v2803_v44  ;;  %v3355_v1 = vrot.slane %v10113_v11, 1  ;;  %v4884_v44 = vsel %vm1869_vm3, %v11736_v52, %v4883_v22 }
 0x10e   : > { %7816 = vmatprep.mubr.msk.f32.mxu0 %vm431_vm2, %v9493_v34  ;;  %8016 = vmatprep.mubr.msk.f32.mxu1 %vm431_vm2, %v9497_v16  ;;  %v4868_v34 = vrot.slane %v10113_v11, 2  ;;  %v10141_v16 = vld [vmem:[%s8932_s27 + $0x38] sm:$0xff]  ;;  %11907 = vst [vmem:[#allocation46_spill] sm:$0xff] %v10266_v13 }
 0x10f   : > { %v10151_v9 = vsel %vm348_vm1, %v3354_v0, %v3355_v1  ;;  %v10156_v56 = vrot.slane %v10141_v16, 1  ;;  %v4873_v21 = vrot.slane %v10141_v16, 2  ;;  %v10173_v55 = vsel %vm348_vm1, %v3355_v1, %v3357_v58 }
 0x110   : > { %v4869_v54 = vsel %vm1869_vm3, %v4867_v7, %v4868_v34  ;;  %v4871_v46 = vsel %vm1869_vm3, %v4868_v34, %v4870_v62  ;;  %v11735_v0 = vrot.slane %v10236_v20, 2  ;;  %v4888_v1 = vrot.slane %v10239_v60, 2  ;;  %v10271_v7 = vld [vmem:[%s8932_s27 + $0x90] sm:$0xff]  ;;  %v10274_v34 = vld [vmem:[%s8932_s27 + $0x98] sm:$0xff] }
 0x111   : > { %7817 = vmatmul.mubr.msk.f32.gmra.mrb[28].mxu0 %vm431_vm2, %v9926_v49  ;;  %8017 = vmatmul.mubr.msk.f32.gmra.mrb[28].mxu1 %vm431_vm2, %v2808_v15  ;;  %v6664_v49 = vld [vmem:[%s8932_s27 + $0x40] sm:$0x3]  ;;  %11904 = vst [vmem:[#allocation32_spill] sm:$0xff] %v10156_v56  ;;  %v10191_v61 = vsel %vm348_vm1, %v3359_v3, %v10156_v56  ;;  %v4874_v17 = vsel %vm1869_vm3, %v11739_v24, %v4873_v21  ;;  %v3374_v15 = vrot.slane %v10236_v20, 1  ;;  %v3377_v58 = vrot.slane %v6673_v18, 1 }
 0x112   : > { %7819 = vmatprep.mubr.msk.f32.mxu0 %vm431_vm2, %v9931_v30  ;;  %8019 = vmatprep.mubr.msk.f32.mxu1 %vm431_vm2, %v10126_v28  ;;  %v3362_v42 = vrot.slane %v6664_v49, 1  ;;  %v4875_v10 = vrot.slane %v6664_v49, 2  ;;  %v4890_v62 = vrot.slane %v6673_v18, 2  ;;  %v3379_v49 = vrot.slane %v10271_v7, 1 }
 0x113   : > { %v11734_v3 = vrot.slane %v10271_v7, 2 }
 0x114   : > { %v10201_v2 = vsel %vm348_vm1, %v10156_v56, %v3362_v42  ;;  %v4876_v6 = vsel %vm1869_vm3, %v4873_v21, %v4875_v10  ;;  %v4893_v21 = vrot.slane %v10274_v34, 2  ;;  %v6676_v42 = vld [vmem:[%s8932_s27 + $0xa0] sm:$0x3]  ;;  %v10296_v10 = vsel %vm348_vm1, %v3374_v15, %v10266_v13  ;;  %v6691_v56 = vld [vmem:[%s8932_s27 + $0x118] sm:$0x3] }
 0x115   : > { %7820 = vmatmul.mubr.msk.f32.gmra.mrb[30].mxu0 %vm431_vm2, %v9943_v57  ;;  %8020 = vmatmul.mubr.msk.f32.gmra.mrb[30].mxu1 %vm431_vm2, %v2813_v26  ;;  %v11738_v57 = vrot.slane %v10161_v38, 2  ;;  %v4886_v26 = vsel %vm1869_vm3, %v4883_v22, %v4885_v40  ;;  %v4891_v59 = vsel %vm1869_vm3, %v4888_v1, %v4890_v62  ;;  %v6679_v22 = vld [vmem:[%s8932_s27 + $0xb8] sm:$0x3]  ;;  %v4920_v39 = vrot.slane %v6691_v56, 2 }
 0x116   : > { %8024 = vmatprep.mubr.msk.f32.mxu0 %vm431_vm2, %v10151_v9  ;;  %8224 = vmatprep.mubr.msk.f32.mxu1 %vm431_vm2, %v4869_v54  ;;  %v10289_v54 = vrot.slane %v10274_v34, 1  ;;  %v4894_v33 = vsel %vm1869_vm3, %v11734_v3, %v4893_v21 }
 0x118   : > { %11908 = vst [vmem:[#allocation37_spill] sm:$0xff] %v10289_v54  ;;  %v10320_v45 = vsel %vm348_vm1, %v3379_v49, %v10289_v54 }
 0x119   : > { %8025 = vmatmul.mubr.msk.f32.vlgmr.msra.gmra.mrb[32].mxu0 %vm431_vm2, %v10173_v55  ;;  %8225 = vmatmul.mubr.msk.f32.vlgmr.msra.gmra.mrb[32].mxu1 %vm431_vm2, %v4871_v46  ;;  %v4889_v46 = vsel %vm1869_vm3, %v11735_v0, %v4888_v1  ;;  %11910 = vst [vmem:[#allocation52_spill] sm:$0xff] %v10320_v45  ;;  %v3387_v1 = vrot.slane %v6679_v22, 1  ;;  %v6685_v0 = vld [vmem:[%s8932_s27 + $0xe8] sm:$0x3] }
 0x11a   : > { %8073 = vmatpush3.msk.msra.mxu0 %vm496_vm0, %v9963_v32  ;;  %8273 = vmatpush3.msk.msra.mxu1 %vm496_vm0, %v9968_v27  ;;  %v10230_v32 = vsel %vm348_vm1, %v3364_v36, %v10179_v53  ;;  %v4879_v27 = vsel %vm1869_vm3, %v11738_v57, %v4878_v63  ;;  %v10305_v36 = vld [vmem:[%s8932_s27 + $0xb0] sm:$0xff]  ;;  %v10312_v63 = vsel %vm348_vm1, %v10266_v13, %v3377_v58  ;;  %v3397_v57 = vrot.slane %v6685_v0, 1 }
 0x11b   : > { %8027 = vmatprep.mubr.msk.f32.mxu0 %vm431_vm2, %v10191_v61  ;;  %8227 = vmatprep.mubr.msk.f32.mxu1 %vm431_vm2, %v4874_v17  ;;  %v3382_v17 = vrot.slane %v6676_v42, 1  ;;  %v4898_v40 = vrot.slane %v10305_v36, 2  ;;  %v4910_v24 = vrot.slane %v6685_v0, 2 }
 0x11c   : > { %8122 = vmatprep.subr.msk.mxu0 %vm496_vm0, %v10207_v4  ;;  %8322 = vmatprep.subr.msk.mxu1 %vm496_vm0, %v10212_v12 }
 0x11d   : > { %8028 = vmatmul.mubr.msk.f32.gmra.mrb[34].mxu0 %vm431_vm2, %v10201_v2  ;;  %8228 = vmatmul.mubr.msk.f32.gmra.mrb[34].mxu1 %vm431_vm2, %v4876_v6  ;;  %v4895_v6 = vrot.slane %v6676_v42, 2  ;;  %v10343_v18 = vsel %vm348_vm1, %v10289_v54, %v3382_v17  ;;  %v4899_v17 = vsel %vm1869_vm3, %v11733_v31, %v4898_v40 }
 0x11e   : > { %8030 = vmatprep.mubr.msk.f32.mxu0 %vm431_vm2, %v10230_v32  ;;  %8230 = vmatprep.mubr.msk.f32.mxu1 %vm431_vm2, %v4879_v27  ;;  %v10328_v27 = vrot.slane %v10305_v36, 1 }
 0x11f   : > { %v4896_v15 = vsel %vm1869_vm3, %v4893_v21, %v4895_v6  ;;  %v10364_v6 = vld [vmem:[%s8932_s27 + $0xd8] sm:$0xff] }
 0x120   : > { %11911 = vst [vmem:[#allocation44_spill] sm:$0xff] %v10328_v27  ;;  %v10358_v21 = vsel %vm348_vm1, %v3384_v25, %v10328_v27  ;;  %v11917_v0 = vrot.slane %v10364_v6, 2 }
 0x121   : > { %8031 = vmatmul.mubr.msk.f32.gmra.mrb[36].mxu0 %vm431_vm2, %v10250_v23  ;;  %8231 = vmatmul.mubr.msk.f32.gmra.mrb[36].mxu1 %vm431_vm2, %v4881_v43  ;;  %v10333_v43 = vld [vmem:[%s8932_s27 + $0xc0] sm:$0xff]  ;;  %11913 = vst [vmem:[#allocation50_spill] sm:$0xff] %v10358_v21 }
 0x122   : > { %8033 = vmatprep.mubr.msk.f32.mxu0 %vm431_vm2, %v10258_v35  ;;  %8233 = vmatprep.mubr.msk.f32.mxu1 %vm431_vm2, %v4884_v44  ;;  %v10336_v44 = vld [vmem:[%s8932_s27 + $0xc8] sm:$0xff]  ;;  %v3389_v58 = vrot.slane %v10333_v43, 1  ;;  %v11737_v49 = vrot.slane %v10333_v43, 2 }
 0x123   : > { %v10351_v62 = vrot.slane %v10336_v44, 1  ;;  %v4903_v42 = vrot.slane %v10336_v44, 2 }
 0x125   : > { %8034 = vmatmul.mubr.msk.f32.gmra.mrb[38].mxu0 %vm431_vm2, %v10281_v5  ;;  %8234 = vmatmul.mubr.msk.f32.gmra.mrb[38].mxu1 %vm431_vm2, %v4886_v26  ;;  %v4900_v26 = vrot.slane %v6679_v22, 2  ;;  %11912 = vst [vmem:[#allocation45_spill] sm:$0xff] %v10351_v62  ;;  %v10382_v3 = vsel %vm348_vm1, %v3389_v58, %v10351_v62 }
 0x126   : > { %8036 = vmatprep.mubr.msk.f32.mxu0 %vm431_vm2, %v10296_v10  ;;  %8236 = vmatprep.mubr.msk.f32.mxu1 %vm431_vm2, %v4889_v46  ;;  %v6682_v46 = vld [vmem:[%s8932_s27 + $0xd0] sm:$0x3] }
 0x127   : > { %v3392_v22 = vrot.slane %v6682_v46, 1  ;;  %v4905_v25 = vrot.slane %v6682_v46, 2  ;;  %v4901_v31 = vsel %vm1869_vm3, %v4898_v40, %v4900_v26  ;;  %v10395_v40 = vld [vmem:[%s8932_s27 + $0xf0] sm:$0xff]  ;;  %v10398_v26 = vld [vmem:[%s8932_s27 + $0xf8] sm:$0xff] }
 0x128   : > { %11915 = vst [vmem:[#allocation54_spill] sm:$0xff] %v10398_v26  ;;  %v3399_v52 = vrot.slane %v10395_v40, 1  ;;  %v4913_v54 = vrot.slane %v10398_v26, 2  ;;  %v11921_v53 = vrot.slane %v10395_v40, 2 }
 0x129   : > { %8037 = vmatmul.mubr.msk.f32.gmra.mrb[40].mxu0 %vm431_vm2, %v10312_v63  ;;  %8237 = vmatmul.mubr.msk.f32.gmra.mrb[40].mxu1 %vm431_vm2, %v4891_v59  ;;  %v10367_v59 = vld [vmem:[%s8932_s27 + $0xe0] sm:$0xff]  ;;  %v10405_v58 = vsel %vm348_vm1, %v10351_v62, %v3392_v22  ;;  %v10429_v62 = vld [vmem:[%s8932_s27 + $0x110] sm:$0xff] }
 0x12a   : > { %8039 = vmatprep.mubr.msk.f32.mxu0 %vm431_vm2, %v10320_v45  ;;  %8239 = vmatprep.mubr.msk.f32.mxu1 %vm431_vm2, %v4894_v33  ;;  %v10374_v33 = vsel %vm348_vm1, %v10328_v27, %v3387_v1  ;;  %v3394_v1 = vrot.slane %v10364_v6, 1  ;;  %v10390_v46 = vrot.slane %v10367_v59, 1  ;;  %v10413_v27 = vrot.slane %v10398_v26, 1  ;;  %v6688_v22 = vld [vmem:[%s8932_s27 + $0x100] sm:$0x3]  ;;  %11919 = vst [vmem:[#allocation5_spill] sm:$0xff] %v10429_v62 }
 0x12b   : > { %v4915_v13 = vrot.slane %v6688_v22, 2 }
 0x12c   : > { %11914 = vst [vmem:[#allocation51_spill] sm:$0xff] %v10390_v46  ;;  %11916 = vst [vmem:[#allocation55_spill] sm:$0xff] %v10413_v27  ;;  %v10444_v14 = vsel %vm348_vm1, %v3399_v52, %v10413_v27 }
 0x12d   : > { %8040 = vmatmul.mubr.msk.f32.gmra.mrb[42].mxu0 %vm431_vm2, %v10343_v18  ;;  %8240 = vmatmul.mubr.msk.f32.gmra.mrb[42].mxu1 %vm431_vm2, %v4896_v15  ;;  %v4904_v15 = vsel %vm1869_vm3, %v11737_v49, %v4903_v42  ;;  %v4906_v49 = vsel %vm1869_vm3, %v4903_v42, %v4905_v25  ;;  %v10420_v42 = vsel %vm348_vm1, %v3394_v1, %v10390_v46  ;;  %v3402_v1 = vrot.slane %v6688_v22, 1 }
 0x12e   : > { %8042 = vmatprep.mubr.msk.f32.mxu0 %vm431_vm2, %v10358_v21  ;;  %8242 = vmatprep.mubr.msk.f32.mxu1 %vm431_vm2, %v4899_v17  ;;  %v4908_v17 = vrot.slane %v10367_v59, 2  ;;  %11920 = vst [vmem:[#allocation8_spill] sm:$0xff] %v10444_v14  ;;  %v10452_v22 = vrot.slane %v10429_v62, 1  ;;  %v4916_v52 = vsel %vm1869_vm3, %v4913_v54, %v4915_v13 }
 0x130   : > { %v4909_v25 = vsel %vm1869_vm3, %v11917_v0, %v4908_v17  ;;  %v4911_v0 = vsel %vm1869_vm3, %v4908_v17, %v4910_v24  ;;  %11922 = vst [vmem:[#allocation10_spill] sm:$0xff] %v10452_v22  ;;  %v10457_v24 = vld [vmem:[%s8932_s27 + $0x120] sm:$0xff]  ;;  %v10460_v17 = vld [vmem:[%s8932_s27 + $0x128] sm:$0xff] }
 0x131   : > { %8043 = vmatmul.mubr.msk.f32.gmra.mrb[44].mxu0 %vm431_vm2, %v10374_v33  ;;  %8243 = vmatmul.mubr.msk.f32.gmra.mrb[44].mxu1 %vm431_vm2, %v4901_v31  ;;  %v10436_v31 = vsel %vm348_vm1, %v10390_v46, %v3397_v57  ;;  %11923 = vst [vmem:[#allocation14_spill] sm:$0xff] %v10457_v24  ;;  %11924 = vst [vmem:[#allocation16_spill] sm:$0xff] %v10460_v17  ;;  %v3407_v46 = vrot.slane %v6691_v56, 1  ;;  %v3409_v48 = vrot.slane %v10457_v24, 1  ;;  %v4923_v26 = vrot.slane %v10460_v17, 2 }
 0x132   : > { %8045 = vmatprep.mubr.msk.f32.mxu0 %vm431_vm2, %v10382_v3  ;;  %8245 = vmatprep.mubr.msk.f32.mxu1 %vm431_vm2, %v4904_v15  ;;  %v10426_v15 = vld [vmem:[%s8932_s27 + $0x108] sm:$0xff] }
 0x133   : > { %11918 = vst [vmem:[#allocation2_spill] sm:$0xff] %v10426_v15  ;;  %v3404_v57 = vrot.slane %v10426_v15, 1  ;;  %v11928_v56 = vrot.slane %v10426_v15, 2 }
 0x135   : > { %8046 = vmatmul.mubr.msk.f32.gmra.mrb[46].mxu0 %vm431_vm2, %v10405_v58  ;;  %8246 = vmatmul.mubr.msk.f32.gmra.mrb[46].mxu1 %vm431_vm2, %v4906_v49  ;;  %v4914_v49 = vsel %vm1869_vm3, %v11921_v53, %v4913_v54  ;;  %v10467_v53 = vsel %vm348_vm1, %v10413_v27, %v3402_v1  ;;  %v6694_v1 = vld [vmem:[%s8932_s27 + $0x130] sm:$0x3]  ;;  %v10482_v13 = vsel %vm348_vm1, %v3404_v57, %v10452_v22  ;;  %v10491_v27 = vld [vmem:[%s8932_s27 + $0x140] sm:$0xff] }
 0x136   : > { %8048 = vmatprep.mubr.msk.f32.mxu0 %vm431_vm2, %v10420_v42  ;;  %8248 = vmatprep.mubr.msk.f32.mxu1 %vm431_vm2, %v4909_v25  ;;  %v4918_v25 = vrot.slane %v10429_v62, 2  ;;  %11925 = vst [vmem:[#allocation20_spill] sm:$0xff] %v10467_v53  ;;  %v10475_v62 = vrot.slane %v10460_v17, 1  ;;  %11927 = vst [vmem:[#allocation26_spill] sm:$0xff] %v10482_v13  ;;  %v3412_v57 = vrot.slane %v6694_v1, 1  ;;  %v4925_v17 = vrot.slane %v6694_v1, 2 }
 0x137   : > { %11930 = vst [vmem:[#allocation35_spill] sm:$0xff] %v10491_v27  ;;  %v10514_v1 = vrot.slane %v10491_v27, 1 }
 0x138   : > { %11926 = vst [vmem:[#allocation22_spill] sm:$0xff] %v10475_v62  ;;  %v4919_v54 = vsel %vm1869_vm3, %v11928_v56, %v4918_v25  ;;  %v4921_v56 = vsel %vm1869_vm3, %v4918_v25, %v4920_v39  ;;  %v10506_v15 = vsel %vm348_vm1, %v3409_v48, %v10475_v62  ;;  %v10522_v39 = vld [vmem:[%s8932_s27 + $0x158] sm:$0xff]  ;;  %v10529_v48 = vsel %vm348_vm1, %v10475_v62, %v3412_v57  ;;  %v10550_v62 = vld [vmem:[%s8932_s27 + $0x168] sm:$0xff] }
 0x139   : > { %8049 = vmatmul.mubr.msk.f32.gmra.mrb[48].mxu0 %vm431_vm2, %v10436_v31  ;;  %8249 = vmatmul.mubr.msk.f32.gmra.mrb[48].mxu1 %vm431_vm2, %v4911_v0  ;;  %v10498_v0 = vsel %vm348_vm1, %v10452_v22, %v3407_v46  ;;  %11933 = vst [vmem:[#allocation48_spill] sm:$0xff] %v10514_v1  ;;  %11935 = vst [vmem:[#allocation3_spill] sm:$0xff] %v10522_v39  ;;  %v4926_v25 = vsel %vm1869_vm3, %v4923_v26, %v4925_v17  ;;  %v6700_v17 = vld [vmem:[%s8932_s27 + $0x160] sm:$0x3] }
 0x13a   : > { %8051 = vmatprep.mubr.msk.f32.mxu0 %vm431_vm2, %v10444_v14  ;;  %8251 = vmatprep.mubr.msk.f32.mxu1 %vm431_vm2, %v4914_v49  ;;  %v10488_v49 = vld [vmem:[%s8932_s27 + $0x138] sm:$0xff]  ;;  %11931 = vst [vmem:[#allocation40_spill] sm:$0xff] %v10498_v0  ;;  %v6697_v14 = vld [vmem:[%s8932_s27 + $0x148] sm:$0x3]  ;;  %11936 = vst [vmem:[#allocation6_spill] sm:$0xff] %v10529_v48 }
 0x13b   : > { %11929 = vst [vmem:[#allocation29_spill] sm:$0xff] %v10488_v49  ;;  %v3414_v46 = vrot.slane %v10488_v49, 1  ;;  %v4930_v22 = vrot.slane %v6697_v14, 2 }
 0x13d   : > { %8052 = vmatmul.mubr.msk.f32.gmra.mrb[50].mxu0 %vm431_vm2, %v10467_v53  ;;  %8252 = vmatmul.mubr.msk.f32.gmra.mrb[50].mxu1 %vm431_vm2, %v4916_v52  ;;  %v11932_v53 = vrot.slane %v10457_v24, 2  ;;  %v10537_v24 = vrot.slane %v10522_v39, 1  ;;  %v10543_v57 = vsel %vm348_vm1, %v3414_v46, %v10514_v1 }
 0x13e   : > { %8054 = vmatprep.mubr.msk.f32.mxu0 %vm431_vm2, %v10482_v13  ;;  %8254 = vmatprep.mubr.msk.f32.mxu1 %vm431_vm2, %v4919_v54  ;;  %v4928_v54 = vrot.slane %v10491_v27, 2  ;;  %v10519_v13 = vld [vmem:[%s8932_s27 + $0x150] sm:$0xff]  ;;  %11937 = vst [vmem:[#allocation7_spill] sm:$0xff] %v10543_v57 }
 0x13f   : > { %v4924_v52 = vsel %vm1869_vm3, %v11932_v53, %v4923_v26  ;;  %11934 = vst [vmem:[#allocation4_spill] sm:$0xff] %v10519_v13  ;;  %v3417_v53 = vrot.slane %v6697_v14, 1  ;;  %v3419_v27 = vrot.slane %v10519_v13, 1  ;;  %v11938_v14 = vrot.slane %v10488_v49, 2 }
 0x140   : > { %v4931_v46 = vsel %vm1869_vm3, %v4928_v54, %v4930_v22 }
 0x141   : > { %8055 = vmatmul.mubr.msk.f32.gmra.mrb[52].mxu0 %vm431_vm2, %v10498_v0  ;;  %8255 = vmatmul.mubr.msk.f32.gmra.mrb[52].mxu1 %vm431_vm2, %v4921_v56  ;;  %v4933_v0 = vrot.slane %v10522_v39, 2  ;;  %v4929_v26 = vsel %vm1869_vm3, %v11938_v14, %v4928_v54  ;;  %v10560_v56 = vsel %vm348_vm1, %v10514_v1, %v3417_v53  ;;  %v10568_v14 = vsel %vm348_vm1, %v3419_v27, %v10537_v24  ;;  %v6703_v1 = vld [vmem:[%s8932_s27 + $0x178] sm:$0x3] }
 0x142   : > { %8057 = vmatprep.mubr.msk.f32.mxu0 %vm431_vm2, %v10506_v15  ;;  %8257 = vmatprep.mubr.msk.f32.mxu1 %vm431_vm2, %v4924_v52  ;;  %v10553_v52 = vld [vmem:[%s8932_s27 + $0x170] sm:$0xff]  ;;  %11940 = vst [vmem:[#allocation9_spill] sm:$0xff] %v10560_v56  ;;  %v11941_v39 = vrot.slane %v10519_v13, 2  ;;  %v3424_v53 = vrot.slane %v10550_v62, 1  ;;  %v4940_v54 = vrot.slane %v6703_v1, 2  ;;  %v11942_v13 = vrot.slane %v10550_v62, 2 }
 0x143   : > { %11939 = vst [vmem:[#allocation11_spill] sm:$0xff] %v10553_v52  ;;  %v10575_v22 = vrot.slane %v10553_v52, 1 }
 0x144   : > { %v4934_v49 = vsel %vm1869_vm3, %v11941_v39, %v4933_v0 }
 0x145   : > { %8058 = vmatmul.mubr.msk.f32.gmra.mrb[54].mxu0 %vm431_vm2, %v10529_v48  ;;  %8258 = vmatmul.mubr.msk.f32.gmra.mrb[54].mxu1 %vm431_vm2, %v4926_v25  ;;  %v3422_v25 = vrot.slane %v6700_v17, 1  ;;  %v4935_v48 = vrot.slane %v6700_v17, 2  ;;  %v3427_v17 = vrot.slane %v6703_v1, 1 }
 0x146   : > { %8060 = vmatprep.mubr.msk.f32.mxu0 %vm431_vm2, %v10543_v57  ;;  %8260 = vmatprep.mubr.msk.f32.mxu1 %vm431_vm2, %v4929_v26  ;;  %v4938_v26 = vrot.slane %v10553_v52, 2  ;;  %v10593_v52 = vsel %vm348_vm1, %v3424_v53, %v10575_v22  ;;  %v10757_v53 = vld [vmem:[%s8932_s27 + $0x188] sm:$0xff] }
 0x147   : > { %v10588_v27 = vsel %vm348_vm1, %v10537_v24, %v3422_v25  ;;  %v4936_v39 = vsel %vm1869_vm3, %v4933_v0, %v4935_v48  ;;  %v10607_v0 = vsel %vm348_vm1, %v10575_v22, %v3427_v17  ;;  %v10772_v17 = vld [vmem:[%s8932_s27 + $0x198] sm:$0xff] }
 0x149   : > { %8061 = vmatmul.mubr.msk.f32.gmra.mrb[56].mxu0 %vm431_vm2, %v10560_v56  ;;  %8261 = vmatmul.mubr.msk.f32.gmra.mrb[56].mxu1 %vm431_vm2, %v4931_v46  ;;  %v4939_v46 = vsel %vm1869_vm3, %v11942_v13, %v4938_v26  ;;  %v6706_v56 = vld [vmem:[%s8932_s27 + $0x190] sm:$0x3] }
 0x14a   : > { %8063 = vmatprep.mubr.msk.f32.mxu0 %vm431_vm2, %v10568_v14  ;;  %8263 = vmatprep.mubr.msk.f32.mxu1 %vm431_vm2, %v4934_v49  ;;  %v4941_v49 = vsel %vm1869_vm3, %v4938_v26, %v4940_v54  ;;  %v3432_v1 = vrot.slane %v6706_v56, 1  ;;  %v4945_v48 = vrot.slane %v6706_v56, 2  ;;  %v11957_v54 = vld [vmem:[#allocation3_spill] sm:$0xff]  ;;  %v10764_v26 = vld [vmem:[%s8932_s27 + $0x190] sm:$0x3] }
 0x14c   : > { %v10619_v13 = vsel %vm348_vm1, %v9911_v50, %v3432_v1  ;;  %v4946_v25 = vsel %vm1869_vm3, %v10107_v47, %v4945_v48  ;;  %v10637_v50 = vld [vmem:[%s11664_s1 + $0x2c] sm:$0xf]  ;;  %v10642_v47 = vld [vmem:[%s11664_s1 + $0x3c] sm:$0xf]  ;;  %v5806_v1 = vrot.slane %v10772_v17, 2  ;;  %v10783_v48 = vld [vmem:[%s8932_s27 + $0x1a0] sm:$0xff] }
 0x14d   : > { %8064 = vmatmul.mubr.msk.f32.gmra.mrb[58].mxu0 %vm431_vm2, %v10588_v27  ;;  %8264 = vmatmul.mubr.msk.f32.gmra.mrb[58].mxu1 %vm431_vm2, %v4936_v39  ;;  %v5802_v39 = vrot.slane %v10757_v53, 2 }
 0x14e   : > { %8066 = vmatprep.mubr.msk.f32.mxu0 %vm431_vm2, %v10593_v52  ;;  %8266 = vmatprep.mubr.msk.f32.mxu1 %vm431_vm2, %v4939_v46  ;;  %v5804_v46 = vrot.slane %v10764_v26, 2 }
 0x151   : > { %8067 = vmatmul.mubr.msk.f32.gmra.mrb[60].mxu0 %vm431_vm2, %v10607_v0  ;;  %8267 = vmatmul.mubr.msk.f32.gmra.mrb[60].mxu1 %vm431_vm2, %v4941_v49  ;;  %v10776_v49 = vld [vmem:[%s8932_s27 + $0x40] sm:$0x3] }
 0x152   : > { %8069 = vmatprep.mubr.msk.f32.mxu0 %vm431_vm2, %v9931_v30  ;;  %8269 = vmatprep.mubr.msk.f32.mxu1 %vm431_vm2, %v10126_v28  ;;  %v11945_v28 = vld [vmem:[#allocation20_spill] sm:$0xff] }
 0x155   : > { %8070 = vmatmul.mubr.msk.f32.gmra.mrb[62].mxu0 %vm431_vm2, %v10619_v13  ;;  %8270 = vmatmul.mubr.msk.f32.gmra.mrb[62].mxu1 %vm431_vm2, %v4946_v25  ;;  %v10786_v25 = vsel %vm1869_vm3, %v5802_v39, %v5804_v46  ;;  %v10803_v46 = vld [vmem:[%s8932_s27 + $0x58] sm:$0x3] }
 0x156   : > { %8074 = vmatprep.mubr.msk.f32.mxu0 %vm431_vm2, %v10110_v37  ;;  %8274 = vmatprep.mubr.msk.f32.mxu1 %vm431_vm2, %v10151_v9  ;;  %v11943_v37 = vld [vmem:[#allocation8_spill] sm:$0xff]  ;;  %v11946_v9 = vld [vmem:[#allocation2_spill] sm:$0xff]  ;;  %11959 = vst [vmem:[#allocation12_spill] sm:$0xff] %v10786_v25 }
 0x159   : > { %8075 = vmatmul.mubr.msk.f32.vlgmr.msra.gmra.mrb[32].mxu0 %vm431_vm2, %v10113_v11  ;;  %8275 = vmatmul.mubr.msk.f32.vlgmr.msra.gmra.mrb[32].mxu1 %vm431_vm2, %v10173_v55  ;;  %v11944_v11 = vld [vmem:[#allocation54_spill] sm:$0xff] }
 0x15a   : > { %8123 = vmatpush3.msk.msra.mxu0 %vm496_vm0, %v10207_v4  ;;  %8323 = vmatpush3.msk.msra.mxu1 %vm496_vm0, %v10212_v12  ;;  %v11947_v55 = vld [vmem:[#allocation26_spill] sm:$0xff]  ;;  %v11949_v4 = vld [vmem:[#allocation40_spill] sm:$0xff] }
 0x15b   : > { %8077 = vmatprep.mubr.msk.f32.mxu0 %vm431_vm2, %v10138_v51  ;;  %8277 = vmatprep.mubr.msk.f32.mxu1 %vm431_vm2, %v10191_v61  ;;  %v11950_v12 = vld [vmem:[#allocation14_spill] sm:$0xff] }
 0x15c   : > { %8172 = vmatprep.subr.msk.mxu0 %vm496_vm0, %v10637_v50  ;;  %8372 = vmatprep.subr.msk.mxu1 %vm496_vm0, %v10642_v47 }
 0x15d   : > { %8078 = vmatmul.mubr.msk.f32.gmra.mrb[34].mxu0 %vm431_vm2, %v10141_v16  ;;  %8278 = vmatmul.mubr.msk.f32.gmra.mrb[34].mxu1 %vm431_vm2, %v10201_v2  ;;  %v11948_v2 = vld [vmem:[#allocation5_spill] sm:$0xff] }
 0x15e   : > { %8080 = vmatprep.mubr.msk.f32.mxu0 %vm431_vm2, %v10161_v38  ;;  %8280 = vmatprep.mubr.msk.f32.mxu1 %vm431_vm2, %v10230_v32 }
 0x161   : > { %8081 = vmatmul.mubr.msk.f32.gmra.mrb[36].mxu0 %vm431_vm2, %v10164_v29  ;;  %8281 = vmatmul.mubr.msk.f32.gmra.mrb[36].mxu1 %vm431_vm2, %v10250_v23  ;;  %v11951_v23 = vld [vmem:[#allocation16_spill] sm:$0xff] }
 0x162   : > { %8083 = vmatprep.mubr.msk.f32.mxu0 %vm431_vm2, %v10184_v8  ;;  %8283 = vmatprep.mubr.msk.f32.mxu1 %vm431_vm2, %v10258_v35 }
 0x165   : > { %8084 = vmatmul.mubr.msk.f32.gmra.mrb[38].mxu0 %vm431_vm2, %v10187_v41  ;;  %8284 = vmatmul.mubr.msk.f32.gmra.mrb[38].mxu1 %vm431_vm2, %v10281_v5  ;;  %v11952_v5 = vld [vmem:[#allocation6_spill] sm:$0xff] }
 0x166   : > { %8086 = vmatprep.mubr.msk.f32.mxu0 %vm431_vm2, %v10236_v20  ;;  %8286 = vmatprep.mubr.msk.f32.mxu1 %vm431_vm2, %v10296_v10 }
 0x169   : > { %8087 = vmatmul.mubr.msk.f32.gmra.mrb[40].mxu0 %vm431_vm2, %v10239_v60  ;;  %8287 = vmatmul.mubr.msk.f32.gmra.mrb[40].mxu1 %vm431_vm2, %v10312_v63  ;;  %v11953_v63 = vld [vmem:[#allocation29_spill] sm:$0xff] }
 0x16a   : > { %8089 = vmatprep.mubr.msk.f32.mxu0 %vm431_vm2, %v10271_v7  ;;  %8289 = vmatprep.mubr.msk.f32.mxu1 %vm431_vm2, %v10320_v45 }
 0x16d   : > { %8090 = vmatmul.mubr.msk.f32.gmra.mrb[42].mxu0 %vm431_vm2, %v10274_v34  ;;  %8290 = vmatmul.mubr.msk.f32.gmra.mrb[42].mxu1 %vm431_vm2, %v10343_v18  ;;  %v11954_v18 = vld [vmem:[#allocation35_spill] sm:$0xff] }
 0x16e   : > { %8092 = vmatprep.mubr.msk.f32.mxu0 %vm431_vm2, %v10302_v19  ;;  %8292 = vmatprep.mubr.msk.f32.mxu1 %vm431_vm2, %v10358_v21 }
 0x171   : > { %8093 = vmatmul.mubr.msk.f32.gmra.mrb[44].mxu0 %vm431_vm2, %v10305_v36  ;;  %8293 = vmatmul.mubr.msk.f32.gmra.mrb[44].mxu1 %vm431_vm2, %v10374_v33  ;;  %v11955_v33 = vld [vmem:[#allocation9_spill] sm:$0xff] }
 0x172   : > { %8095 = vmatprep.mubr.msk.f32.mxu0 %vm431_vm2, %v10333_v43  ;;  %8295 = vmatprep.mubr.msk.f32.mxu1 %vm431_vm2, %v10382_v3 }
 0x175   : > { %8096 = vmatmul.mubr.msk.f32.gmra.mrb[46].mxu0 %vm431_vm2, %v10336_v44  ;;  %8296 = vmatmul.mubr.msk.f32.gmra.mrb[46].mxu1 %vm431_vm2, %v10405_v58  ;;  %v11956_v58 = vld [vmem:[#allocation4_spill] sm:$0xff] }
 0x176   : > { %8098 = vmatprep.mubr.msk.f32.mxu0 %vm431_vm2, %v10364_v6  ;;  %8298 = vmatprep.mubr.msk.f32.mxu1 %vm431_vm2, %v10420_v42 }
 0x179   : > { %8099 = vmatmul.mubr.msk.f32.gmra.mrb[48].mxu0 %vm431_vm2, %v10367_v59  ;;  %8299 = vmatmul.mubr.msk.f32.gmra.mrb[48].mxu1 %vm431_vm2, %v10436_v31  ;;  %v10753_v31 = vld [vmem:[%s8932_s27 + $0x180] sm:$0xff] }
 0x17a   : > { %8101 = vmatprep.mubr.msk.f32.mxu0 %vm431_vm2, %v10395_v40  ;;  %8301 = vmatprep.mubr.msk.f32.mxu1 %vm431_vm2, %v11943_v37  ;;  %v5801_v56 = vrot.slane %v10753_v31, 2 }
 0x17d   : > { %8102 = vmatmul.mubr.msk.f32.gmra.mrb[50].mxu0 %vm431_vm2, %v11944_v11  ;;  %8302 = vmatmul.mubr.msk.f32.gmra.mrb[50].mxu1 %vm431_vm2, %v11945_v28  ;;  %v11960_v28 = vld [vmem:[#allocation11_spill] sm:$0xff] }
 0x17e   : > { %8104 = vmatprep.mubr.msk.f32.mxu0 %vm431_vm2, %v11946_v9  ;;  %8304 = vmatprep.mubr.msk.f32.mxu1 %vm431_vm2, %v11947_v55 }
 0x181   : > { %8105 = vmatmul.mubr.msk.f32.gmra.mrb[52].mxu0 %vm431_vm2, %v11948_v2  ;;  %8305 = vmatmul.mubr.msk.f32.gmra.mrb[52].mxu1 %vm431_vm2, %v11949_v4  ;;  %v10793_v4 = vld [vmem:[%s8932_s27 + $0x1a8] sm:$0x3] }
 0x182   : > { %8107 = vmatprep.mubr.msk.f32.mxu0 %vm431_vm2, %v11950_v12  ;;  %8307 = vmatprep.mubr.msk.f32.mxu1 %vm431_vm2, %v10506_v15 }
 0x185   : > { %8108 = vmatmul.mubr.msk.f32.gmra.mrb[54].mxu0 %vm431_vm2, %v11951_v23  ;;  %8308 = vmatmul.mubr.msk.f32.gmra.mrb[54].mxu1 %vm431_vm2, %v11952_v5  ;;  %v5807_v5 = vrot.slane %v10783_v48, 2 }
 0x186   : > { %8110 = vmatprep.mubr.msk.f32.mxu0 %vm431_vm2, %v11953_v63  ;;  %8310 = vmatprep.mubr.msk.f32.mxu1 %vm431_vm2, %v10543_v57 }
 0x187   : > { %v10806_v25 = vsel %vm1869_vm3, %v5806_v1, %v5807_v5 }
 0x188   : > { %11962 = vst [vmem:[#allocation17_spill] sm:$0xff] %v10806_v25 }
 0x189   : > { %8111 = vmatmul.mubr.msk.f32.gmra.mrb[56].mxu0 %vm431_vm2, %v11954_v18  ;;  %8311 = vmatmul.mubr.msk.f32.gmra.mrb[56].mxu1 %vm431_vm2, %v11955_v33  ;;  %v11961_v33 = vld [vmem:[#allocation28_spill] sm:$0xff] }
 0x18a   : > { %8113 = vmatprep.mubr.msk.f32.mxu0 %vm431_vm2, %v11956_v58  ;;  %8313 = vmatprep.mubr.msk.f32.mxu1 %vm431_vm2, %v10568_v14 }
 0x18d   : > { %8114 = vmatmul.mubr.msk.f32.gmra.mrb[58].mxu0 %vm431_vm2, %v11957_v54  ;;  %8314 = vmatmul.mubr.msk.f32.gmra.mrb[58].mxu1 %vm431_vm2, %v10588_v27  ;;  %v10780_v27 = vsel %vm1869_vm3, %v5801_v56, %v5802_v39  ;;  %v4397_v56 = vrot.slane %v10776_v49, 1  ;;  %v5809_v39 = vrot.slane %v10793_v4, 2 }
 0x18e   : > { %8116 = vmatprep.mubr.msk.f32.mxu0 %vm431_vm2, %v10550_v62  ;;  %8316 = vmatprep.mubr.msk.f32.mxu1 %vm431_vm2, %v10593_v52  ;;  %11958 = vst [vmem:[#allocation13_spill] sm:$0xff] %v10780_v27  ;;  %v11964_v27 = vld [vmem:[#allocation39_spill] sm:$0xff] }
 0x191   : > { %8117 = vmatmul.mubr.msk.f32.gmra.mrb[60].mxu0 %vm431_vm2, %v11960_v28  ;;  %8317 = vmatmul.mubr.msk.f32.gmra.mrb[60].mxu1 %vm431_vm2, %v10607_v0  ;;  %v10809_v0 = vsel %vm1869_vm3, %v5807_v5, %v5809_v39  ;;  %v4402_v5 = vrot.slane %v10803_v46, 1 }
 0x192   : > { %8119 = vmatprep.mubr.msk.f32.mxu0 %vm431_vm2, %v11961_v33  ;;  %8319 = vmatprep.mubr.msk.f32.mxu1 %vm431_vm2, %v9931_v30  ;;  %11963 = vst [vmem:[#allocation15_spill] sm:$0xff] %v10809_v0  ;;  %v11965_v30 = vld [vmem:[#allocation32_spill] sm:$0xff]  ;;  %v10915_v0 = vld [vmem:[%s8932_s27 + $0xe8] sm:$0x3] }
 0x193   : > { %v10821_v1 = vsel %vm348_vm1, %v11965_v30, %v4397_v56  ;;  %v10825_v33 = vld [vmem:[%s8932_s27 + $0x70] sm:$0x3]  ;;  %v10861_v30 = vld [vmem:[%s8932_s27 + $0xa0] sm:$0x3]  ;;  %11974 = vst [vmem:[#allocation21_spill] sm:$0xff] %v10915_v0 }
 0x194   : > { %v4407_v56 = vrot.slane %v10825_v33, 1 }
 0x195   : > { %8120 = vmatmul.mubr.msk.f32.gmra.mrb[62].mxu0 %vm431_vm2, %v11964_v27  ;;  %8320 = vmatmul.mubr.msk.f32.gmra.mrb[62].mxu1 %vm431_vm2, %v10619_v13  ;;  %v11966_v13 = vld [vmem:[#allocation41_spill] sm:$0xff] }
 0x196   : > { %8124 = vmatprep.mubr.msk.f32.mxu0 %vm431_vm2, %v10138_v51  ;;  %8324 = vmatprep.mubr.msk.f32.mxu1 %vm431_vm2, %v10191_v61  ;;  %v10837_v27 = vsel %vm348_vm1, %v11966_v13, %v4402_v5  ;;  %v4417_v13 = vrot.slane %v10861_v30, 1 }
 0x199   : > { %8125 = vmatmul.mubr.msk.f32.vlgmr.msra.gmra.mrb[32].mxu0 %vm431_vm2, %v10141_v16  ;;  %8325 = vmatmul.mubr.msk.f32.vlgmr.msra.gmra.mrb[32].mxu1 %vm431_vm2, %v10821_v1  ;;  %v10845_v16 = vld [vmem:[%s8932_s27 + $0x88] sm:$0x3] }
 0x19a   : > { %8173 = vmatpush3.msk.msra.mxu0 %vm496_vm0, %v10637_v50  ;;  %8373 = vmatpush3.msk.msra.mxu1 %vm496_vm0, %v10642_v47  ;;  %v11967_v50 = vld [vmem:[#allocation33_spill] sm:$0xff]  ;;  %v4412_v39 = vrot.slane %v10845_v16, 1 }
 0x19b   : > { %8127 = vmatprep.mubr.msk.f32.mxu0 %vm431_vm2, %v10161_v38  ;;  %8327 = vmatprep.mubr.msk.f32.mxu1 %vm431_vm2, %v10230_v32  ;;  %v10857_v47 = vsel %vm348_vm1, %v11967_v50, %v4407_v56  ;;  %v10877_v56 = vld [vmem:[%s8932_s27 + $0xb8] sm:$0x3] }
 0x19c   : > { %11969 = vst [vmem:[#allocation19_spill] sm:$0xff] %v10877_v56 }
 0x19d   : > { %8128 = vmatmul.mubr.msk.f32.gmra.mrb[34].mxu0 %vm431_vm2, %v10164_v29  ;;  %8328 = vmatmul.mubr.msk.f32.gmra.mrb[34].mxu1 %vm431_vm2, %v10837_v27  ;;  %v11968_v29 = vld [vmem:[#allocation46_spill] sm:$0xff] }
 0x19e   : > { %8130 = vmatprep.mubr.msk.f32.mxu0 %vm431_vm2, %v10184_v8  ;;  %8330 = vmatprep.mubr.msk.f32.mxu1 %vm431_vm2, %v10258_v35  ;;  %v10873_v5 = vsel %vm348_vm1, %v11968_v29, %v4412_v39  ;;  %v4422_v39 = vrot.slane %v10877_v56, 1  ;;  %v10893_v29 = vld [vmem:[%s8932_s27 + $0xd0] sm:$0x3] }
 0x19f   : > { %11972 = vst [vmem:[#allocation23_spill] sm:$0xff] %v10893_v29 }
 0x1a1   : > { %8131 = vmatmul.mubr.msk.f32.gmra.mrb[36].mxu0 %vm431_vm2, %v10187_v41  ;;  %8331 = vmatmul.mubr.msk.f32.gmra.mrb[36].mxu1 %vm431_vm2, %v10857_v47  ;;  %v11970_v41 = vld [vmem:[#allocation37_spill] sm:$0xff] }
 0x1a2   : > { %8133 = vmatprep.mubr.msk.f32.mxu0 %vm431_vm2, %v10236_v20  ;;  %8333 = vmatprep.mubr.msk.f32.mxu1 %vm431_vm2, %v10296_v10  ;;  %v10889_v50 = vsel %vm348_vm1, %v11970_v41, %v4417_v13  ;;  %v11973_v13 = vld [vmem:[#allocation44_spill] sm:$0xff] }
 0x1a3   : > { %11971 = vst [vmem:[#allocation18_spill] sm:$0xff] %v10889_v50  ;;  %v10911_v41 = vsel %vm348_vm1, %v11973_v13, %v4422_v39 }
 0x1a5   : > { %8134 = vmatmul.mubr.msk.f32.gmra.mrb[38].mxu0 %vm431_vm2, %v10239_v60  ;;  %8334 = vmatmul.mubr.msk.f32.gmra.mrb[38].mxu1 %vm431_vm2, %v10873_v5  ;;  %v10903_v60 = vld [vmem:[%s11665_s2] ss:$0 sm:$0xff] }
 0x1a6   : > { %8136 = vmatprep.mubr.msk.f32.mxu0 %vm431_vm2, %v10271_v7  ;;  %8336 = vmatprep.mubr.msk.f32.mxu1 %vm431_vm2, %v10320_v45  ;;  %v4432_v45 = vrot.slane %v10915_v0, 1 }
 0x1a9   : > { %8137 = vmatmul.mubr.msk.f32.gmra.mrb[40].mxu0 %vm431_vm2, %v10274_v34  ;;  %8337 = vmatmul.mubr.msk.f32.gmra.mrb[40].mxu1 %vm431_vm2, %v10889_v50  ;;  %v4427_v34 = vrot.slane %v10893_v29, 1 }
 0x1aa   : > { %8139 = vmatprep.mubr.msk.f32.mxu0 %vm431_vm2, %v10302_v19  ;;  %8339 = vmatprep.mubr.msk.f32.mxu1 %vm431_vm2, %v10358_v21 }
 0x1ac   : > { %v7776_v25 = vpop.f32.mrb[0].mxu0  ;;  %v7976_v50 = vpop.f32.mrb[0].mxu1 }
 0x1ad   : > { %v1804_v21 = vadd.f32 %v7776_v25, %v10903_v60  ;;  %v3141_v39 = vadd.f32 %v7976_v50, %v10903_v60  ;;  %v1606_v13 = vpop.f32.mrb[1].mxu0  ;;  %v2949_v29 = vpop.f32.mrb[1].mxu1  ;;  %8140 = vmatmul.mubr.msk.f32.gmra.mrb[42].mxu0 %vm431_vm2, %v10305_v36  ;;  %8340 = vmatmul.mubr.msk.f32.gmra.mrb[42].mxu1 %vm431_vm2, %v10911_v41  ;;  %v11975_v25 = vld [vmem:[#allocation45_spill] sm:$0xff]  ;;  %v10944_v36 = vld [vmem:[%s8932_s27 + $0x100] sm:$0x3] }
 0x1ae   : > { %v1803_v19 = vadd.f32 %v10903_v60, %v1606_v13  ;;  %v3140_v56 = vadd.f32 %v10903_v60, %v2949_v29  ;;  %8142 = vmatprep.mubr.msk.f32.mxu0 %vm431_vm2, %v10333_v43  ;;  %8342 = vmatprep.mubr.msk.f32.mxu1 %vm431_vm2, %v10382_v3  ;;  %v10936_v50 = vsel %vm348_vm1, %v11975_v25, %v4427_v34 }
 0x1af   : > { %1836 = vst.msk [vmem:[%s10920_s7 + $0x8] sm:$0xff] %vm431_vm2, %v1804_v21  ;;  %6628 = vst.msk [vmem:[%s10920_s7 + $0x18] sm:$0xff] %vm431_vm2, %v3141_v39  ;;  %v11977_v39 = vld [vmem:[#allocation51_spill] sm:$0xff] }
 0x1b0   : > { %11976 = vst [vmem:[#allocation25_spill] sm:$0xff] %v10944_v36  ;;  %1835 = vst.msk [vmem:[%s10920_s7] sm:$0xff] %vm431_vm2, %v1803_v19  ;;  %v7779_v29 = vpop.f32.mrb[2].mxu0  ;;  %v7979_v13 = vpop.f32.mrb[2].mxu1 }
 0x1b1   : > { %6627 = vst.msk [vmem:[%s10920_s7 + $0x10] sm:$0xff] %vm431_vm2, %v3140_v56  ;;  %v1806_v34 = vadd.f32 %v7779_v29, %v10903_v60  ;;  %v3143_v25 = vadd.f32 %v7979_v13, %v10903_v60  ;;  %v1616_v21 = vpop.f32.mrb[3].mxu0  ;;  %v2959_v0 = vpop.f32.mrb[3].mxu1  ;;  %8143 = vmatmul.mubr.msk.f32.gmra.mrb[44].mxu0 %vm431_vm2, %v10336_v44  ;;  %8343 = vmatmul.mubr.msk.f32.gmra.mrb[44].mxu1 %vm431_vm2, %v10936_v50  ;;  %v4437_v13 = vrot.slane %v10944_v36, 1  ;;  %v10972_v44 = vld [vmem:[%s8932_s27 + $0x118] sm:$0x3] }
 0x1b2   : > { %v1805_v19 = vadd.f32 %v10903_v60, %v1616_v21  ;;  %v3142_v56 = vadd.f32 %v10903_v60, %v2959_v0  ;;  %8145 = vmatprep.mubr.msk.f32.mxu0 %vm431_vm2, %v10364_v6  ;;  %8345 = vmatprep.mubr.msk.f32.mxu1 %vm431_vm2, %v10420_v42  ;;  %v10964_v29 = vsel %vm348_vm1, %v11977_v39, %v4432_v45 }
 0x1b3   : > { %1838 = vst.msk [vmem:[%s10920_s7 + $0x48] sm:$0xff] %vm431_vm2, %v1806_v34  ;;  %6630 = vst.msk [vmem:[%s10920_s7 + $0x58] sm:$0xff] %vm431_vm2, %v3143_v25 }
 0x1b4   : > { %11978 = vst [vmem:[#allocation24_spill] sm:$0xff] %v10972_v44  ;;  %1837 = vst.msk [vmem:[%s10920_s7 + $0x40] sm:$0xff] %vm431_vm2, %v1805_v19  ;;  %v7782_v0 = vpop.f32.mrb[4].mxu0  ;;  %v7982_v21 = vpop.f32.mrb[4].mxu1 }
 0x1b5   : > { %6629 = vst.msk [vmem:[%s10920_s7 + $0x50] sm:$0xff] %vm431_vm2, %v3142_v56  ;;  %v1808_v45 = vadd.f32 %v7782_v0, %v10903_v60  ;;  %v3145_v39 = vadd.f32 %v7982_v21, %v10903_v60  ;;  %v1626_v34 = vpop.f32.mrb[5].mxu0  ;;  %v2969_v36 = vpop.f32.mrb[5].mxu1  ;;  %8146 = vmatmul.mubr.msk.f32.gmra.mrb[46].mxu0 %vm431_vm2, %v10367_v59  ;;  %8346 = vmatmul.mubr.msk.f32.gmra.mrb[46].mxu1 %vm431_vm2, %v10964_v29  ;;  %v11979_v56 = vld [vmem:[#allocation55_spill] sm:$0xff]  ;;  %v4442_v21 = vrot.slane %v10972_v44, 1 }
 0x1b6   : > { %v1807_v25 = vadd.f32 %v10903_v60, %v1626_v34  ;;  %v3144_v19 = vadd.f32 %v10903_v60, %v2969_v36  ;;  %8148 = vmatprep.mubr.msk.f32.mxu0 %vm431_vm2, %v10395_v40  ;;  %8348 = vmatprep.mubr.msk.f32.mxu1 %vm431_vm2, %v11943_v37  ;;  %v10992_v0 = vsel %vm348_vm1, %v11979_v56, %v4437_v13  ;;  %v11000_v59 = vld [vmem:[%s8932_s27 + $0x130] sm:$0x3] }
 0x1b7   : > { %1840 = vst.msk [vmem:[%s10920_s7 + $0x88] sm:$0xff] %vm431_vm2, %v1808_v45  ;;  %6632 = vst.msk [vmem:[%s10920_s7 + $0x98] sm:$0xff] %vm431_vm2, %v3145_v39 }
 0x1b8   : > { %11980 = vst [vmem:[#allocation30_spill] sm:$0xff] %v11000_v59  ;;  %1839 = vst.msk [vmem:[%s10920_s7 + $0x80] sm:$0xff] %vm431_vm2, %v1807_v25  ;;  %v7785_v36 = vpop.f32.mrb[6].mxu0  ;;  %v7985_v34 = vpop.f32.mrb[6].mxu1 }
 0x1b9   : > { %6631 = vst.msk [vmem:[%s10920_s7 + $0x90] sm:$0xff] %vm431_vm2, %v3144_v19  ;;  %v1810_v13 = vadd.f32 %v7785_v36, %v10903_v60  ;;  %v3147_v56 = vadd.f32 %v7985_v34, %v10903_v60  ;;  %v1636_v45 = vpop.f32.mrb[7].mxu0  ;;  %v2979_v44 = vpop.f32.mrb[7].mxu1  ;;  %8149 = vmatmul.mubr.msk.f32.gmra.mrb[48].mxu0 %vm431_vm2, %v11944_v11  ;;  %8349 = vmatmul.mubr.msk.f32.gmra.mrb[48].mxu1 %vm431_vm2, %v10992_v0  ;;  %v11981_v19 = vld [vmem:[#allocation10_spill] sm:$0xff]  ;;  %v4447_v34 = vrot.slane %v11000_v59, 1 }
 0x1ba   : > { %v1809_v39 = vadd.f32 %v10903_v60, %v1636_v45  ;;  %v3146_v25 = vadd.f32 %v10903_v60, %v2979_v44  ;;  %8151 = vmatprep.mubr.msk.f32.mxu0 %vm431_vm2, %v11946_v9  ;;  %8351 = vmatprep.mubr.msk.f32.mxu1 %vm431_vm2, %v11947_v55  ;;  %v11020_v36 = vsel %vm348_vm1, %v11981_v19, %v4442_v21  ;;  %v11028_v11 = vld [vmem:[%s8932_s27 + $0x148] sm:$0x3] }
 0x1bb   : > { %1842 = vst.msk [vmem:[%s10920_s7 + $0xc8] sm:$0xff] %vm431_vm2, %v1810_v13  ;;  %6634 = vst.msk [vmem:[%s10920_s7 + $0xd8] sm:$0xff] %vm431_vm2, %v3147_v56 }
 0x1bc   : > { %11982 = vst [vmem:[#allocation27_spill] sm:$0xff] %v11028_v11  ;;  %1841 = vst.msk [vmem:[%s10920_s7 + $0xc0] sm:$0xff] %vm431_vm2, %v1809_v39  ;;  %v7788_v44 = vpop.f32.mrb[8].mxu0  ;;  %v7988_v45 = vpop.f32.mrb[8].mxu1 }
 0x1bd   : > { %6633 = vst.msk [vmem:[%s10920_s7 + $0xd0] sm:$0xff] %vm431_vm2, %v3146_v25  ;;  %v1812_v21 = vadd.f32 %v7788_v44, %v10903_v60  ;;  %v3149_v19 = vadd.f32 %v7988_v45, %v10903_v60  ;;  %v1646_v13 = vpop.f32.mrb[9].mxu0  ;;  %v2989_v59 = vpop.f32.mrb[9].mxu1  ;;  %8152 = vmatmul.mubr.msk.f32.gmra.mrb[50].mxu0 %vm431_vm2, %v11948_v2  ;;  %8352 = vmatmul.mubr.msk.f32.gmra.mrb[50].mxu1 %vm431_vm2, %v11020_v36  ;;  %v11983_v25 = vld [vmem:[#allocation22_spill] sm:$0xff]  ;;  %v4452_v45 = vrot.slane %v11028_v11, 1 }
 0x1be   : > { %v1811_v56 = vadd.f32 %v10903_v60, %v1646_v13  ;;  %v3148_v39 = vadd.f32 %v10903_v60, %v2989_v59  ;;  %8154 = vmatprep.mubr.msk.f32.mxu0 %vm431_vm2, %v11950_v12  ;;  %8354 = vmatprep.mubr.msk.f32.mxu1 %vm431_vm2, %v10506_v15  ;;  %v11048_v44 = vsel %vm348_vm1, %v11983_v25, %v4447_v34  ;;  %v11056_v2 = vld [vmem:[%s8932_s27 + $0x160] sm:$0x3] }
 0x1bf   : > { %1844 = vst.msk [vmem:[%s10920_s7 + $0x108] sm:$0xff] %vm431_vm2, %v1812_v21  ;;  %6636 = vst.msk [vmem:[%s10920_s7 + $0x118] sm:$0xff] %vm431_vm2, %v3149_v19 }
 0x1c0   : > { %1843 = vst.msk [vmem:[%s10920_s7 + $0x100] sm:$0xff] %vm431_vm2, %v1811_v56  ;;  %6635 = vst.msk [vmem:[%s10920_s7 + $0x110] sm:$0xff] %vm431_vm2, %v3148_v39  ;;  %v7791_v59 = vpop.f32.mrb[10].mxu0  ;;  %v7991_v13 = vpop.f32.mrb[10].mxu1  ;;  %v11984_v39 = vld [vmem:[#allocation48_spill] sm:$0xff] }
 0x1c1   : > { %v1814_v34 = vadd.f32 %v7791_v59, %v10903_v60  ;;  %v3151_v25 = vadd.f32 %v7991_v13, %v10903_v60  ;;  %v1656_v21 = vpop.f32.mrb[11].mxu0  ;;  %v2999_v11 = vpop.f32.mrb[11].mxu1  ;;  %8155 = vmatmul.mubr.msk.f32.gmra.mrb[52].mxu0 %vm431_vm2, %v11951_v23  ;;  %8355 = vmatmul.mubr.msk.f32.gmra.mrb[52].mxu1 %vm431_vm2, %v11048_v44  ;;  %v11076_v59 = vsel %vm348_vm1, %v11984_v39, %v4452_v45  ;;  %v4457_v13 = vrot.slane %v11056_v2, 1  ;;  %v11084_v23 = vld [vmem:[%s8932_s27 + $0x178] sm:$0x3] }
 0x1c2   : > { %v1813_v19 = vadd.f32 %v10903_v60, %v1656_v21  ;;  %v3150_v56 = vadd.f32 %v10903_v60, %v2999_v11  ;;  %8157 = vmatprep.mubr.msk.f32.mxu0 %vm431_vm2, %v11953_v63  ;;  %8357 = vmatprep.mubr.msk.f32.mxu1 %vm431_vm2, %v10543_v57 }
 0x1c3   : > { %1846 = vst.msk [vmem:[%s10920_s7 + $0x148] sm:$0xff] %vm431_vm2, %v1814_v34  ;;  %6638 = vst.msk [vmem:[%s10920_s7 + $0x158] sm:$0xff] %vm431_vm2, %v3151_v25 }
 0x1c4   : > { %1845 = vst.msk [vmem:[%s10920_s7 + $0x140] sm:$0xff] %vm431_vm2, %v1813_v19  ;;  %6637 = vst.msk [vmem:[%s10920_s7 + $0x150] sm:$0xff] %vm431_vm2, %v3150_v56  ;;  %v7794_v11 = vpop.f32.mrb[12].mxu0  ;;  %v7994_v21 = vpop.f32.mrb[12].mxu1  ;;  %v11104_v56 = vsel %vm348_vm1, %v10537_v24, %v4457_v13 }
 0x1c5   : > { %v1816_v57 = vadd.f32 %v7794_v11, %v10903_v60  ;;  %v3153_v45 = vadd.f32 %v7994_v21, %v10903_v60  ;;  %v1666_v39 = vpop.f32.mrb[13].mxu0  ;;  %v3009_v34 = vpop.f32.mrb[13].mxu1  ;;  %8158 = vmatmul.mubr.msk.f32.gmra.mrb[54].mxu0 %vm431_vm2, %v11954_v18  ;;  %8358 = vmatmul.mubr.msk.f32.gmra.mrb[54].mxu1 %vm431_vm2, %v11076_v59  ;;  %v4462_v11 = vrot.slane %v11084_v23, 1  ;;  %v4464_v18 = vrot.slane %v10753_v31, 1 }
 0x1c6   : > { %v1815_v25 = vadd.f32 %v10903_v60, %v1666_v39  ;;  %v3152_v19 = vadd.f32 %v10903_v60, %v3009_v34  ;;  %8160 = vmatprep.mubr.msk.f32.mxu0 %vm431_vm2, %v11956_v58  ;;  %8360 = vmatprep.mubr.msk.f32.mxu1 %vm431_vm2, %v10568_v14  ;;  %v4465_v21 = vrot.slane %v10757_v53, 1 }
 0x1c7   : > { %1848 = vst.msk [vmem:[%s10920_s7 + $0x188] sm:$0xff] %vm431_vm2, %v1816_v57  ;;  %6640 = vst.msk [vmem:[%s10920_s7 + $0x198] sm:$0xff] %vm431_vm2, %v3153_v45 }
 0x1c8   : > { %1847 = vst.msk [vmem:[%s10920_s7 + $0x180] sm:$0xff] %vm431_vm2, %v1815_v25  ;;  %6639 = vst.msk [vmem:[%s10920_s7 + $0x190] sm:$0xff] %vm431_vm2, %v3152_v19  ;;  %v7797_v39 = vpop.f32.mrb[14].mxu0  ;;  %v7997_v34 = vpop.f32.mrb[14].mxu1 }
 0x1c9   : > { %v1818_v24 = vadd.f32 %v7797_v39, %v10903_v60  ;;  %v3155_v13 = vadd.f32 %v7997_v34, %v10903_v60  ;;  %v1676_v57 = vpop.f32.mrb[15].mxu0  ;;  %v3019_v45 = vpop.f32.mrb[15].mxu1  ;;  %8161 = vmatmul.mubr.msk.f32.gmra.mrb[56].mxu0 %vm431_vm2, %v11957_v54  ;;  %8361 = vmatmul.mubr.msk.f32.gmra.mrb[56].mxu1 %vm431_vm2, %v11104_v56  ;;  %v11131_v39 = vsel %vm348_vm1, %v10575_v22, %v4462_v11  ;;  %v4467_v34 = vrot.slane %v10764_v26, 1 }
 0x1ca   : > { %v1817_v25 = vadd.f32 %v10903_v60, %v1676_v57  ;;  %v3154_v19 = vadd.f32 %v10903_v60, %v3019_v45  ;;  %8163 = vmatprep.mubr.msk.f32.mxu0 %vm431_vm2, %v10550_v62  ;;  %8363 = vmatprep.mubr.msk.f32.mxu1 %vm431_vm2, %v10593_v52  ;;  %v11139_v54 = vsel %vm348_vm1, %v4464_v18, %v4465_v21  ;;  %v4469_v57 = vrot.slane %v10772_v17, 1 }
 0x1cb   : > { %1850 = vst.msk [vmem:[%s10920_s7 + $0x1c8] sm:$0xff] %vm431_vm2, %v1818_v24  ;;  %6642 = vst.msk [vmem:[%s10920_s7 + $0x1d8] sm:$0xff] %vm431_vm2, %v3155_v13  ;;  %v4470_v45 = vrot.slane %v10783_v48, 1 }
 0x1cc   : > { %1849 = vst.msk [vmem:[%s10920_s7 + $0x1c0] sm:$0xff] %vm431_vm2, %v1817_v25  ;;  %6641 = vst.msk [vmem:[%s10920_s7 + $0x1d0] sm:$0xff] %vm431_vm2, %v3154_v19  ;;  %v7800_v22 = vpop.f32.mrb[16].mxu0  ;;  %v8000_v11 = vpop.f32.mrb[16].mxu1 }
 0x1cd   : > { %v1820_v26 = vadd.f32 %v7800_v22, %v10903_v60  ;;  %v3157_v24 = vadd.f32 %v8000_v11, %v10903_v60  ;;  %v1686_v18 = vpop.f32.mrb[17].mxu0  ;;  %v3029_v13 = vpop.f32.mrb[17].mxu1  ;;  %8164 = vmatmul.mubr.msk.f32.gmra.mrb[58].mxu0 %vm431_vm2, %v11960_v28  ;;  %8364 = vmatmul.mubr.msk.f32.gmra.mrb[58].mxu1 %vm431_vm2, %v11131_v39  ;;  %v11160_v22 = vsel %vm348_vm1, %v4465_v21, %v4467_v34  ;;  %v4472_v11 = vrot.slane %v10793_v4, 1 }
 0x1ce   : > { %v1819_v25 = vadd.f32 %v10903_v60, %v1686_v18  ;;  %v3156_v19 = vadd.f32 %v10903_v60, %v3029_v13  ;;  %8166 = vmatprep.mubr.msk.f32.mxu0 %vm431_vm2, %v10753_v31  ;;  %8366 = vmatprep.mubr.msk.f32.mxu1 %vm431_vm2, %v11139_v54  ;;  %v11168_v28 = vsel %vm348_vm1, %v4469_v57, %v4470_v45  ;;  %v8831_v18 = vld [vmem:[%s8932_s27 + $0x38] sm:$0xff] }
 0x1cf   : > { %1852 = vst.msk [vmem:[%s10920_s7 + $0x208] sm:$0xff] %vm431_vm2, %v1820_v26  ;;  %6644 = vst.msk [vmem:[%s10920_s7 + $0x218] sm:$0xff] %vm431_vm2, %v3157_v24  ;;  %v5732_v13 = vrot.slane %v8831_v18, 2  ;;  %v5734_v18 = vrot.slane %v10776_v49, 2 }
 0x1d0   : > { %1851 = vst.msk [vmem:[%s10920_s7 + $0x200] sm:$0xff] %vm431_vm2, %v1819_v25  ;;  %6643 = vst.msk [vmem:[%s10920_s7 + $0x210] sm:$0xff] %vm431_vm2, %v3156_v19  ;;  %v7803_v31 = vpop.f32.mrb[18].mxu0  ;;  %v8003_v21 = vpop.f32.mrb[18].mxu1  ;;  %v11188_v19 = vsel %vm348_vm1, %v4470_v45, %v4472_v11 }
 0x1d1   : > { %v1822_v4 = vadd.f32 %v7803_v31, %v10903_v60  ;;  %v3159_v34 = vadd.f32 %v8003_v21, %v10903_v60  ;;  %v1696_v26 = vpop.f32.mrb[19].mxu0  ;;  %v3039_v57 = vpop.f32.mrb[19].mxu1  ;;  %8167 = vmatmul.mubr.msk.f32.gmra.mrb[60].mxu0 %vm431_vm2, %v10757_v53  ;;  %8367 = vmatmul.mubr.msk.f32.gmra.mrb[60].mxu1 %vm431_vm2, %v11160_v22  ;;  %v11985_v53 = vrot.slane %v10138_v51, 2  ;;  %v8832_v21 = vld [vmem:[%s8932_s27 + $0x50] sm:$0xff] }
 0x1d2   : > { %v1821_v24 = vadd.f32 %v10903_v60, %v1696_v26  ;;  %v3158_v25 = vadd.f32 %v10903_v60, %v3039_v57  ;;  %8169 = vmatprep.mubr.msk.f32.mxu0 %vm431_vm2, %v10772_v17  ;;  %8369 = vmatprep.mubr.msk.f32.mxu1 %vm431_vm2, %v11168_v28  ;;  %v5737_v26 = vrot.slane %v8832_v21, 2  ;;  %v8833_v21 = vld [vmem:[%s8932_s27 + $0x68] sm:$0xff] }
 0x1d3   : > { %1854 = vst.msk [vmem:[%s10920_s7 + $0x248] sm:$0xff] %vm431_vm2, %v1822_v4  ;;  %6646 = vst.msk [vmem:[%s10920_s7 + $0x258] sm:$0xff] %vm431_vm2, %v3159_v34  ;;  %v5733_v31 = vsel %vm1869_vm3, %v11985_v53, %v5732_v13 }
 0x1d4   : > { %1853 = vst.msk [vmem:[%s10920_s7 + $0x240] sm:$0xff] %vm431_vm2, %v1821_v24  ;;  %6645 = vst.msk [vmem:[%s10920_s7 + $0x250] sm:$0xff] %vm431_vm2, %v3158_v25  ;;  %v7806_v17 = vpop.f32.mrb[20].mxu0  ;;  %v8006_v45 = vpop.f32.mrb[20].mxu1  ;;  %v5735_v24 = vsel %vm1869_vm3, %v5732_v13, %v5734_v18  ;;  %v5739_v25 = vrot.slane %v10803_v46, 2 }
 0x1d5   : > { %v1824_v49 = vadd.f32 %v7806_v17, %v10903_v60  ;;  %v3161_v11 = vadd.f32 %v8006_v45, %v10903_v60  ;;  %v1706_v4 = vpop.f32.mrb[21].mxu0  ;;  %v3049_v51 = vpop.f32.mrb[21].mxu1  ;;  %8170 = vmatmul.mubr.msk.f32.gmra.mrb[62].mxu0 %vm431_vm2, %v10783_v48  ;;  %8370 = vmatmul.mubr.msk.f32.gmra.mrb[62].mxu1 %vm431_vm2, %v11188_v19  ;;  %v11986_v48 = vrot.slane %v10161_v38, 2  ;;  %v5742_v17 = vrot.slane %v8833_v21, 2 }
 0x1d6   : > { %v1823_v34 = vadd.f32 %v10903_v60, %v1706_v4  ;;  %v3160_v57 = vadd.f32 %v10903_v60, %v3049_v51  ;;  %8174 = vmatprep.mubr.msk.f32.mxu0 %vm431_vm2, %v10191_v61  ;;  %8374 = vmatprep.mubr.msk.f32.mxu1 %vm431_vm2, %v5733_v31  ;;  %v5744_v4 = vrot.slane %v10825_v33, 2 }
 0x1d7   : > { %1856 = vst.msk [vmem:[%s10920_s7 + $0x288] sm:$0xff] %vm431_vm2, %v1824_v49  ;;  %6648 = vst.msk [vmem:[%s10920_s7 + $0x298] sm:$0xff] %vm431_vm2, %v3161_v11  ;;  %v5738_v53 = vsel %vm1869_vm3, %v11986_v48, %v5737_v26  ;;  %v5740_v11 = vsel %vm1869_vm3, %v5737_v26, %v5739_v25 }
 0x1d8   : > { %1855 = vst.msk [vmem:[%s10920_s7 + $0x280] sm:$0xff] %vm431_vm2, %v1823_v34  ;;  %6647 = vst.msk [vmem:[%s10920_s7 + $0x290] sm:$0xff] %vm431_vm2, %v3160_v57  ;;  %v7809_v61 = vpop.f32.mrb[22].mxu0  ;;  %v8009_v13 = vpop.f32.mrb[22].mxu1  ;;  %v8834_v34 = vld [vmem:[%s8932_s27 + $0x80] sm:$0xff]  ;;  %v5745_v21 = vsel %vm1869_vm3, %v5742_v17, %v5744_v4  ;;  %v5754_v4 = vrot.slane %v10861_v30, 2 }
 0x1d9   : > { %v1826_v46 = vadd.f32 %v7809_v61, %v10903_v60  ;;  %v3163_v18 = vadd.f32 %v8009_v13, %v10903_v60  ;;  %v1716_v31 = vpop.f32.mrb[23].mxu0  ;;  %v3059_v38 = vpop.f32.mrb[23].mxu1  ;;  %8175 = vmatmul.mubr.msk.f32.vlgmr.msra.gmra.mrb[32].mxu0 %vm431_vm2, %v10821_v1  ;;  %8375 = vmatmul.mubr.msk.f32.vlgmr.msra.gmra.mrb[32].mxu1 %vm431_vm2, %v5735_v24  ;;  %v11987_v1 = vrot.slane %v10184_v8, 2  ;;  %v5747_v57 = vrot.slane %v8834_v34, 2 }
 0x1da   : > { %v1825_v45 = vadd.f32 %v10903_v60, %v1716_v31  ;;  %v3162_v49 = vadd.f32 %v10903_v60, %v3059_v38  ;;  %8177 = vmatprep.mubr.msk.f32.mxu0 %vm431_vm2, %v10230_v32  ;;  %8377 = vmatprep.mubr.msk.f32.mxu1 %vm431_vm2, %v5738_v53  ;;  %v5749_v61 = vrot.slane %v10845_v16, 2 }
 0x1db   : > { %1858 = vst.msk [vmem:[%s10920_s7 + $0x2c8] sm:$0xff] %vm431_vm2, %v1826_v46  ;;  %6650 = vst.msk [vmem:[%s10920_s7 + $0x2d8] sm:$0xff] %vm431_vm2, %v3163_v18  ;;  %v5743_v51 = vsel %vm1869_vm3, %v11987_v1, %v5742_v17  ;;  %v8835_v46 = vld [vmem:[%s8932_s27 + $0x98] sm:$0xff] }
 0x1dc   : > { %1857 = vst.msk [vmem:[%s10920_s7 + $0x2c0] sm:$0xff] %vm431_vm2, %v1825_v45  ;;  %6649 = vst.msk [vmem:[%s10920_s7 + $0x2d0] sm:$0xff] %vm431_vm2, %v3162_v49  ;;  %v7812_v32 = vpop.f32.mrb[24].mxu0  ;;  %v8012_v26 = vpop.f32.mrb[24].mxu1  ;;  %v5752_v18 = vrot.slane %v8835_v46, 2 }
 0x1dd   : > { %v1828_v33 = vadd.f32 %v7812_v32, %v10903_v60  ;;  %v3165_v24 = vadd.f32 %v8012_v26, %v10903_v60  ;;  %v1726_v25 = vpop.f32.mrb[25].mxu0  ;;  %v3069_v8 = vpop.f32.mrb[25].mxu1  ;;  %8178 = vmatmul.mubr.msk.f32.gmra.mrb[34].mxu0 %vm431_vm2, %v10837_v27  ;;  %8378 = vmatmul.mubr.msk.f32.gmra.mrb[34].mxu1 %vm431_vm2, %v5740_v11  ;;  %v11988_v27 = vrot.slane %v10236_v20, 2  ;;  %v5750_v11 = vsel %vm1869_vm3, %v5747_v57, %v5749_v61 }
 0x1de   : > { %v1827_v48 = vadd.f32 %v10903_v60, %v1726_v25  ;;  %v3164_v53 = vadd.f32 %v10903_v60, %v3069_v8  ;;  %8180 = vmatprep.mubr.msk.f32.mxu0 %vm431_vm2, %v10258_v35  ;;  %8380 = vmatprep.mubr.msk.f32.mxu1 %vm431_vm2, %v5743_v51  ;;  %v8836_v51 = vld [vmem:[%s8932_s27 + $0xb0] sm:$0xff]  ;;  %v5755_v8 = vsel %vm1869_vm3, %v5752_v18, %v5754_v4  ;;  %v11996_v4 = vld [vmem:[#allocation23_spill] sm:$0xff] }
 0x1df   : > { %1860 = vst.msk [vmem:[%s10920_s7 + $0x308] sm:$0xff] %vm431_vm2, %v1828_v33  ;;  %6652 = vst.msk [vmem:[%s10920_s7 + $0x318] sm:$0xff] %vm431_vm2, %v3165_v24  ;;  %v5748_v13 = vsel %vm1869_vm3, %v11988_v27, %v5747_v57  ;;  %v5757_v34 = vrot.slane %v8836_v51, 2  ;;  %v11990_v25 = vld [vmem:[#allocation52_spill] sm:$0xff]  ;;  %v8837_v27 = vld [vmem:[%s8932_s27 + $0xc8] sm:$0xff] }
 0x1e0   : > { %1859 = vst.msk [vmem:[%s10920_s7 + $0x300] sm:$0xff] %vm431_vm2, %v1827_v48  ;;  %6651 = vst.msk [vmem:[%s10920_s7 + $0x310] sm:$0xff] %vm431_vm2, %v3164_v53  ;;  %v7815_v35 = vpop.f32.mrb[26].mxu0  ;;  %v8015_v17 = vpop.f32.mrb[26].mxu1  ;;  %v11991_v48 = vld [vmem:[#allocation19_spill] sm:$0xff] }
 0x1e1   : > { %v1830_v16 = vadd.f32 %v7815_v35, %v10903_v60  ;;  %v3167_v31 = vadd.f32 %v8015_v17, %v10903_v60  ;;  %v1736_v38 = vpop.f32.mrb[27].mxu0  ;;  %v3079_v20 = vpop.f32.mrb[27].mxu1  ;;  %8181 = vmatmul.mubr.msk.f32.gmra.mrb[36].mxu0 %vm431_vm2, %v10857_v47  ;;  %8381 = vmatmul.mubr.msk.f32.gmra.mrb[36].mxu1 %vm431_vm2, %v5745_v21  ;;  %v11989_v47 = vrot.slane %v10271_v7, 2  ;;  %v5759_v53 = vrot.slane %v11991_v48, 2 }
 0x1e2   : > { %v1829_v45 = vadd.f32 %v10903_v60, %v1736_v38  ;;  %v3166_v49 = vadd.f32 %v10903_v60, %v3079_v20  ;;  %8183 = vmatprep.mubr.msk.f32.mxu0 %vm431_vm2, %v10296_v10  ;;  %8383 = vmatprep.mubr.msk.f32.mxu1 %vm431_vm2, %v5748_v13  ;;  %v5762_v13 = vrot.slane %v8837_v27, 2  ;;  %v11994_v38 = vld [vmem:[#allocation18_spill] sm:$0xff] }
 0x1e3   : > { %1862 = vst.msk [vmem:[%s10920_s7 + $0x348] sm:$0xff] %vm431_vm2, %v1830_v16  ;;  %6654 = vst.msk [vmem:[%s10920_s7 + $0x358] sm:$0xff] %vm431_vm2, %v3167_v31  ;;  %v5753_v1 = vsel %vm1869_vm3, %v11989_v47, %v5752_v18  ;;  %v5764_v47 = vrot.slane %v11996_v4, 2 }
 0x1e4   : > { %1861 = vst.msk [vmem:[%s10920_s7 + $0x340] sm:$0xff] %vm431_vm2, %v1829_v45  ;;  %6653 = vst.msk [vmem:[%s10920_s7 + $0x350] sm:$0xff] %vm431_vm2, %v3166_v49  ;;  %v7818_v10 = vpop.f32.mrb[28].mxu0  ;;  %v8018_v57 = vpop.f32.mrb[28].mxu1  ;;  %v11995_v49 = vld [vmem:[#allocation50_spill] sm:$0xff] }
 0x1e5   : > { %v1832_v30 = vadd.f32 %v7818_v10, %v10903_v60  ;;  %v3169_v32 = vadd.f32 %v8018_v57, %v10903_v60  ;;  %v1746_v26 = vpop.f32.mrb[29].mxu0  ;;  %v3089_v7 = vpop.f32.mrb[29].mxu1  ;;  %8184 = vmatmul.mubr.msk.f32.gmra.mrb[38].mxu0 %vm431_vm2, %v10873_v5  ;;  %8384 = vmatmul.mubr.msk.f32.gmra.mrb[38].mxu1 %vm431_vm2, %v5750_v11  ;;  %v11992_v5 = vld [vmem:[#allocation38_spill] sm:$0xff]  ;;  %v5760_v11 = vsel %vm1869_vm3, %v5757_v34, %v5759_v53 }
 0x1e6   : > { %v1831_v33 = vadd.f32 %v10903_v60, %v1746_v26  ;;  %v3168_v24 = vadd.f32 %v10903_v60, %v3089_v7  ;;  %8186 = vmatprep.mubr.msk.f32.mxu0 %vm431_vm2, %v11990_v25  ;;  %8386 = vmatprep.mubr.msk.f32.mxu1 %vm431_vm2, %v5753_v1  ;;  %v11993_v21 = vrot.slane %v11992_v5, 2  ;;  %v11997_v1 = vrot.slane %v10333_v43, 2  ;;  %v8838_v10 = vld [vmem:[%s8932_s27 + $0xe0] sm:$0xff]  ;;  %v8839_v7 = vld [vmem:[%s8932_s27 + $0xf8] sm:$0xff] }
 0x1e7   : > { %1864 = vst.msk [vmem:[%s10920_s7 + $0x388] sm:$0xff] %vm431_vm2, %v1832_v30  ;;  %6656 = vst.msk [vmem:[%s10920_s7 + $0x398] sm:$0xff] %vm431_vm2, %v3169_v32  ;;  %v5767_v57 = vrot.slane %v8838_v10, 2  ;;  %v5765_v43 = vsel %vm1869_vm3, %v5762_v13, %v5764_v47  ;;  %v11999_v32 = vrot.slane %v10364_v6, 2  ;;  %v12001_v6 = vrot.slane %v10395_v40, 2 }
 0x1e8   : > { %v5758_v61 = vsel %vm1869_vm3, %v11993_v21, %v5757_v34  ;;  %1863 = vst.msk [vmem:[%s10920_s7 + $0x380] sm:$0xff] %vm431_vm2, %v1831_v33  ;;  %6655 = vst.msk [vmem:[%s10920_s7 + $0x390] sm:$0xff] %vm431_vm2, %v3168_v24  ;;  %v7821_v46 = vpop.f32.mrb[30].mxu0  ;;  %v8021_v18 = vpop.f32.mrb[30].mxu1  ;;  %v5763_v51 = vsel %vm1869_vm3, %v11997_v1, %v5762_v13  ;;  %v11998_v34 = vld [vmem:[#allocation21_spill] sm:$0xff]  ;;  %v5772_v33 = vrot.slane %v8839_v7, 2 }
 0x1e9   : > { %v1834_v35 = vadd.f32 %v7821_v46, %v10903_v60  ;;  %v3171_v17 = vadd.f32 %v8021_v18, %v10903_v60  ;;  %v1756_v16 = vpop.f32.mrb[31].mxu0  ;;  %v3099_v31 = vpop.f32.mrb[31].mxu1  ;;  %8187 = vmatmul.mubr.msk.f32.gmra.mrb[40].mxu0 %vm431_vm2, %v11994_v38  ;;  %8387 = vmatmul.mubr.msk.f32.gmra.mrb[40].mxu1 %vm431_vm2, %v5755_v8  ;;  %v5769_v30 = vrot.slane %v11998_v34, 2  ;;  %v5768_v26 = vsel %vm1869_vm3, %v11999_v32, %v5767_v57  ;;  %v8840_v8 = vld [vmem:[%s8932_s27 + $0x110] sm:$0xff]  ;;  %v8841_v21 = vld [vmem:[%s8932_s27 + $0x128] sm:$0xff]  ;;  %v8842_v46 = vld [vmem:[%s8932_s27 + $0x140] sm:$0xff] }
 0x1ea   : > { %v1833_v20 = vadd.f32 %v10903_v60, %v1756_v16  ;;  %v3170_v45 = vadd.f32 %v10903_v60, %v3099_v31  ;;  %8189 = vmatprep.mubr.msk.f32.mxu0 %vm431_vm2, %v11995_v49  ;;  %8389 = vmatprep.mubr.msk.f32.mxu1 %vm431_vm2, %v5758_v61  ;;  %v5773_v25 = vsel %vm1869_vm3, %v12001_v6, %v5772_v33  ;;  %v5777_v48 = vrot.slane %v8840_v8, 2  ;;  %v8843_v16 = vld [vmem:[%s8932_s27 + $0x158] sm:$0xff] }
 0x1eb   : > { %1866 = vst.msk [vmem:[%s10920_s7 + $0x3c8] sm:$0xff] %vm431_vm2, %v1834_v35  ;;  %6658 = vst.msk [vmem:[%s10920_s7 + $0x3d8] sm:$0xff] %vm431_vm2, %v3171_v17  ;;  %v12003_v40 = vrot.slane %v11946_v9, 2  ;;  %v5782_v61 = vrot.slane %v8841_v21, 2  ;;  %v12005_v9 = vrot.slane %v11950_v12, 2  ;;  %v5787_v18 = vrot.slane %v8842_v46, 2 }
 0x1ec   : > { %1865 = vst.msk [vmem:[%s10920_s7 + $0x3c0] sm:$0xff] %vm431_vm2, %v1833_v20  ;;  %6657 = vst.msk [vmem:[%s10920_s7 + $0x3d0] sm:$0xff] %vm431_vm2, %v3170_v45  ;;  %v12007_v12 = vrot.slane %v11953_v63, 2  ;;  %v5792_v31 = vrot.slane %v8843_v16, 2  ;;  %v5794_v38 = vrot.slane %v11056_v2, 2  ;;  %v12009_v63 = vrot.slane %v11956_v58, 2 }
 0x1ed   : > { %8190 = vmatmul.mubr.msk.f32.gmra.mrb[42].mxu0 %vm431_vm2, %v10911_v41  ;;  %8390 = vmatmul.mubr.msk.f32.gmra.mrb[42].mxu1 %vm431_vm2, %v5760_v11  ;;  %v12000_v41 = vld [vmem:[#allocation25_spill] sm:$0xff]  ;;  %v5778_v5 = vsel %vm1869_vm3, %v12003_v40, %v5777_v48  ;;  %v5783_v13 = vsel %vm1869_vm3, %v12005_v9, %v5782_v61  ;;  %v8844_v45 = vld [vmem:[%s8932_s27 + $0x170] sm:$0xff]  ;;  %v5799_v2 = vrot.slane %v11084_v23, 2  ;;  %v12010_v58 = vrot.slane %v10550_v62, 2  ;;  %v12014_v23 = vld [vmem:[#allocation15_spill] sm:$0xff] }
 0x1ee   : > { %8192 = vmatprep.mubr.msk.f32.mxu0 %vm431_vm2, %v10382_v3  ;;  %8392 = vmatprep.mubr.msk.f32.mxu1 %vm431_vm2, %v5763_v51  ;;  %v5770_v3 = vsel %vm1869_vm3, %v5767_v57, %v5769_v30  ;;  %v5774_v24 = vrot.slane %v12000_v41, 2  ;;  %v5788_v17 = vsel %vm1869_vm3, %v12007_v12, %v5787_v18  ;;  %v5793_v20 = vsel %vm1869_vm3, %v12009_v63, %v5792_v31  ;;  %v12011_v62 = vld [vmem:[#allocation13_spill] sm:$0xff] }
 0x1ef   : > { %v5797_v49 = vrot.slane %v8844_v45, 2 }
 0x1f1   : > { %8193 = vmatmul.mubr.msk.f32.gmra.mrb[44].mxu0 %vm431_vm2, %v10936_v50  ;;  %8393 = vmatmul.mubr.msk.f32.gmra.mrb[44].mxu1 %vm431_vm2, %v5765_v43  ;;  %v12002_v50 = vld [vmem:[#allocation24_spill] sm:$0xff]  ;;  %v5798_v11 = vsel %vm1869_vm3, %v12010_v58, %v5797_v49 }
 0x1f2   : > { %8195 = vmatprep.mubr.msk.f32.mxu0 %vm431_vm2, %v10420_v42  ;;  %8395 = vmatprep.mubr.msk.f32.mxu1 %vm431_vm2, %v5768_v26  ;;  %v5775_v42 = vsel %vm1869_vm3, %v5772_v33, %v5774_v24  ;;  %v5779_v53 = vrot.slane %v12002_v50, 2 }
 0x1f5   : > { %8196 = vmatmul.mubr.msk.f32.gmra.mrb[46].mxu0 %vm431_vm2, %v10964_v29  ;;  %8396 = vmatmul.mubr.msk.f32.gmra.mrb[46].mxu1 %vm431_vm2, %v5770_v3  ;;  %v12004_v29 = vld [vmem:[#allocation30_spill] sm:$0xff] }
 0x1f6   : > { %8198 = vmatprep.mubr.msk.f32.mxu0 %vm431_vm2, %v11943_v37  ;;  %8398 = vmatprep.mubr.msk.f32.mxu1 %vm431_vm2, %v5773_v25  ;;  %v5780_v37 = vsel %vm1869_vm3, %v5777_v48, %v5779_v53  ;;  %v5784_v27 = vrot.slane %v12004_v29, 2 }
 0x1f9   : > { %8199 = vmatmul.mubr.msk.f32.gmra.mrb[48].mxu0 %vm431_vm2, %v10992_v0  ;;  %8399 = vmatmul.mubr.msk.f32.gmra.mrb[48].mxu1 %vm431_vm2, %v5775_v42  ;;  %v12006_v0 = vld [vmem:[#allocation27_spill] sm:$0xff] }
 0x1fa   : > { %8201 = vmatprep.mubr.msk.f32.mxu0 %vm431_vm2, %v11947_v55  ;;  %8401 = vmatprep.mubr.msk.f32.mxu1 %vm431_vm2, %v5778_v5  ;;  %v5785_v55 = vsel %vm1869_vm3, %v5782_v61, %v5784_v27  ;;  %v5789_v35 = vrot.slane %v12006_v0, 2 }
 0x1fd   : > { %8202 = vmatmul.mubr.msk.f32.gmra.mrb[50].mxu0 %vm431_vm2, %v11020_v36  ;;  %8402 = vmatmul.mubr.msk.f32.gmra.mrb[50].mxu1 %vm431_vm2, %v5780_v37  ;;  %v12008_v36 = vld [vmem:[#allocation7_spill] sm:$0xff] }
 0x1fe   : > { %8204 = vmatprep.mubr.msk.f32.mxu0 %vm431_vm2, %v10506_v15  ;;  %8404 = vmatprep.mubr.msk.f32.mxu1 %vm431_vm2, %v5783_v13  ;;  %v5790_v15 = vsel %vm1869_vm3, %v5787_v18, %v5789_v35 }
 0x201   : > { %8205 = vmatmul.mubr.msk.f32.gmra.mrb[52].mxu0 %vm431_vm2, %v11048_v44  ;;  %8405 = vmatmul.mubr.msk.f32.gmra.mrb[52].mxu1 %vm431_vm2, %v5785_v55  ;;  %v5795_v44 = vsel %vm1869_vm3, %v5792_v31, %v5794_v38 }
 0x202   : > { %8207 = vmatprep.mubr.msk.f32.mxu0 %vm431_vm2, %v12008_v36  ;;  %8407 = vmatprep.mubr.msk.f32.mxu1 %vm431_vm2, %v5788_v17 }
 0x205   : > { %8208 = vmatmul.mubr.msk.f32.gmra.mrb[54].mxu0 %vm431_vm2, %v11076_v59  ;;  %8408 = vmatmul.mubr.msk.f32.gmra.mrb[54].mxu1 %vm431_vm2, %v5790_v15  ;;  %v12013_v59 = vld [vmem:[#allocation17_spill] sm:$0xff] }
 0x206   : > { %8210 = vmatprep.mubr.msk.f32.mxu0 %vm431_vm2, %v10568_v14  ;;  %8410 = vmatprep.mubr.msk.f32.mxu1 %vm431_vm2, %v5793_v20  ;;  %v5800_v14 = vsel %vm1869_vm3, %v5797_v49, %v5799_v2 }
 0x209   : > { %8211 = vmatmul.mubr.msk.f32.gmra.mrb[56].mxu0 %vm431_vm2, %v11104_v56  ;;  %8411 = vmatmul.mubr.msk.f32.gmra.mrb[56].mxu1 %vm431_vm2, %v5795_v44 }
 0x20a   : > { %8213 = vmatprep.mubr.msk.f32.mxu0 %vm431_vm2, %v10593_v52  ;;  %8413 = vmatprep.mubr.msk.f32.mxu1 %vm431_vm2, %v5798_v11  ;;  %v12012_v52 = vld [vmem:[#allocation12_spill] sm:$0xff] }
 0x20d   : > { %8214 = vmatmul.mubr.msk.f32.gmra.mrb[58].mxu0 %vm431_vm2, %v11131_v39  ;;  %8414 = vmatmul.mubr.msk.f32.gmra.mrb[58].mxu1 %vm431_vm2, %v5800_v14 }
 0x20e   : > { %8216 = vmatprep.mubr.msk.f32.mxu0 %vm431_vm2, %v11139_v54  ;;  %8416 = vmatprep.mubr.msk.f32.mxu1 %vm431_vm2, %v12011_v62 }
 0x211   : > { %8217 = vmatmul.mubr.msk.f32.gmra.mrb[60].mxu0 %vm431_vm2, %v11160_v22  ;;  %8417 = vmatmul.mubr.msk.f32.gmra.mrb[60].mxu1 %vm431_vm2, %v12012_v52 }
 0x212   : > { %8219 = vmatprep.mubr.msk.f32.mxu0 %vm431_vm2, %v11168_v28  ;;  %8419 = vmatprep.mubr.msk.f32.mxu1 %vm431_vm2, %v12013_v59 }
 0x215   : > { %8220 = vmatmul.mubr.msk.f32.gmra.mrb[62].mxu0 %vm431_vm2, %v11188_v19  ;;  %8420 = vmatmul.mubr.msk.f32.gmra.mrb[62].mxu1 %vm431_vm2, %v12014_v23 }
 0x2ac   : > { %v8176_v56 = vpop.f32.mrb[32].mxu0  ;;  %v8376_v39 = vpop.f32.mrb[32].mxu1 }
 0x2ad   : > { %v4801_v54 = vadd.f32 %v8176_v56, %v10903_v60  ;;  %v6138_v22 = vadd.f32 %v8376_v39, %v10903_v60  ;;  %v4609_v4 = vpop.f32.mrb[33].mxu0  ;;  %v5946_v47 = vpop.f32.mrb[33].mxu1 }
 0x2ae   : > { %v4800_v28 = vadd.f32 %v10903_v60, %v4609_v4  ;;  %v6137_v1 = vadd.f32 %v10903_v60, %v5946_v47 }
 0x2af   : > { %6892 = vst.msk [vmem:[%s10920_s7 + $0x28] sm:$0xff] %vm431_vm2, %v4801_v54  ;;  %7060 = vst.msk [vmem:[%s10920_s7 + $0x38] sm:$0xff] %vm431_vm2, %v6138_v22 }
 0x2b0   : > { %6891 = vst.msk [vmem:[%s10920_s7 + $0x20] sm:$0xff] %vm431_vm2, %v4800_v28  ;;  %7059 = vst.msk [vmem:[%s10920_s7 + $0x30] sm:$0xff] %vm431_vm2, %v6137_v1  ;;  %v8179_v19 = vpop.f32.mrb[34].mxu0  ;;  %v8379_v51 = vpop.f32.mrb[34].mxu1 }
 0x2b1   : > { %v4803_v10 = vadd.f32 %v8179_v19, %v10903_v60  ;;  %v6140_v57 = vadd.f32 %v8379_v51, %v10903_v60  ;;  %v4619_v43 = vpop.f32.mrb[35].mxu0  ;;  %v5956_v34 = vpop.f32.mrb[35].mxu1 }
 0x2b2   : > { %v4802_v30 = vadd.f32 %v10903_v60, %v4619_v43  ;;  %v6139_v32 = vadd.f32 %v10903_v60, %v5956_v34 }
 0x2b3   : > { %6894 = vst.msk [vmem:[%s10920_s7 + $0x68] sm:$0xff] %vm431_vm2, %v4803_v10  ;;  %7062 = vst.msk [vmem:[%s10920_s7 + $0x78] sm:$0xff] %vm431_vm2, %v6140_v57 }
 0x2b4   : > { %6893 = vst.msk [vmem:[%s10920_s7 + $0x60] sm:$0xff] %vm431_vm2, %v4802_v30  ;;  %7061 = vst.msk [vmem:[%s10920_s7 + $0x70] sm:$0xff] %vm431_vm2, %v6139_v32  ;;  %v8182_v26 = vpop.f32.mrb[36].mxu0  ;;  %v8382_v7 = vpop.f32.mrb[36].mxu1 }
 0x2b5   : > { %v4805_v33 = vadd.f32 %v8182_v26, %v10903_v60  ;;  %v6142_v3 = vadd.f32 %v8382_v7, %v10903_v60  ;;  %v4629_v41 = vpop.f32.mrb[37].mxu0  ;;  %v5966_v24 = vpop.f32.mrb[37].mxu1 }
 0x2b6   : > { %v4804_v6 = vadd.f32 %v10903_v60, %v4629_v41  ;;  %v6141_v25 = vadd.f32 %v10903_v60, %v5966_v24 }
 0x2b7   : > { %6896 = vst.msk [vmem:[%s10920_s7 + $0xa8] sm:$0xff] %vm431_vm2, %v4805_v33  ;;  %7064 = vst.msk [vmem:[%s10920_s7 + $0xb8] sm:$0xff] %vm431_vm2, %v6142_v3  ;;  %v11580_v3 = vld [vmem:[%s11665_s2] ss:$0 sm:$0xff] }
 0x2b8   : > { %6895 = vst.msk [vmem:[%s10920_s7 + $0xa0] sm:$0xff] %vm431_vm2, %v4804_v6  ;;  %7063 = vst.msk [vmem:[%s10920_s7 + $0xb0] sm:$0xff] %vm431_vm2, %v6141_v25  ;;  %v8185_v8 = vpop.f32.mrb[38].mxu0  ;;  %v8385_v48 = vpop.f32.mrb[38].mxu1 }
 0x2b9   : > { %v4807_v42 = vadd.f32 %v8185_v8, %v10903_v60  ;;  %v6144_v50 = vadd.f32 %v8385_v48, %v10903_v60  ;;  %v4639_v53 = vpop.f32.mrb[39].mxu0  ;;  %v5976_v40 = vpop.f32.mrb[39].mxu1 }
 0x2ba   : > { %v4806_v5 = vadd.f32 %v10903_v60, %v4639_v53  ;;  %v6143_v21 = vadd.f32 %v10903_v60, %v5976_v40 }
 0x2bb   : > { %6898 = vst.msk [vmem:[%s10920_s7 + $0xe8] sm:$0xff] %vm431_vm2, %v4807_v42  ;;  %7066 = vst.msk [vmem:[%s10920_s7 + $0xf8] sm:$0xff] %vm431_vm2, %v6144_v50 }
 0x2bc   : > { %6897 = vst.msk [vmem:[%s10920_s7 + $0xe0] sm:$0xff] %vm431_vm2, %v4806_v5  ;;  %7065 = vst.msk [vmem:[%s10920_s7 + $0xf0] sm:$0xff] %vm431_vm2, %v6143_v21  ;;  %v8188_v61 = vpop.f32.mrb[40].mxu0  ;;  %v8388_v37 = vpop.f32.mrb[40].mxu1 }
 0x2bd   : > { %v4809_v29 = vadd.f32 %v8188_v61, %v10903_v60  ;;  %v6146_v27 = vadd.f32 %v8388_v37, %v10903_v60  ;;  %v4649_v9 = vpop.f32.mrb[41].mxu0  ;;  %v5986_v13 = vpop.f32.mrb[41].mxu1 }
 0x2be   : > { %v4808_v46 = vadd.f32 %v10903_v60, %v4649_v9  ;;  %v6145_v18 = vadd.f32 %v10903_v60, %v5986_v13 }
 0x2bf   : > { %6900 = vst.msk [vmem:[%s10920_s7 + $0x128] sm:$0xff] %vm431_vm2, %v4809_v29  ;;  %7068 = vst.msk [vmem:[%s10920_s7 + $0x138] sm:$0xff] %vm431_vm2, %v6146_v27 }
 0x2c0   : > { %6899 = vst.msk [vmem:[%s10920_s7 + $0x120] sm:$0xff] %vm431_vm2, %v4808_v46  ;;  %7067 = vst.msk [vmem:[%s10920_s7 + $0x130] sm:$0xff] %vm431_vm2, %v6145_v18  ;;  %v8191_v55 = vpop.f32.mrb[42].mxu0  ;;  %v8391_v0 = vpop.f32.mrb[42].mxu1 }
 0x2c1   : > { %v4811_v35 = vadd.f32 %v8191_v55, %v10903_v60  ;;  %v6148_v12 = vadd.f32 %v8391_v0, %v10903_v60  ;;  %v4659_v17 = vpop.f32.mrb[43].mxu0  ;;  %v5996_v16 = vpop.f32.mrb[43].mxu1 }
 0x2c2   : > { %v4810_v31 = vadd.f32 %v10903_v60, %v4659_v17  ;;  %v6147_v36 = vadd.f32 %v10903_v60, %v5996_v16 }
 0x2c3   : > { %6902 = vst.msk [vmem:[%s10920_s7 + $0x168] sm:$0xff] %vm431_vm2, %v4811_v35  ;;  %7070 = vst.msk [vmem:[%s10920_s7 + $0x178] sm:$0xff] %vm431_vm2, %v6148_v12 }
 0x2c4   : > { %6901 = vst.msk [vmem:[%s10920_s7 + $0x160] sm:$0xff] %vm431_vm2, %v4810_v31  ;;  %7069 = vst.msk [vmem:[%s10920_s7 + $0x170] sm:$0xff] %vm431_vm2, %v6147_v36  ;;  %v8194_v15 = vpop.f32.mrb[44].mxu0  ;;  %v8394_v38 = vpop.f32.mrb[44].mxu1 }
 0x2c5   : > { %v4813_v63 = vadd.f32 %v8194_v15, %v10903_v60  ;;  %v6150_v20 = vadd.f32 %v8394_v38, %v10903_v60  ;;  %v4669_v45 = vpop.f32.mrb[45].mxu0  ;;  %v6006_v49 = vpop.f32.mrb[45].mxu1 }
 0x2c6   : > { %v4812_v44 = vadd.f32 %v10903_v60, %v4669_v45  ;;  %v6149_v2 = vadd.f32 %v10903_v60, %v6006_v49 }
 0x2c7   : > { %6904 = vst.msk [vmem:[%s10920_s7 + $0x1a8] sm:$0xff] %vm431_vm2, %v4813_v63  ;;  %7072 = vst.msk [vmem:[%s10920_s7 + $0x1b8] sm:$0xff] %vm431_vm2, %v6150_v20 }
 0x2c8   : > { %6903 = vst.msk [vmem:[%s10920_s7 + $0x1a0] sm:$0xff] %vm431_vm2, %v4812_v44  ;;  %7071 = vst.msk [vmem:[%s10920_s7 + $0x1b0] sm:$0xff] %vm431_vm2, %v6149_v2  ;;  %v8197_v58 = vpop.f32.mrb[46].mxu0  ;;  %v8397_v11 = vpop.f32.mrb[46].mxu1 }
 0x2c9   : > { %v4815_v14 = vadd.f32 %v8197_v58, %v10903_v60  ;;  %v6152_v62 = vadd.f32 %v8397_v11, %v10903_v60  ;;  %v4679_v52 = vpop.f32.mrb[47].mxu0  ;;  %v6016_v59 = vpop.f32.mrb[47].mxu1 }
 0x2ca   : > { %v4814_v23 = vadd.f32 %v10903_v60, %v4679_v52  ;;  %v6151_v56 = vadd.f32 %v10903_v60, %v6016_v59 }
 0x2cb   : > { %6906 = vst.msk [vmem:[%s10920_s7 + $0x1e8] sm:$0xff] %vm431_vm2, %v4815_v14  ;;  %7074 = vst.msk [vmem:[%s10920_s7 + $0x1f8] sm:$0xff] %vm431_vm2, %v6152_v62 }
 0x2cc   : > { %6905 = vst.msk [vmem:[%s10920_s7 + $0x1e0] sm:$0xff] %vm431_vm2, %v4814_v23  ;;  %7073 = vst.msk [vmem:[%s10920_s7 + $0x1f0] sm:$0xff] %vm431_vm2, %v6151_v56  ;;  %v8200_v39 = vpop.f32.mrb[48].mxu0  ;;  %v8400_v54 = vpop.f32.mrb[48].mxu1 }
 0x2cd   : > { %v4817_v22 = vadd.f32 %v8200_v39, %v10903_v60  ;;  %v6154_v4 = vadd.f32 %v8400_v54, %v10903_v60  ;;  %v4689_v47 = vpop.f32.mrb[49].mxu0  ;;  %v6026_v28 = vpop.f32.mrb[49].mxu1 }
 0x2ce   : > { %v4816_v1 = vadd.f32 %v10903_v60, %v4689_v47  ;;  %v6153_v19 = vadd.f32 %v10903_v60, %v6026_v28 }
 0x2cf   : > { %6908 = vst.msk [vmem:[%s10920_s7 + $0x228] sm:$0xff] %vm431_vm2, %v4817_v22  ;;  %7076 = vst.msk [vmem:[%s10920_s7 + $0x238] sm:$0xff] %vm431_vm2, %v6154_v4 }
 0x2d0   : > { %6907 = vst.msk [vmem:[%s10920_s7 + $0x220] sm:$0xff] %vm431_vm2, %v4816_v1  ;;  %7075 = vst.msk [vmem:[%s10920_s7 + $0x230] sm:$0xff] %vm431_vm2, %v6153_v19  ;;  %v8203_v51 = vpop.f32.mrb[50].mxu0  ;;  %v8403_v10 = vpop.f32.mrb[50].mxu1 }
 0x2d1   : > { %v4819_v57 = vadd.f32 %v8203_v51, %v10903_v60  ;;  %v6156_v43 = vadd.f32 %v8403_v10, %v10903_v60  ;;  %v4699_v34 = vpop.f32.mrb[51].mxu0  ;;  %v6036_v30 = vpop.f32.mrb[51].mxu1 }
 0x2d2   : > { %v4818_v32 = vadd.f32 %v10903_v60, %v4699_v34  ;;  %v6155_v26 = vadd.f32 %v10903_v60, %v6036_v30 }
 0x2d3   : > { %6910 = vst.msk [vmem:[%s10920_s7 + $0x268] sm:$0xff] %vm431_vm2, %v4819_v57  ;;  %7078 = vst.msk [vmem:[%s10920_s7 + $0x278] sm:$0xff] %vm431_vm2, %v6156_v43 }
 0x2d4   : > { %6909 = vst.msk [vmem:[%s10920_s7 + $0x260] sm:$0xff] %vm431_vm2, %v4818_v32  ;;  %7077 = vst.msk [vmem:[%s10920_s7 + $0x270] sm:$0xff] %vm431_vm2, %v6155_v26  ;;  %v8206_v7 = vpop.f32.mrb[52].mxu0  ;;  %v8406_v33 = vpop.f32.mrb[52].mxu1 }
 0x2d5   : > { %v4821_v41 = vadd.f32 %v11580_v3, %v8206_v7  ;;  %v6158_v60 = vadd.f32 %v11580_v3, %v8406_v33  ;;  %v4709_v24 = vpop.f32.mrb[53].mxu0  ;;  %v6046_v6 = vpop.f32.mrb[53].mxu1 }
 0x2d6   : > { %v4820_v25 = vadd.f32 %v11580_v3, %v4709_v24  ;;  %v6157_v8 = vadd.f32 %v11580_v3, %v6046_v6 }
 0x2d7   : > { %6912 = vst.msk [vmem:[%s10920_s7 + $0x2a8] sm:$0xff] %vm431_vm2, %v4821_v41  ;;  %7080 = vst.msk [vmem:[%s10920_s7 + $0x2b8] sm:$0xff] %vm431_vm2, %v6158_v60 }
 0x2d8   : > { %6911 = vst.msk [vmem:[%s10920_s7 + $0x2a0] sm:$0xff] %vm431_vm2, %v4820_v25  ;;  %7079 = vst.msk [vmem:[%s10920_s7 + $0x2b0] sm:$0xff] %vm431_vm2, %v6157_v8  ;;  %v8209_v48 = vpop.f32.mrb[54].mxu0  ;;  %v8409_v42 = vpop.f32.mrb[54].mxu1 }
 0x2d9   : > { %v4823_v50 = vadd.f32 %v11580_v3, %v8209_v48  ;;  %v6160_v53 = vadd.f32 %v11580_v3, %v8409_v42  ;;  %v4719_v40 = vpop.f32.mrb[55].mxu0  ;;  %v6056_v5 = vpop.f32.mrb[55].mxu1 }
 0x2da   : > { %v4822_v21 = vadd.f32 %v11580_v3, %v4719_v40  ;;  %v6159_v61 = vadd.f32 %v11580_v3, %v6056_v5 }
 0x2db   : > { %6914 = vst.msk [vmem:[%s10920_s7 + $0x2e8] sm:$0xff] %vm431_vm2, %v4823_v50  ;;  %7082 = vst.msk [vmem:[%s10920_s7 + $0x2f8] sm:$0xff] %vm431_vm2, %v6160_v53 }
 0x2dc   : > { %6913 = vst.msk [vmem:[%s10920_s7 + $0x2e0] sm:$0xff] %vm431_vm2, %v4822_v21  ;;  %7081 = vst.msk [vmem:[%s10920_s7 + $0x2f0] sm:$0xff] %vm431_vm2, %v6159_v61  ;;  %v8212_v37 = vpop.f32.mrb[56].mxu0  ;;  %v8412_v29 = vpop.f32.mrb[56].mxu1 }
 0x2dd   : > { %v4825_v27 = vadd.f32 %v11580_v3, %v8212_v37  ;;  %v6162_v9 = vadd.f32 %v11580_v3, %v8412_v29  ;;  %v4729_v13 = vpop.f32.mrb[57].mxu0  ;;  %v6066_v46 = vpop.f32.mrb[57].mxu1 }
 0x2de   : > { %v4824_v18 = vadd.f32 %v11580_v3, %v4729_v13  ;;  %v6161_v55 = vadd.f32 %v11580_v3, %v6066_v46 }
 0x2df   : > { %6916 = vst.msk [vmem:[%s10920_s7 + $0x328] sm:$0xff] %vm431_vm2, %v4825_v27  ;;  %7084 = vst.msk [vmem:[%s10920_s7 + $0x338] sm:$0xff] %vm431_vm2, %v6162_v9 }
 0x2e0   : > { %6915 = vst.msk [vmem:[%s10920_s7 + $0x320] sm:$0xff] %vm431_vm2, %v4824_v18  ;;  %7083 = vst.msk [vmem:[%s10920_s7 + $0x330] sm:$0xff] %vm431_vm2, %v6161_v55  ;;  %v8215_v0 = vpop.f32.mrb[58].mxu0  ;;  %v8415_v35 = vpop.f32.mrb[58].mxu1 }
 0x2e1   : > { %v4827_v12 = vadd.f32 %v11580_v3, %v8215_v0  ;;  %v6164_v17 = vadd.f32 %v11580_v3, %v8415_v35  ;;  %v4739_v16 = vpop.f32.mrb[59].mxu0  ;;  %v6076_v31 = vpop.f32.mrb[59].mxu1 }
 0x2e2   : > { %v4826_v36 = vadd.f32 %v11580_v3, %v4739_v16  ;;  %v6163_v15 = vadd.f32 %v11580_v3, %v6076_v31 }
 0x2e3   : > { %6918 = vst.msk [vmem:[%s10920_s7 + $0x368] sm:$0xff] %vm431_vm2, %v4827_v12  ;;  %7086 = vst.msk [vmem:[%s10920_s7 + $0x378] sm:$0xff] %vm431_vm2, %v6164_v17 }
 0x2e4   : > { %6917 = vst.msk [vmem:[%s10920_s7 + $0x360] sm:$0xff] %vm431_vm2, %v4826_v36  ;;  %7085 = vst.msk [vmem:[%s10920_s7 + $0x370] sm:$0xff] %vm431_vm2, %v6163_v15  ;;  %v8218_v38 = vpop.f32.mrb[60].mxu0  ;;  %v8418_v63 = vpop.f32.mrb[60].mxu1 }
 0x2e5   : > { %v4829_v20 = vadd.f32 %v11580_v3, %v8218_v38  ;;  %v6166_v45 = vadd.f32 %v11580_v3, %v8418_v63  ;;  %v4749_v49 = vpop.f32.mrb[61].mxu0  ;;  %v6086_v44 = vpop.f32.mrb[61].mxu1 }
 0x2e6   : > { %v4828_v2 = vadd.f32 %v11580_v3, %v4749_v49  ;;  %v6165_v58 = vadd.f32 %v11580_v3, %v6086_v44 }
 0x2e7   : > { %6920 = vst.msk [vmem:[%s10920_s7 + $0x3a8] sm:$0xff] %vm431_vm2, %v4829_v20  ;;  %7088 = vst.msk [vmem:[%s10920_s7 + $0x3b8] sm:$0xff] %vm431_vm2, %v6166_v45 }
 0x2e8   : > { %6919 = vst.msk [vmem:[%s10920_s7 + $0x3a0] sm:$0xff] %vm431_vm2, %v4828_v2  ;;  %7087 = vst.msk [vmem:[%s10920_s7 + $0x3b0] sm:$0xff] %vm431_vm2, %v6165_v58  ;;  %v8221_v11 = vpop.f32.mrb[62].mxu0  ;;  %v8421_v14 = vpop.f32.mrb[62].mxu1 }
 0x2e9   : > { %v4831_v62 = vadd.f32 %v11580_v3, %v8221_v11  ;;  %v6168_v52 = vadd.f32 %v11580_v3, %v8421_v14  ;;  %v4759_v59 = vpop.f32.mrb[63].mxu0  ;;  %v6096_v23 = vpop.f32.mrb[63].mxu1 }
 0x2ea   : > { %v4830_v56 = vadd.f32 %v11580_v3, %v4759_v59  ;;  %v6167_v39 = vadd.f32 %v11580_v3, %v6096_v23 }
 0x2eb   : > { %6922 = vst.msk [vmem:[%s10920_s7 + $0x3e8] sm:$0xff] %vm431_vm2, %v4831_v62  ;;  %7090 = vst.msk [vmem:[%s10920_s7 + $0x3f8] sm:$0xff] %vm431_vm2, %v6168_v52 }
 0x2ec   : > { %6921 = vst.msk [vmem:[%s10920_s7 + $0x3e0] sm:$0xff] %vm431_vm2, %v4830_v56  ;;  %7089 = vst.msk [vmem:[%s10920_s7 + $0x3f0] sm:$0xff] %vm431_vm2, %v6167_v39 }
 0x2ed PF: > { %s13_s14 = sadd.s32 1, %s8868_s14   ;;  %s12015_s12 = smov %s8864_s13 }
 0x2ee   : > { %p10_p5 = scmp.ge.s32.totalorder %s13_s14, 4   ;;  %s12016_s13 = smov %s12018_s15 }
 0x2f0   :  { %12 = sbr.rel (!%p10_p5) target bundleno = 2 (0x2), region = 83 }

</bundles_post_ra>
